<compile_context>
chip_gen: v5e
topology: v5e:2x2
jax: 0.10.0
libtpu: 0.0.40
codegen_flags: <defaults>
</compile_context>

<pallas_src>
import functools
import math

import numpy as np
import jax
import jax.numpy as jnp
from jax import lax
from jax.experimental import pallas as pl
from jax.experimental.pallas import tpu as pltpu

# ---- small, TPU-friendly config (consistent with the module's __init__) ----
VOCAB = 256
BLOCK_SIZE = 16
N_EMBD = 128
N_HEAD = 4
N_LAYER = 2
HEAD_DIM = N_EMBD // N_HEAD
LN_EPS = 1e-5  # torch.nn.LayerNorm default


# ---------------------------------------------------------------------------
# in-kernel helpers
# ---------------------------------------------------------------------------
def _layernorm(x, w, b):
    mu = jnp.mean(x, axis=-1, keepdims=True)
    xc = x - mu
    var = jnp.mean(xc * xc, axis=-1, keepdims=True)
    return xc * lax.rsqrt(var + LN_EPS) * w + b


def _gelu_exact(x):
    # torch nn.GELU() default = exact erf-based GELU
    return 0.5 * x * (1.0 + lax.erf(x * (1.0 / math.sqrt(2.0))))


def _mm(a_f32, w_bf16):
    # explicit bf16 MXU pass with f32 accumulation
    return jnp.dot(a_f32.astype(jnp.bfloat16), w_bf16,
                   preferred_element_type=jnp.float32)


# ---------------------------------------------------------------------------
# one grid step == one transformer layer (step 0 also does the embedding,
# last step also does final LN + lm_head on the last token only)
# ---------------------------------------------------------------------------
def _echo_kernel(idx_ref, maskf_ref, maskl_ref, wte_ref, wpe_ref,
                 ln1w_ref, ln1b_ref, wqkv_ref, bqkv_ref, wproj_ref, bproj_ref,
                 ln2w_ref, ln2b_ref, wfc1_ref, bfc1_ref, wfc2_ref, bfc2_ref,
                 lnf_w_ref, lnf_b_ref, w_head_ref,
                 o_ref, x_ref,
                 *, batch, seq, n_head, head_dim, n_layer):
    B, T, H, D = batch, seq, n_head, head_dim
    C = H * D
    BT = B * T
    l = pl.program_id(0)

    # ---- step 0: fused token + position embedding (one-hot @ wte on MXU) ----
    @pl.when(l == 0)
    def _embed():
        ids = idx_ref[...]                                        # (BT, 1) int32
        onehot = (ids == lax.broadcasted_iota(jnp.int32, (BT, VOCAB), 1)
                  ).astype(jnp.bfloat16)                          # (BT, VOCAB)
        tok = jnp.dot(onehot, wte_ref[...],
                      preferred_element_type=jnp.float32)         # (BT, C) f32
        x0 = tok.reshape(B, T, C) + wpe_ref[0:T, :][None, :, :]
        x_ref[...] = x0.reshape(BT, C)

    def attn_heads(q, qkv, mask_bias):
        """q: (R, C) queries (scale pre-folded); K/V taken from qkv (BT, 3C)."""
        ctxs = []
        for hh in range(H):                                       # static unroll
            qh = q[:, hh * D:(hh + 1) * D]                        # (R, D)
            kh = qkv[:, C + hh * D:C + (hh + 1) * D]              # (BT, D)
            vh = qkv[:, 2 * C + hh * D:2 * C + (hh + 1) * D]      # (BT, D)
            s = lax.dot_general(qh, kh, (((1,), (1,)), ((), ())),
                                preferred_element_type=jnp.float32) + mask_bias
            s = s - jnp.max(s, axis=-1, keepdims=True)
            p = jnp.exp(s)
            p = p / jnp.sum(p, axis=-1, keepdims=True)            # exact divide
            ctxs.append(jnp.dot(p, vh, preferred_element_type=jnp.float32))
        return jnp.concatenate(ctxs, axis=-1)                     # (R, C)

    # ---- layers 0 .. n_layer-2: full-width block on all (BT) rows ----
    @pl.when(l < n_layer - 1)
    def _full_block():
        x = x_ref[...]                                            # (BT, C) f32
        h = _layernorm(x, ln1w_ref[...], ln1b_ref[...])
        qkv = _mm(h, wqkv_ref[...]) + bqkv_ref[...]               # ONE (BT,C)@(C,3C)
        ctx = attn_heads(qkv[:, 0:C], qkv, maskf_ref[...])        # (BT, C)
        x = x + _mm(ctx, wproj_ref[...]) + bproj_ref[...]         # ONE (BT,C)@(C,C)
        h2 = _layernorm(x, ln2w_ref[...], ln2b_ref[...])
        m = _gelu_exact(_mm(h2, wfc1_ref[...]) + bfc1_ref[...])
        x = x + _mm(m, wfc2_ref[...]) + bfc2_ref[...]
        x_ref[...] = x

    # ---- last layer: only the last-token rows feed the logits ----
    @pl.when(l == n_layer - 1)
    def _last_block():
        x = x_ref[...]                                            # (BT, C)
        h = _layernorm(x, ln1w_ref[...], ln1b_ref[...])           # K/V need all rows
        qkv = _mm(h, wqkv_ref[...]) + bqkv_ref[...]               # (BT, 3C)
        q_last = qkv[:, 0:C].reshape(B, T, C)[:, T - 1, :]        # (B, C)
        ctx = attn_heads(q_last, qkv, maskl_ref[...])             # (B, C)
        x_last = x.reshape(B, T, C)[:, T - 1, :]                  # (B, C)
        xl = x_last + _mm(ctx, wproj_ref[...]) + bproj_ref[...]
        h2 = _layernorm(xl, ln2w_ref[...], ln2b_ref[...])
        m = _gelu_exact(_mm(h2, wfc1_ref[...]) + bfc1_ref[...])   # GELU on (B,4C)
        xl = xl + _mm(m, wfc2_ref[...]) + bfc2_ref[...]
        hf = _layernorm(xl, lnf_w_ref[...], lnf_b_ref[...])
        o_ref[...] = _mm(hf, w_head_ref[...])                     # (B, VOCAB)


# ---------------------------------------------------------------------------
# parameter init (deterministic, matching the PyTorch init scheme)
# ---------------------------------------------------------------------------
def init_params(key):
    std = 0.02
    fc2_std = 0.02 / math.sqrt(2 * N_LAYER)
    keys = list(jax.random.split(key, 3 + 4 * N_LAYER))
    ki = iter(keys)
    C = N_EMBD

    def nrm(k, shape, s):
        return jax.random.normal(k, shape, jnp.float32) * s

    params = {
        "wte": nrm(next(ki), (VOCAB, C), std),
        "wpe": nrm(next(ki), (BLOCK_SIZE, C), std),
        "w_head": nrm(next(ki), (C, VOCAB), std),     # (in, out) layout
        "lnf_w": jnp.ones((1, C), jnp.float32),
        "lnf_b": jnp.zeros((1, C), jnp.float32),
        "blocks": [],
    }
    for _ in range(N_LAYER):
        params["blocks"].append({
            "ln1_w": jnp.ones((1, C), jnp.float32),
            "ln1_b": jnp.zeros((1, C), jnp.float32),
            "w_qkv": nrm(next(ki), (C, 3 * C), std),  # (in, out)
            "b_qkv": jnp.zeros((1, 3 * C), jnp.float32),
            "w_proj": nrm(next(ki), (C, C), std),
            "b_proj": jnp.zeros((1, C), jnp.float32),
            "ln2_w": jnp.ones((1, C), jnp.float32),
            "ln2_b": jnp.zeros((1, C), jnp.float32),
            "w_fc1": nrm(next(ki), (C, 4 * C), std),
            "b_fc1": jnp.zeros((1, 4 * C), jnp.float32),
            "w_fc2": nrm(next(ki), (4 * C, C), fc2_std),
            "b_fc2": jnp.zeros((1, C), jnp.float32),
        })
    return params


# ---------------------------------------------------------------------------
# wrapper-side repacking (done ONCE): layer-stacked, 1/sqrt(D) folded into the
# Q columns, matmul weights cast to bf16 (halves weight DMA).
# ---------------------------------------------------------------------------
def pack_params(params):
    C = N_EMBD
    scale = 1.0 / math.sqrt(HEAD_DIM)
    qcol = jnp.concatenate([jnp.full((C,), scale, jnp.float32),
                            jnp.ones((2 * C,), jnp.float32)])

    def stack(name):
        return jnp.stack([b[name] for b in params["blocks"]], axis=0)

    bf = lambda a: a.astype(jnp.bfloat16)
    w_qkv = stack("w_qkv") * qcol[None, None, :]
    b_qkv = stack("b_qkv") * qcol[None, None, :]
    return (
        bf(params["wte"]), params["wpe"],
        stack("ln1_w"), stack("ln1_b"),
        bf(w_qkv), b_qkv,
        bf(stack("w_proj")), stack("b_proj"),
        stack("ln2_w"), stack("ln2_b"),
        bf(stack("w_fc1")), stack("b_fc1"),
        bf(stack("w_fc2")), stack("b_fc2"),
        params["lnf_w"], params["lnf_b"],
        bf(params["w_head"]),
    )


def _build_masks(B, T):
    """Host (numpy, trace-time) additive masks: 0 keep, -1e30 drop."""
    BT = B * T
    i = np.arange(BT)
    same = (i[:, None] // T) == (i[None, :] // T)
    causal = (i[None, :] % T) <= (i[:, None] % T)
    full = np.where(same & causal, 0.0, -1e30).astype(np.float32)      # (BT, BT)
    last = np.where((i[None, :] // T) == np.arange(B)[:, None],
                    0.0, -1e30).astype(np.float32)                     # (B, BT)
    return jnp.asarray(full), jnp.asarray(last)


# ---------------------------------------------------------------------------
# full forward: ONE pallas_call with a layer grid (weights pipelined per layer)
# ---------------------------------------------------------------------------
def echo_forward(idx, packed):
    (wte, wpe, ln1w, ln1b, wqkv, bqkv, wproj, bproj,
     ln2w, ln2b, wfc1, bfc1, wfc2, bfc2, lnf_w, lnf_b, w_head) = packed
    B, T = idx.shape
    BT = B * T
    C = N_EMBD
    idx2 = idx.reshape(BT, 1).astype(jnp.int32)
    mask_full, mask_last = _build_masks(B, T)

    kernel = functools.partial(_echo_kernel, batch=B, seq=T, n_head=N_HEAD,
                               head_dim=HEAD_DIM, n_layer=N_LAYER)

    def const_spec(shape):          # 2-D constant: same block every grid step
        return pl.BlockSpec(shape, lambda l: (0, 0))

    def layer_spec(d1, d2):         # per-layer stack, leading dim squeezed
        return pl.BlockSpec((None, d1, d2), lambda l: (l, 0, 0))

    grid_spec = pltpu.PrefetchScalarGridSpec(
        num_scalar_prefetch=0,
        grid=(N_LAYER,),
        in_specs=[
            const_spec((BT, 1)),             # token ids
            const_spec((BT, BT)),            # block-diag causal additive mask
            const_spec((B, BT)),             # last-token additive mask
            const_spec((VOCAB, C)),          # wte (bf16)
            const_spec((BLOCK_SIZE, C)),     # wpe
            layer_spec(1, C), layer_spec(1, C),            # ln1 w, b
            layer_spec(C, 3 * C), layer_spec(1, 3 * C),    # qkv w, b
            layer_spec(C, C), layer_spec(1, C),            # proj w, b
            layer_spec(1, C), layer_spec(1, C),            # ln2 w, b
            layer_spec(C, 4 * C), layer_spec(1, 4 * C),    # fc1 w, b
            layer_spec(4 * C, C), layer_spec(1, C),        # fc2 w, b
            const_spec((1, C)), const_spec((1, C)),        # ln_final w, b
            const_spec((C, VOCAB)),                        # lm_head (bf16)
        ],
        out_specs=pl.BlockSpec((B, VOCAB), lambda l: (0, 0)),
        scratch_shapes=[pltpu.VMEM((BT, C), jnp.float32)],   # residual carry
    )

    logits = pl.pallas_call(
        kernel,
        grid_spec=grid_spec,
        out_shape=jax.ShapeDtypeStruct((B, VOCAB), jnp.float32),
        compiler_params=pltpu.CompilerParams(dimension_semantics=("arbitrary",)),
    )(idx2, mask_full, mask_last, wte, wpe,
      ln1w, ln1b, wqkv, bqkv, wproj, bproj,
      ln2w, ln2b, wfc1, bfc1, wfc2, bfc2, lnf_w, lnf_b, w_head)
    return logits[:, None, :]                                # (B, 1, vocab)


if __name__ == "__main__":
    B, T = 2, 8
    key = jax.random.PRNGKey(0)
    k_idx, k_params = jax.random.split(key)
    idx = jax.random.randint(k_idx, (B, T), 0, VOCAB, dtype=jnp.int32)
    params = init_params(k_params)
    packed = pack_params(params)                              # packed once

    fwd = jax.jit(echo_forward)
    logits = jax.block_until_ready(fwd(idx, packed))
    assert logits.shape == (B, 1, VOCAB)
    assert bool(jnp.all(jnp.isfinite(logits)))
    print("KERNEL_OK")
</pallas_src>

<mosaic_0001>
module attributes {stable_mosaic.version = 11 : i64} {
  func.func @_echo_kernel(%arg0: i32, %arg1: memref<16x1xi32, #tpu.memory_space<vmem>>, %arg2: memref<16x16xf32, #tpu.memory_space<vmem>>, %arg3: memref<2x16xf32, #tpu.memory_space<vmem>>, %arg4: memref<256x128xbf16, #tpu.memory_space<vmem>>, %arg5: memref<16x128xf32, #tpu.memory_space<vmem>>, %arg6: memref<1x1x128xf32, #tpu.memory_space<vmem>>, %arg7: memref<1x1x128xf32, #tpu.memory_space<vmem>>, %arg8: memref<1x128x384xbf16, #tpu.memory_space<vmem>>, %arg9: memref<1x1x384xf32, #tpu.memory_space<vmem>>, %arg10: memref<1x128x128xbf16, #tpu.memory_space<vmem>>, %arg11: memref<1x1x128xf32, #tpu.memory_space<vmem>>, %arg12: memref<1x1x128xf32, #tpu.memory_space<vmem>>, %arg13: memref<1x1x128xf32, #tpu.memory_space<vmem>>, %arg14: memref<1x128x512xbf16, #tpu.memory_space<vmem>>, %arg15: memref<1x1x512xf32, #tpu.memory_space<vmem>>, %arg16: memref<1x512x128xbf16, #tpu.memory_space<vmem>>, %arg17: memref<1x1x128xf32, #tpu.memory_space<vmem>>, %arg18: memref<1x128xf32, #tpu.memory_space<vmem>>, %arg19: memref<1x128xf32, #tpu.memory_space<vmem>>, %arg20: memref<128x256xbf16, #tpu.memory_space<vmem>>, %arg21: memref<2x256xf32, #tpu.memory_space<vmem>>, %arg22: memref<16x128xf32, #tpu.memory_space<vmem>>) attributes {dimension_semantics = [#tpu.dimension_semantics<arbitrary>], iteration_bounds = array<i64: 2>, scalar_prefetch = 0 : i64, scratch_operands = 1 : i64, tpu.core_type = #tpu.core_type<tc>, window_params = [{pipeline_mode = #tpu.pipeline_mode<synchronous>, transform_indices = @transform_0, window_bounds = array<i64: 16, 1>}, {pipeline_mode = #tpu.pipeline_mode<synchronous>, transform_indices = @transform_1, window_bounds = array<i64: 16, 16>}, {pipeline_mode = #tpu.pipeline_mode<synchronous>, transform_indices = @transform_2, window_bounds = array<i64: 2, 16>}, {pipeline_mode = #tpu.pipeline_mode<synchronous>, transform_indices = @transform_3, window_bounds = array<i64: 256, 128>}, {pipeline_mode = #tpu.pipeline_mode<synchronous>, transform_indices = @transform_4, window_bounds = array<i64: 16, 128>}, {transform_indices = @transform_5, window_bounds = array<i64: 1, 1, 128>}, {transform_indices = @transform_6, window_bounds = array<i64: 1, 1, 128>}, {transform_indices = @transform_7, window_bounds = array<i64: 1, 128, 384>}, {transform_indices = @transform_8, window_bounds = array<i64: 1, 1, 384>}, {transform_indices = @transform_9, window_bounds = array<i64: 1, 128, 128>}, {transform_indices = @transform_10, window_bounds = array<i64: 1, 1, 128>}, {transform_indices = @transform_11, window_bounds = array<i64: 1, 1, 128>}, {transform_indices = @transform_12, window_bounds = array<i64: 1, 1, 128>}, {transform_indices = @transform_13, window_bounds = array<i64: 1, 128, 512>}, {transform_indices = @transform_14, window_bounds = array<i64: 1, 1, 512>}, {transform_indices = @transform_15, window_bounds = array<i64: 1, 512, 128>}, {transform_indices = @transform_16, window_bounds = array<i64: 1, 1, 128>}, {pipeline_mode = #tpu.pipeline_mode<synchronous>, transform_indices = @transform_17, window_bounds = array<i64: 1, 128>}, {pipeline_mode = #tpu.pipeline_mode<synchronous>, transform_indices = @transform_18, window_bounds = array<i64: 1, 128>}, {pipeline_mode = #tpu.pipeline_mode<synchronous>, transform_indices = @transform_19, window_bounds = array<i64: 128, 256>}, {pipeline_mode = #tpu.pipeline_mode<synchronous>, transform_indices = @transform_20, window_bounds = array<i64: 2, 256>}]} {
    %c0_i32 = arith.constant 0 : i32
    %0 = arith.cmpi eq, %arg0, %c0_i32 : i32
    %1 = arith.extui %0 : i1 to i32
    %c0_i32_0 = arith.constant 0 : i32
    %2 = arith.cmpi ne, %1, %c0_i32_0 : i32
    scf.if %2 {
      %c0 = arith.constant 0 : index
      %c0_4 = arith.constant 0 : index
      %9 = vector.load %arg1[%c0, %c0_4] : memref<16x1xi32, #tpu.memory_space<vmem>>, vector<16x1xi32>
      %10 = tpu.iota {dimensions = array<i32: 1>} : vector<16x256xi32>
      %11 = vector.broadcast %9 : vector<16x1xi32> to vector<16x256xi32>
      %12 = arith.cmpi eq, %11, %10 : vector<16x256xi32>
      %13 = arith.extui %12 : vector<16x256xi1> to vector<16x256xi32>
      %14 = arith.sitofp %13 : vector<16x256xi32> to vector<16x256xf32>
      %15 = arith.truncf %14 : vector<16x256xf32> to vector<16x256xbf16>
      %c0_5 = arith.constant 0 : index
      %c0_6 = arith.constant 0 : index
      %16 = vector.load %arg4[%c0_5, %c0_6] : memref<256x128xbf16, #tpu.memory_space<vmem>>, vector<256x128xbf16>
      %cst = arith.constant dense<0.000000e+00> : vector<16x128xf32>
      %17 = tpu.matmul %15, %16, %cst {dimension_numbers = #tpu.dot_dimension_numbers<[1], [0], [0], [1], [0, 0, 1, 1], [], []>} : vector<16x256xbf16>, vector<256x128xbf16>, vector<16x128xf32> -> vector<16x128xf32>
      %18 = vector.shape_cast %17 : vector<16x128xf32> to vector<2x8x128xf32>
      %c0_7 = arith.constant 0 : index
      %c0_8 = arith.constant 0 : index
      %19 = vector.load %arg5[%c0_7, %c0_8] : memref<16x128xf32, #tpu.memory_space<vmem>>, vector<8x128xf32>
      %20 = vector.shape_cast %19 : vector<8x128xf32> to vector<1x8x128xf32>
      %21 = vector.broadcast %20 : vector<1x8x128xf32> to vector<2x8x128xf32>
      %22 = arith.addf %18, %21 : vector<2x8x128xf32>
      %23 = vector.shape_cast %22 : vector<2x8x128xf32> to vector<16x128xf32>
      %c0_9 = arith.constant 0 : index
      %c0_10 = arith.constant 0 : index
      %24 = vector.load %arg22[%c0_9, %c0_10] : memref<16x128xf32, #tpu.memory_space<vmem>>, vector<16x128xf32>
      tpu.vector_store %arg22[%c0_9, %c0_10], %23 {strides = array<i32>} : memref<16x128xf32, #tpu.memory_space<vmem>>, vector<16x128xf32>,
    } else {
    }
    %c1_i32 = arith.constant 1 : i32
    %3 = arith.cmpi slt, %arg0, %c1_i32 : i32
    %4 = arith.extui %3 : i1 to i32
    %c0_i32_1 = arith.constant 0 : i32
    %5 = arith.cmpi ne, %4, %c0_i32_1 : i32
    scf.if %5 {
      %c0 = arith.constant 0 : index
      %c0_4 = arith.constant 0 : index
      %9 = vector.load %arg22[%c0, %c0_4] : memref<16x128xf32, #tpu.memory_space<vmem>>, vector<16x128xf32>
      %c0_5 = arith.constant 0 : index
      %c0_6 = arith.constant 0 : index
      %c0_7 = arith.constant 0 : index
      %10 = vector.load %arg6[%c0_5, %c0_6, %c0_7] : memref<1x1x128xf32, #tpu.memory_space<vmem>>, vector<1x1x128xf32>
      %11 = vector.shape_cast %10 : vector<1x1x128xf32> to vector<1x128xf32>
      %c0_8 = arith.constant 0 : index
      %c0_9 = arith.constant 0 : index
      %c0_10 = arith.constant 0 : index
      %12 = vector.load %arg7[%c0_8, %c0_9, %c0_10] : memref<1x1x128xf32, #tpu.memory_space<vmem>>, vector<1x1x128xf32>
      %13 = vector.shape_cast %12 : vector<1x1x128xf32> to vector<1x128xf32>
      %cst = arith.constant dense<0.000000e+00> : vector<16xf32>
      %14 = vector.multi_reduction <add>, %9, %cst [1] : vector<16x128xf32> to vector<16xf32>
      %15 = vector.shape_cast %14 : vector<16xf32> to vector<16x1xf32>
      %cst_11 = arith.constant 1.280000e+02 : f32
      %16 = vector.broadcast %cst_11 : f32 to vector<16x1xf32>
      %17 = arith.divf %15, %16 : vector<16x1xf32>
      %18 = vector.broadcast %17 : vector<16x1xf32> to vector<16x128xf32>
      %19 = arith.subf %9, %18 : vector<16x128xf32>
      %20 = arith.mulf %19, %19 : vector<16x128xf32>
      %cst_12 = arith.constant dense<0.000000e+00> : vector<16xf32>
      %21 = vector.multi_reduction <add>, %20, %cst_12 [1] : vector<16x128xf32> to vector<16xf32>
      %22 = vector.shape_cast %21 : vector<16xf32> to vector<16x1xf32>
      %cst_13 = arith.constant 1.280000e+02 : f32
      %23 = vector.broadcast %cst_13 : f32 to vector<16x1xf32>
      %24 = arith.divf %22, %23 : vector<16x1xf32>
      %cst_14 = arith.constant 9.99999974E-6 : f32
      %25 = vector.broadcast %cst_14 : f32 to vector<16x1xf32>
      %26 = arith.addf %24, %25 : vector<16x1xf32>
      %27 = math.rsqrt %26 : vector<16x1xf32>
      %28 = vector.broadcast %27 : vector<16x1xf32> to vector<16x128xf32>
      %29 = arith.mulf %19, %28 : vector<16x128xf32>
      %30 = vector.broadcast %11 : vector<1x128xf32> to vector<16x128xf32>
      %31 = arith.mulf %29, %30 : vector<16x128xf32>
      %32 = vector.broadcast %13 : vector<1x128xf32> to vector<16x128xf32>
      %33 = arith.addf %31, %32 : vector<16x128xf32>
      %c0_15 = arith.constant 0 : index
      %c0_16 = arith.constant 0 : index
      %c0_17 = arith.constant 0 : index
      %34 = vector.load %arg8[%c0_15, %c0_16, %c0_17] : memref<1x128x384xbf16, #tpu.memory_space<vmem>>, vector<1x128x384xbf16>
      %35 = vector.shape_cast %34 : vector<1x128x384xbf16> to vector<128x384xbf16>
      %36 = arith.truncf %33 : vector<16x128xf32> to vector<16x128xbf16>
      %cst_18 = arith.constant dense<0.000000e+00> : vector<16x384xf32>
      %37 = tpu.matmul %36, %35, %cst_18 {dimension_numbers = #tpu.dot_dimension_numbers<[1], [0], [0], [1], [0, 0, 1, 1], [], []>} : vector<16x128xbf16>, vector<128x384xbf16>, vector<16x384xf32> -> vector<16x384xf32>
      %c0_19 = arith.constant 0 : index
      %c0_20 = arith.constant 0 : index
      %c0_21 = arith.constant 0 : index
      %38 = vector.load %arg9[%c0_19, %c0_20, %c0_21] : memref<1x1x384xf32, #tpu.memory_space<vmem>>, vector<1x1x384xf32>
      %39 = vector.shape_cast %38 : vector<1x1x384xf32> to vector<1x384xf32>
      %40 = vector.broadcast %39 : vector<1x384xf32> to vector<16x384xf32>
      %41 = arith.addf %37, %40 : vector<16x384xf32>
      %42 = vector.extract_strided_slice %41 {offsets = [0, 0], sizes = [16, 128], strides = [1, 1]} : vector<16x384xf32> to vector<16x128xf32>
      %c0_22 = arith.constant 0 : index
      %c0_23 = arith.constant 0 : index
      %43 = vector.load %arg2[%c0_22, %c0_23] : memref<16x16xf32, #tpu.memory_space<vmem>>, vector<16x16xf32>
      %44 = vector.extract_strided_slice %42 {offsets = [0, 0], sizes = [16, 32], strides = [1, 1]} : vector<16x128xf32> to vector<16x32xf32>
      %45 = vector.extract_strided_slice %41 {offsets = [0, 128], sizes = [16, 32], strides = [1, 1]} : vector<16x384xf32> to vector<16x32xf32>
      %46 = vector.extract_strided_slice %41 {offsets = [0, 256], sizes = [16, 32], strides = [1, 1]} : vector<16x384xf32> to vector<16x32xf32>
      %cst_24 = arith.constant dense<0.000000e+00> : vector<16x16xf32>
      %47 = tpu.matmul %44, %45, %cst_24 {dimension_numbers = #tpu.dot_dimension_numbers<[1], [1], [0], [0], [0, 0, 1, 0], [], []>} : vector<16x32xf32>, vector<16x32xf32>, vector<16x16xf32> -> vector<16x16xf32>
      %48 = arith.addf %47, %43 : vector<16x16xf32>
      %cst_25 = arith.constant dense<0xFF800000> : vector<16xf32>
      %49 = vector.multi_reduction <maximumf>, %48, %cst_25 [1] : vector<16x16xf32> to vector<16xf32>
      %50 = vector.shape_cast %49 : vector<16xf32> to vector<16x1xf32>
      %51 = vector.broadcast %50 : vector<16x1xf32> to vector<16x16xf32>
      %52 = arith.subf %48, %51 : vector<16x16xf32>
      %53 = math.exp %52 : vector<16x16xf32>
      %cst_26 = arith.constant dense<0.000000e+00> : vector<16xf32>
      %54 = vector.multi_reduction <add>, %53, %cst_26 [1] : vector<16x16xf32> to vector<16xf32>
      %55 = vector.shape_cast %54 : vector<16xf32> to vector<16x1xf32>
      %56 = vector.broadcast %55 : vector<16x1xf32> to vector<16x16xf32>
      %57 = arith.divf %53, %56 : vector<16x16xf32>
      %cst_27 = arith.constant dense<0.000000e+00> : vector<16x32xf32>
      %58 = tpu.matmul %57, %46, %cst_27 {dimension_numbers = #tpu.dot_dimension_numbers<[1], [0], [0], [1], [0, 0, 1, 1], [], []>} : vector<16x16xf32>, vector<16x32xf32>, vector<16x32xf32> -> vector<16x32xf32>
      %59 = vector.extract_strided_slice %42 {offsets = [0, 32], sizes = [16, 32], strides = [1, 1]} : vector<16x128xf32> to vector<16x32xf32>
      %60 = vector.extract_strided_slice %41 {offsets = [0, 160], sizes = [16, 32], strides = [1, 1]} : vector<16x384xf32> to vector<16x32xf32>
      %61 = vector.extract_strided_slice %41 {offsets = [0, 288], sizes = [16, 32], strides = [1, 1]} : vector<16x384xf32> to vector<16x32xf32>
      %cst_28 = arith.constant dense<0.000000e+00> : vector<16x16xf32>
      %62 = tpu.matmul %59, %60, %cst_28 {dimension_numbers = #tpu.dot_dimension_numbers<[1], [1], [0], [0], [0, 0, 1, 0], [], []>} : vector<16x32xf32>, vector<16x32xf32>, vector<16x16xf32> -> vector<16x16xf32>
      %63 = arith.addf %62, %43 : vector<16x16xf32>
      %cst_29 = arith.constant dense<0xFF800000> : vector<16xf32>
      %64 = vector.multi_reduction <maximumf>, %63, %cst_29 [1] : vector<16x16xf32> to vector<16xf32>
      %65 = vector.shape_cast %64 : vector<16xf32> to vector<16x1xf32>
      %66 = vector.broadcast %65 : vector<16x1xf32> to vector<16x16xf32>
      %67 = arith.subf %63, %66 : vector<16x16xf32>
      %68 = math.exp %67 : vector<16x16xf32>
      %cst_30 = arith.constant dense<0.000000e+00> : vector<16xf32>
      %69 = vector.multi_reduction <add>, %68, %cst_30 [1] : vector<16x16xf32> to vector<16xf32>
      %70 = vector.shape_cast %69 : vector<16xf32> to vector<16x1xf32>
      %71 = vector.broadcast %70 : vector<16x1xf32> to vector<16x16xf32>
      %72 = arith.divf %68, %71 : vector<16x16xf32>
      %cst_31 = arith.constant dense<0.000000e+00> : vector<16x32xf32>
      %73 = tpu.matmul %72, %61, %cst_31 {dimension_numbers = #tpu.dot_dimension_numbers<[1], [0], [0], [1], [0, 0, 1, 1], [], []>} : vector<16x16xf32>, vector<16x32xf32>, vector<16x32xf32> -> vector<16x32xf32>
      %74 = vector.extract_strided_slice %42 {offsets = [0, 64], sizes = [16, 32], strides = [1, 1]} : vector<16x128xf32> to vector<16x32xf32>
      %75 = vector.extract_strided_slice %41 {offsets = [0, 192], sizes = [16, 32], strides = [1, 1]} : vector<16x384xf32> to vector<16x32xf32>
      %76 = vector.extract_strided_slice %41 {offsets = [0, 320], sizes = [16, 32], strides = [1, 1]} : vector<16x384xf32> to vector<16x32xf32>
      %cst_32 = arith.constant dense<0.000000e+00> : vector<16x16xf32>
      %77 = tpu.matmul %74, %75, %cst_32 {dimension_numbers = #tpu.dot_dimension_numbers<[1], [1], [0], [0], [0, 0, 1, 0], [], []>} : vector<16x32xf32>, vector<16x32xf32>, vector<16x16xf32> -> vector<16x16xf32>
      %78 = arith.addf %77, %43 : vector<16x16xf32>
      %cst_33 = arith.constant dense<0xFF800000> : vector<16xf32>
      %79 = vector.multi_reduction <maximumf>, %78, %cst_33 [1] : vector<16x16xf32> to vector<16xf32>
      %80 = vector.shape_cast %79 : vector<16xf32> to vector<16x1xf32>
      %81 = vector.broadcast %80 : vector<16x1xf32> to vector<16x16xf32>
      %82 = arith.subf %78, %81 : vector<16x16xf32>
      %83 = math.exp %82 : vector<16x16xf32>
      %cst_34 = arith.constant dense<0.000000e+00> : vector<16xf32>
      %84 = vector.multi_reduction <add>, %83, %cst_34 [1] : vector<16x16xf32> to vector<16xf32>
      %85 = vector.shape_cast %84 : vector<16xf32> to vector<16x1xf32>
      %86 = vector.broadcast %85 : vector<16x1xf32> to vector<16x16xf32>
      %87 = arith.divf %83, %86 : vector<16x16xf32>
      %cst_35 = arith.constant dense<0.000000e+00> : vector<16x32xf32>
      %88 = tpu.matmul %87, %76, %cst_35 {dimension_numbers = #tpu.dot_dimension_numbers<[1], [0], [0], [1], [0, 0, 1, 1], [], []>} : vector<16x16xf32>, vector<16x32xf32>, vector<16x32xf32> -> vector<16x32xf32>
      %89 = vector.extract_strided_slice %42 {offsets = [0, 96], sizes = [16, 32], strides = [1, 1]} : vector<16x128xf32> to vector<16x32xf32>
      %90 = vector.extract_strided_slice %41 {offsets = [0, 224], sizes = [16, 32], strides = [1, 1]} : vector<16x384xf32> to vector<16x32xf32>
      %91 = vector.extract_strided_slice %41 {offsets = [0, 352], sizes = [16, 32], strides = [1, 1]} : vector<16x384xf32> to vector<16x32xf32>
      %cst_36 = arith.constant dense<0.000000e+00> : vector<16x16xf32>
      %92 = tpu.matmul %89, %90, %cst_36 {dimension_numbers = #tpu.dot_dimension_numbers<[1], [1], [0], [0], [0, 0, 1, 0], [], []>} : vector<16x32xf32>, vector<16x32xf32>, vector<16x16xf32> -> vector<16x16xf32>
      %93 = arith.addf %92, %43 : vector<16x16xf32>
      %cst_37 = arith.constant dense<0xFF800000> : vector<16xf32>
      %94 = vector.multi_reduction <maximumf>, %93, %cst_37 [1] : vector<16x16xf32> to vector<16xf32>
      %95 = vector.shape_cast %94 : vector<16xf32> to vector<16x1xf32>
      %96 = vector.broadcast %95 : vector<16x1xf32> to vector<16x16xf32>
      %97 = arith.subf %93, %96 : vector<16x16xf32>
      %98 = math.exp %97 : vector<16x16xf32>
      %cst_38 = arith.constant dense<0.000000e+00> : vector<16xf32>
      %99 = vector.multi_reduction <add>, %98, %cst_38 [1] : vector<16x16xf32> to vector<16xf32>
      %100 = vector.shape_cast %99 : vector<16xf32> to vector<16x1xf32>
      %101 = vector.broadcast %100 : vector<16x1xf32> to vector<16x16xf32>
      %102 = arith.divf %98, %101 : vector<16x16xf32>
      %cst_39 = arith.constant dense<0.000000e+00> : vector<16x32xf32>
      %103 = tpu.matmul %102, %91, %cst_39 {dimension_numbers = #tpu.dot_dimension_numbers<[1], [0], [0], [1], [0, 0, 1, 1], [], []>} : vector<16x16xf32>, vector<16x32xf32>, vector<16x32xf32> -> vector<16x32xf32>
      %104 = tpu.concatenate %58, %73, %88, %103 in 1 : vector<16x32xf32>, vector<16x32xf32>, vector<16x32xf32>, vector<16x32xf32> -> vector<16x128xf32>
      %c0_40 = arith.constant 0 : index
      %c0_41 = arith.constant 0 : index
      %c0_42 = arith.constant 0 : index
      %105 = vector.load %arg10[%c0_40, %c0_41, %c0_42] : memref<1x128x128xbf16, #tpu.memory_space<vmem>>, vector<1x128x128xbf16>
      %106 = vector.shape_cast %105 : vector<1x128x128xbf16> to vector<128x128xbf16>
      %107 = arith.truncf %104 : vector<16x128xf32> to vector<16x128xbf16>
      %cst_43 = arith.constant dense<0.000000e+00> : vector<16x128xf32>
      %108 = tpu.matmul %107, %106, %cst_43 {dimension_numbers = #tpu.dot_dimension_numbers<[1], [0], [0], [1], [0, 0, 1, 1], [], []>} : vector<16x128xbf16>, vector<128x128xbf16>, vector<16x128xf32> -> vector<16x128xf32>
      %109 = arith.addf %9, %108 : vector<16x128xf32>
      %c0_44 = arith.constant 0 : index
      %c0_45 = arith.constant 0 : index
      %c0_46 = arith.constant 0 : index
      %110 = vector.load %arg11[%c0_44, %c0_45, %c0_46] : memref<1x1x128xf32, #tpu.memory_space<vmem>>, vector<1x1x128xf32>
      %111 = vector.shape_cast %110 : vector<1x1x128xf32> to vector<1x128xf32>
      %112 = vector.broadcast %111 : vector<1x128xf32> to vector<16x128xf32>
      %113 = arith.addf %109, %112 : vector<16x128xf32>
      %c0_47 = arith.constant 0 : index
      %c0_48 = arith.constant 0 : index
      %c0_49 = arith.constant 0 : index
      %114 = vector.load %arg12[%c0_47, %c0_48, %c0_49] : memref<1x1x128xf32, #tpu.memory_space<vmem>>, vector<1x1x128xf32>
      %115 = vector.shape_cast %114 : vector<1x1x128xf32> to vector<1x128xf32>
      %c0_50 = arith.constant 0 : index
      %c0_51 = arith.constant 0 : index
      %c0_52 = arith.constant 0 : index
      %116 = vector.load %arg13[%c0_50, %c0_51, %c0_52] : memref<1x1x128xf32, #tpu.memory_space<vmem>>, vector<1x1x128xf32>
      %117 = vector.shape_cast %116 : vector<1x1x128xf32> to vector<1x128xf32>
      %cst_53 = arith.constant dense<0.000000e+00> : vector<16xf32>
      %118 = vector.multi_reduction <add>, %113, %cst_53 [1] : vector<16x128xf32> to vector<16xf32>
      %119 = vector.shape_cast %118 : vector<16xf32> to vector<16x1xf32>
      %cst_54 = arith.constant 1.280000e+02 : f32
      %120 = vector.broadcast %cst_54 : f32 to vector<16x1xf32>
      %121 = arith.divf %119, %120 : vector<16x1xf32>
      %122 = vector.broadcast %121 : vector<16x1xf32> to vector<16x128xf32>
      %123 = arith.subf %113, %122 : vector<16x128xf32>
      %124 = arith.mulf %123, %123 : vector<16x128xf32>
      %cst_55 = arith.constant dense<0.000000e+00> : vector<16xf32>
      %125 = vector.multi_reduction <add>, %124, %cst_55 [1] : vector<16x128xf32> to vector<16xf32>
      %126 = vector.shape_cast %125 : vector<16xf32> to vector<16x1xf32>
      %cst_56 = arith.constant 1.280000e+02 : f32
      %127 = vector.broadcast %cst_56 : f32 to vector<16x1xf32>
      %128 = arith.divf %126, %127 : vector<16x1xf32>
      %cst_57 = arith.constant 9.99999974E-6 : f32
      %129 = vector.broadcast %cst_57 : f32 to vector<16x1xf32>
      %130 = arith.addf %128, %129 : vector<16x1xf32>
      %131 = math.rsqrt %130 : vector<16x1xf32>
      %132 = vector.broadcast %131 : vector<16x1xf32> to vector<16x128xf32>
      %133 = arith.mulf %123, %132 : vector<16x128xf32>
      %134 = vector.broadcast %115 : vector<1x128xf32> to vector<16x128xf32>
      %135 = arith.mulf %133, %134 : vector<16x128xf32>
      %136 = vector.broadcast %117 : vector<1x128xf32> to vector<16x128xf32>
      %137 = arith.addf %135, %136 : vector<16x128xf32>
      %c0_58 = arith.constant 0 : index
      %c0_59 = arith.constant 0 : index
      %c0_60 = arith.constant 0 : index
      %138 = vector.load %arg14[%c0_58, %c0_59, %c0_60] : memref<1x128x512xbf16, #tpu.memory_space<vmem>>, vector<1x128x512xbf16>
      %139 = vector.shape_cast %138 : vector<1x128x512xbf16> to vector<128x512xbf16>
      %140 = arith.truncf %137 : vector<16x128xf32> to vector<16x128xbf16>
      %cst_61 = arith.constant dense<0.000000e+00> : vector<16x512xf32>
      %141 = tpu.matmul %140, %139, %cst_61 {dimension_numbers = #tpu.dot_dimension_numbers<[1], [0], [0], [1], [0, 0, 1, 1], [], []>} : vector<16x128xbf16>, vector<128x512xbf16>, vector<16x512xf32> -> vector<16x512xf32>
      %c0_62 = arith.constant 0 : index
      %c0_63 = arith.constant 0 : index
      %c0_64 = arith.constant 0 : index
      %142 = vector.load %arg15[%c0_62, %c0_63, %c0_64] : memref<1x1x512xf32, #tpu.memory_space<vmem>>, vector<1x1x512xf32>
      %143 = vector.shape_cast %142 : vector<1x1x512xf32> to vector<1x512xf32>
      %144 = vector.broadcast %143 : vector<1x512xf32> to vector<16x512xf32>
      %145 = arith.addf %141, %144 : vector<16x512xf32>
      %cst_65 = arith.constant 5.000000e-01 : f32
      %146 = vector.broadcast %cst_65 : f32 to vector<16x512xf32>
      %147 = arith.mulf %146, %145 : vector<16x512xf32>
      %cst_66 = arith.constant 0.707106769 : f32
      %148 = vector.broadcast %cst_66 : f32 to vector<16x512xf32>
      %149 = arith.mulf %145, %148 : vector<16x512xf32>
      %150 = math.erf %149 : vector<16x512xf32>
      %cst_67 = arith.constant 1.000000e+00 : f32
      %151 = vector.broadcast %cst_67 : f32 to vector<16x512xf32>
      %152 = arith.addf %151, %150 : vector<16x512xf32>
      %153 = arith.mulf %147, %152 : vector<16x512xf32>
      %c0_68 = arith.constant 0 : index
      %c0_69 = arith.constant 0 : index
      %c0_70 = arith.constant 0 : index
      %154 = vector.load %arg16[%c0_68, %c0_69, %c0_70] : memref<1x512x128xbf16, #tpu.memory_space<vmem>>, vector<1x512x128xbf16>
      %155 = vector.shape_cast %154 : vector<1x512x128xbf16> to vector<512x128xbf16>
      %156 = arith.truncf %153 : vector<16x512xf32> to vector<16x512xbf16>
      %cst_71 = arith.constant dense<0.000000e+00> : vector<16x128xf32>
      %157 = tpu.matmul %156, %155, %cst_71 {dimension_numbers = #tpu.dot_dimension_numbers<[1], [0], [0], [1], [0, 0, 1, 1], [], []>} : vector<16x512xbf16>, vector<512x128xbf16>, vector<16x128xf32> -> vector<16x128xf32>
      %158 = arith.addf %113, %157 : vector<16x128xf32>
      %c0_72 = arith.constant 0 : index
      %c0_73 = arith.constant 0 : index
      %c0_74 = arith.constant 0 : index
      %159 = vector.load %arg17[%c0_72, %c0_73, %c0_74] : memref<1x1x128xf32, #tpu.memory_space<vmem>>, vector<1x1x128xf32>
      %160 = vector.shape_cast %159 : vector<1x1x128xf32> to vector<1x128xf32>
      %161 = vector.broadcast %160 : vector<1x128xf32> to vector<16x128xf32>
      %162 = arith.addf %158, %161 : vector<16x128xf32>
      %c0_75 = arith.constant 0 : index
      %c0_76 = arith.constant 0 : index
      %163 = vector.load %arg22[%c0_75, %c0_76] : memref<16x128xf32, #tpu.memory_space<vmem>>, vector<16x128xf32>
      tpu.vector_store %arg22[%c0_75, %c0_76], %162 {strides = array<i32>} : memref<16x128xf32, #tpu.memory_space<vmem>>, vector<16x128xf32>,
    } else {
    }
    %c1_i32_2 = arith.constant 1 : i32
    %6 = arith.cmpi eq, %arg0, %c1_i32_2 : i32
    %7 = arith.extui %6 : i1 to i32
    %c0_i32_3 = arith.constant 0 : i32
    %8 = arith.cmpi ne, %7, %c0_i32_3 : i32
    scf.if %8 {
      %c0 = arith.constant 0 : index
      %c0_4 = arith.constant 0 : index
      %9 = vector.load %arg22[%c0, %c0_4] : memref<16x128xf32, #tpu.memory_space<vmem>>, vector<16x128xf32>
      %c0_5 = arith.constant 0 : index
      %c0_6 = arith.constant 0 : index
      %c0_7 = arith.constant 0 : index
      %10 = vector.load %arg6[%c0_5, %c0_6, %c0_7] : memref<1x1x128xf32, #tpu.memory_space<vmem>>, vector<1x1x128xf32>
      %11 = vector.shape_cast %10 : vector<1x1x128xf32> to vector<1x128xf32>
      %c0_8 = arith.constant 0 : index
      %c0_9 = arith.constant 0 : index
      %c0_10 = arith.constant 0 : index
      %12 = vector.load %arg7[%c0_8, %c0_9, %c0_10] : memref<1x1x128xf32, #tpu.memory_space<vmem>>, vector<1x1x128xf32>
      %13 = vector.shape_cast %12 : vector<1x1x128xf32> to vector<1x128xf32>
      %cst = arith.constant dense<0.000000e+00> : vector<16xf32>
      %14 = vector.multi_reduction <add>, %9, %cst [1] : vector<16x128xf32> to vector<16xf32>
      %15 = vector.shape_cast %14 : vector<16xf32> to vector<16x1xf32>
      %cst_11 = arith.constant 1.280000e+02 : f32
      %16 = vector.broadcast %cst_11 : f32 to vector<16x1xf32>
      %17 = arith.divf %15, %16 : vector<16x1xf32>
      %18 = vector.broadcast %17 : vector<16x1xf32> to vector<16x128xf32>
      %19 = arith.subf %9, %18 : vector<16x128xf32>
      %20 = arith.mulf %19, %19 : vector<16x128xf32>
      %cst_12 = arith.constant dense<0.000000e+00> : vector<16xf32>
      %21 = vector.multi_reduction <add>, %20, %cst_12 [1] : vector<16x128xf32> to vector<16xf32>
      %22 = vector.shape_cast %21 : vector<16xf32> to vector<16x1xf32>
      %cst_13 = arith.constant 1.280000e+02 : f32
      %23 = vector.broadcast %cst_13 : f32 to vector<16x1xf32>
      %24 = arith.divf %22, %23 : vector<16x1xf32>
      %cst_14 = arith.constant 9.99999974E-6 : f32
      %25 = vector.broadcast %cst_14 : f32 to vector<16x1xf32>
      %26 = arith.addf %24, %25 : vector<16x1xf32>
      %27 = math.rsqrt %26 : vector<16x1xf32>
      %28 = vector.broadcast %27 : vector<16x1xf32> to vector<16x128xf32>
      %29 = arith.mulf %19, %28 : vector<16x128xf32>
      %30 = vector.broadcast %11 : vector<1x128xf32> to vector<16x128xf32>
      %31 = arith.mulf %29, %30 : vector<16x128xf32>
      %32 = vector.broadcast %13 : vector<1x128xf32> to vector<16x128xf32>
      %33 = arith.addf %31, %32 : vector<16x128xf32>
      %c0_15 = arith.constant 0 : index
      %c0_16 = arith.constant 0 : index
      %c0_17 = arith.constant 0 : index
      %34 = vector.load %arg8[%c0_15, %c0_16, %c0_17] : memref<1x128x384xbf16, #tpu.memory_space<vmem>>, vector<1x128x384xbf16>
      %35 = vector.shape_cast %34 : vector<1x128x384xbf16> to vector<128x384xbf16>
      %36 = arith.truncf %33 : vector<16x128xf32> to vector<16x128xbf16>
      %cst_18 = arith.constant dense<0.000000e+00> : vector<16x384xf32>
      %37 = tpu.matmul %36, %35, %cst_18 {dimension_numbers = #tpu.dot_dimension_numbers<[1], [0], [0], [1], [0, 0, 1, 1], [], []>} : vector<16x128xbf16>, vector<128x384xbf16>, vector<16x384xf32> -> vector<16x384xf32>
      %c0_19 = arith.constant 0 : index
      %c0_20 = arith.constant 0 : index
      %c0_21 = arith.constant 0 : index
      %38 = vector.load %arg9[%c0_19, %c0_20, %c0_21] : memref<1x1x384xf32, #tpu.memory_space<vmem>>, vector<1x1x384xf32>
      %39 = vector.shape_cast %38 : vector<1x1x384xf32> to vector<1x384xf32>
      %40 = vector.broadcast %39 : vector<1x384xf32> to vector<16x384xf32>
      %41 = arith.addf %37, %40 : vector<16x384xf32>
      %42 = vector.extract_strided_slice %41 {offsets = [0, 0], sizes = [16, 128], strides = [1, 1]} : vector<16x384xf32> to vector<16x128xf32>
      %43 = vector.shape_cast %42 : vector<16x128xf32> to vector<2x8x128xf32>
      %44 = vector.extract_strided_slice %43 {offsets = [0, 7, 0], sizes = [2, 1, 128], strides = [1, 1, 1]} : vector<2x8x128xf32> to vector<2x1x128xf32>
      %45 = vector.shape_cast %44 : vector<2x1x128xf32> to vector<2x128xf32>
      %c0_22 = arith.constant 0 : index
      %c0_23 = arith.constant 0 : index
      %46 = vector.load %arg3[%c0_22, %c0_23] : memref<2x16xf32, #tpu.memory_space<vmem>>, vector<2x16xf32>
      %47 = vector.extract_strided_slice %45 {offsets = [0, 0], sizes = [2, 32], strides = [1, 1]} : vector<2x128xf32> to vector<2x32xf32>
      %48 = vector.extract_strided_slice %41 {offsets = [0, 128], sizes = [16, 32], strides = [1, 1]} : vector<16x384xf32> to vector<16x32xf32>
      %49 = vector.extract_strided_slice %41 {offsets = [0, 256], sizes = [16, 32], strides = [1, 1]} : vector<16x384xf32> to vector<16x32xf32>
      %cst_24 = arith.constant dense<0.000000e+00> : vector<2x16xf32>
      %50 = tpu.matmul %47, %48, %cst_24 {dimension_numbers = #tpu.dot_dimension_numbers<[1], [1], [0], [0], [0, 0, 1, 0], [], []>} : vector<2x32xf32>, vector<16x32xf32>, vector<2x16xf32> -> vector<2x16xf32>
      %51 = arith.addf %50, %46 : vector<2x16xf32>
      %cst_25 = arith.constant dense<0xFF800000> : vector<2xf32>
      %52 = vector.multi_reduction <maximumf>, %51, %cst_25 [1] : vector<2x16xf32> to vector<2xf32>
      %53 = vector.shape_cast %52 : vector<2xf32> to vector<2x1xf32>
      %54 = vector.broadcast %53 : vector<2x1xf32> to vector<2x16xf32>
      %55 = arith.subf %51, %54 : vector<2x16xf32>
      %56 = math.exp %55 : vector<2x16xf32>
      %cst_26 = arith.constant dense<0.000000e+00> : vector<2xf32>
      %57 = vector.multi_reduction <add>, %56, %cst_26 [1] : vector<2x16xf32> to vector<2xf32>
      %58 = vector.shape_cast %57 : vector<2xf32> to vector<2x1xf32>
      %59 = vector.broadcast %58 : vector<2x1xf32> to vector<2x16xf32>
      %60 = arith.divf %56, %59 : vector<2x16xf32>
      %cst_27 = arith.constant dense<0.000000e+00> : vector<2x32xf32>
      %61 = tpu.matmul %60, %49, %cst_27 {dimension_numbers = #tpu.dot_dimension_numbers<[1], [0], [0], [1], [0, 0, 1, 1], [], []>} : vector<2x16xf32>, vector<16x32xf32>, vector<2x32xf32> -> vector<2x32xf32>
      %62 = vector.extract_strided_slice %45 {offsets = [0, 32], sizes = [2, 32], strides = [1, 1]} : vector<2x128xf32> to vector<2x32xf32>
      %63 = vector.extract_strided_slice %41 {offsets = [0, 160], sizes = [16, 32], strides = [1, 1]} : vector<16x384xf32> to vector<16x32xf32>
      %64 = vector.extract_strided_slice %41 {offsets = [0, 288], sizes = [16, 32], strides = [1, 1]} : vector<16x384xf32> to vector<16x32xf32>
      %cst_28 = arith.constant dense<0.000000e+00> : vector<2x16xf32>
      %65 = tpu.matmul %62, %63, %cst_28 {dimension_numbers = #tpu.dot_dimension_numbers<[1], [1], [0], [0], [0, 0, 1, 0], [], []>} : vector<2x32xf32>, vector<16x32xf32>, vector<2x16xf32> -> vector<2x16xf32>
      %66 = arith.addf %65, %46 : vector<2x16xf32>
      %cst_29 = arith.constant dense<0xFF800000> : vector<2xf32>
      %67 = vector.multi_reduction <maximumf>, %66, %cst_29 [1] : vector<2x16xf32> to vector<2xf32>
      %68 = vector.shape_cast %67 : vector<2xf32> to vector<2x1xf32>
      %69 = vector.broadcast %68 : vector<2x1xf32> to vector<2x16xf32>
      %70 = arith.subf %66, %69 : vector<2x16xf32>
      %71 = math.exp %70 : vector<2x16xf32>
      %cst_30 = arith.constant dense<0.000000e+00> : vector<2xf32>
      %72 = vector.multi_reduction <add>, %71, %cst_30 [1] : vector<2x16xf32> to vector<2xf32>
      %73 = vector.shape_cast %72 : vector<2xf32> to vector<2x1xf32>
      %74 = vector.broadcast %73 : vector<2x1xf32> to vector<2x16xf32>
      %75 = arith.divf %71, %74 : vector<2x16xf32>
      %cst_31 = arith.constant dense<0.000000e+00> : vector<2x32xf32>
      %76 = tpu.matmul %75, %64, %cst_31 {dimension_numbers = #tpu.dot_dimension_numbers<[1], [0], [0], [1], [0, 0, 1, 1], [], []>} : vector<2x16xf32>, vector<16x32xf32>, vector<2x32xf32> -> vector<2x32xf32>
      %77 = vector.extract_strided_slice %45 {offsets = [0, 64], sizes = [2, 32], strides = [1, 1]} : vector<2x128xf32> to vector<2x32xf32>
      %78 = vector.extract_strided_slice %41 {offsets = [0, 192], sizes = [16, 32], strides = [1, 1]} : vector<16x384xf32> to vector<16x32xf32>
      %79 = vector.extract_strided_slice %41 {offsets = [0, 320], sizes = [16, 32], strides = [1, 1]} : vector<16x384xf32> to vector<16x32xf32>
      %cst_32 = arith.constant dense<0.000000e+00> : vector<2x16xf32>
      %80 = tpu.matmul %77, %78, %cst_32 {dimension_numbers = #tpu.dot_dimension_numbers<[1], [1], [0], [0], [0, 0, 1, 0], [], []>} : vector<2x32xf32>, vector<16x32xf32>, vector<2x16xf32> -> vector<2x16xf32>
      %81 = arith.addf %80, %46 : vector<2x16xf32>
      %cst_33 = arith.constant dense<0xFF800000> : vector<2xf32>
      %82 = vector.multi_reduction <maximumf>, %81, %cst_33 [1] : vector<2x16xf32> to vector<2xf32>
      %83 = vector.shape_cast %82 : vector<2xf32> to vector<2x1xf32>
      %84 = vector.broadcast %83 : vector<2x1xf32> to vector<2x16xf32>
      %85 = arith.subf %81, %84 : vector<2x16xf32>
      %86 = math.exp %85 : vector<2x16xf32>
      %cst_34 = arith.constant dense<0.000000e+00> : vector<2xf32>
      %87 = vector.multi_reduction <add>, %86, %cst_34 [1] : vector<2x16xf32> to vector<2xf32>
      %88 = vector.shape_cast %87 : vector<2xf32> to vector<2x1xf32>
      %89 = vector.broadcast %88 : vector<2x1xf32> to vector<2x16xf32>
      %90 = arith.divf %86, %89 : vector<2x16xf32>
      %cst_35 = arith.constant dense<0.000000e+00> : vector<2x32xf32>
      %91 = tpu.matmul %90, %79, %cst_35 {dimension_numbers = #tpu.dot_dimension_numbers<[1], [0], [0], [1], [0, 0, 1, 1], [], []>} : vector<2x16xf32>, vector<16x32xf32>, vector<2x32xf32> -> vector<2x32xf32>
      %92 = vector.extract_strided_slice %45 {offsets = [0, 96], sizes = [2, 32], strides = [1, 1]} : vector<2x128xf32> to vector<2x32xf32>
      %93 = vector.extract_strided_slice %41 {offsets = [0, 224], sizes = [16, 32], strides = [1, 1]} : vector<16x384xf32> to vector<16x32xf32>
      %94 = vector.extract_strided_slice %41 {offsets = [0, 352], sizes = [16, 32], strides = [1, 1]} : vector<16x384xf32> to vector<16x32xf32>
      %cst_36 = arith.constant dense<0.000000e+00> : vector<2x16xf32>
      %95 = tpu.matmul %92, %93, %cst_36 {dimension_numbers = #tpu.dot_dimension_numbers<[1], [1], [0], [0], [0, 0, 1, 0], [], []>} : vector<2x32xf32>, vector<16x32xf32>, vector<2x16xf32> -> vector<2x16xf32>
      %96 = arith.addf %95, %46 : vector<2x16xf32>
      %cst_37 = arith.constant dense<0xFF800000> : vector<2xf32>
      %97 = vector.multi_reduction <maximumf>, %96, %cst_37 [1] : vector<2x16xf32> to vector<2xf32>
      %98 = vector.shape_cast %97 : vector<2xf32> to vector<2x1xf32>
      %99 = vector.broadcast %98 : vector<2x1xf32> to vector<2x16xf32>
      %100 = arith.subf %96, %99 : vector<2x16xf32>
      %101 = math.exp %100 : vector<2x16xf32>
      %cst_38 = arith.constant dense<0.000000e+00> : vector<2xf32>
      %102 = vector.multi_reduction <add>, %101, %cst_38 [1] : vector<2x16xf32> to vector<2xf32>
      %103 = vector.shape_cast %102 : vector<2xf32> to vector<2x1xf32>
      %104 = vector.broadcast %103 : vector<2x1xf32> to vector<2x16xf32>
      %105 = arith.divf %101, %104 : vector<2x16xf32>
      %cst_39 = arith.constant dense<0.000000e+00> : vector<2x32xf32>
      %106 = tpu.matmul %105, %94, %cst_39 {dimension_numbers = #tpu.dot_dimension_numbers<[1], [0], [0], [1], [0, 0, 1, 1], [], []>} : vector<2x16xf32>, vector<16x32xf32>, vector<2x32xf32> -> vector<2x32xf32>
      %107 = tpu.concatenate %61, %76, %91, %106 in 1 : vector<2x32xf32>, vector<2x32xf32>, vector<2x32xf32>, vector<2x32xf32> -> vector<2x128xf32>
      %108 = vector.shape_cast %9 : vector<16x128xf32> to vector<2x8x128xf32>
      %109 = vector.extract_strided_slice %108 {offsets = [0, 7, 0], sizes = [2, 1, 128], strides = [1, 1, 1]} : vector<2x8x128xf32> to vector<2x1x128xf32>
      %110 = vector.shape_cast %109 : vector<2x1x128xf32> to vector<2x128xf32>
      %c0_40 = arith.constant 0 : index
      %c0_41 = arith.constant 0 : index
      %c0_42 = arith.constant 0 : index
      %111 = vector.load %arg10[%c0_40, %c0_41, %c0_42] : memref<1x128x128xbf16, #tpu.memory_space<vmem>>, vector<1x128x128xbf16>
      %112 = vector.shape_cast %111 : vector<1x128x128xbf16> to vector<128x128xbf16>
      %113 = arith.truncf %107 : vector<2x128xf32> to vector<2x128xbf16>
      %cst_43 = arith.constant dense<0.000000e+00> : vector<2x128xf32>
      %114 = tpu.matmul %113, %112, %cst_43 {dimension_numbers = #tpu.dot_dimension_numbers<[1], [0], [0], [1], [0, 0, 1, 1], [], []>} : vector<2x128xbf16>, vector<128x128xbf16>, vector<2x128xf32> -> vector<2x128xf32>
      %115 = arith.addf %110, %114 : vector<2x128xf32>
      %c0_44 = arith.constant 0 : index
      %c0_45 = arith.constant 0 : index
      %c0_46 = arith.constant 0 : index
      %116 = vector.load %arg11[%c0_44, %c0_45, %c0_46] : memref<1x1x128xf32, #tpu.memory_space<vmem>>, vector<1x1x128xf32>
      %117 = vector.shape_cast %116 : vector<1x1x128xf32> to vector<1x128xf32>
      %118 = vector.broadcast %117 : vector<1x128xf32> to vector<2x128xf32>
      %119 = arith.addf %115, %118 : vector<2x128xf32>
      %c0_47 = arith.constant 0 : index
      %c0_48 = arith.constant 0 : index
      %c0_49 = arith.constant 0 : index
      %120 = vector.load %arg12[%c0_47, %c0_48, %c0_49] : memref<1x1x128xf32, #tpu.memory_space<vmem>>, vector<1x1x128xf32>
      %121 = vector.shape_cast %120 : vector<1x1x128xf32> to vector<1x128xf32>
      %c0_50 = arith.constant 0 : index
      %c0_51 = arith.constant 0 : index
      %c0_52 = arith.constant 0 : index
      %122 = vector.load %arg13[%c0_50, %c0_51, %c0_52] : memref<1x1x128xf32, #tpu.memory_space<vmem>>, vector<1x1x128xf32>
      %123 = vector.shape_cast %122 : vector<1x1x128xf32> to vector<1x128xf32>
      %cst_53 = arith.constant dense<0.000000e+00> : vector<2xf32>
      %124 = vector.multi_reduction <add>, %119, %cst_53 [1] : vector<2x128xf32> to vector<2xf32>
      %125 = vector.shape_cast %124 : vector<2xf32> to vector<2x1xf32>
      %cst_54 = arith.constant 1.280000e+02 : f32
      %126 = vector.broadcast %cst_54 : f32 to vector<2x1xf32>
      %127 = arith.divf %125, %126 : vector<2x1xf32>
      %128 = vector.broadcast %127 : vector<2x1xf32> to vector<2x128xf32>
      %129 = arith.subf %119, %128 : vector<2x128xf32>
      %130 = arith.mulf %129, %129 : vector<2x128xf32>
      %cst_55 = arith.constant dense<0.000000e+00> : vector<2xf32>
      %131 = vector.multi_reduction <add>, %130, %cst_55 [1] : vector<2x128xf32> to vector<2xf32>
      %132 = vector.shape_cast %131 : vector<2xf32> to vector<2x1xf32>
      %cst_56 = arith.constant 1.280000e+02 : f32
      %133 = vector.broadcast %cst_56 : f32 to vector<2x1xf32>
      %134 = arith.divf %132, %133 : vector<2x1xf32>
      %cst_57 = arith.constant 9.99999974E-6 : f32
      %135 = vector.broadcast %cst_57 : f32 to vector<2x1xf32>
      %136 = arith.addf %134, %135 : vector<2x1xf32>
      %137 = math.rsqrt %136 : vector<2x1xf32>
      %138 = vector.broadcast %137 : vector<2x1xf32> to vector<2x128xf32>
      %139 = arith.mulf %129, %138 : vector<2x128xf32>
      %140 = vector.broadcast %121 : vector<1x128xf32> to vector<2x128xf32>
      %141 = arith.mulf %139, %140 : vector<2x128xf32>
      %142 = vector.broadcast %123 : vector<1x128xf32> to vector<2x128xf32>
      %143 = arith.addf %141, %142 : vector<2x128xf32>
      %c0_58 = arith.constant 0 : index
      %c0_59 = arith.constant 0 : index
      %c0_60 = arith.constant 0 : index
      %144 = vector.load %arg14[%c0_58, %c0_59, %c0_60] : memref<1x128x512xbf16, #tpu.memory_space<vmem>>, vector<1x128x512xbf16>
      %145 = vector.shape_cast %144 : vector<1x128x512xbf16> to vector<128x512xbf16>
      %146 = arith.truncf %143 : vector<2x128xf32> to vector<2x128xbf16>
      %cst_61 = arith.constant dense<0.000000e+00> : vector<2x512xf32>
      %147 = tpu.matmul %146, %145, %cst_61 {dimension_numbers = #tpu.dot_dimension_numbers<[1], [0], [0], [1], [0, 0, 1, 1], [], []>} : vector<2x128xbf16>, vector<128x512xbf16>, vector<2x512xf32> -> vector<2x512xf32>
      %c0_62 = arith.constant 0 : index
      %c0_63 = arith.constant 0 : index
      %c0_64 = arith.constant 0 : index
      %148 = vector.load %arg15[%c0_62, %c0_63, %c0_64] : memref<1x1x512xf32, #tpu.memory_space<vmem>>, vector<1x1x512xf32>
      %149 = vector.shape_cast %148 : vector<1x1x512xf32> to vector<1x512xf32>
      %150 = vector.broadcast %149 : vector<1x512xf32> to vector<2x512xf32>
      %151 = arith.addf %147, %150 : vector<2x512xf32>
      %cst_65 = arith.constant 5.000000e-01 : f32
      %152 = vector.broadcast %cst_65 : f32 to vector<2x512xf32>
      %153 = arith.mulf %152, %151 : vector<2x512xf32>
      %cst_66 = arith.constant 0.707106769 : f32
      %154 = vector.broadcast %cst_66 : f32 to vector<2x512xf32>
      %155 = arith.mulf %151, %154 : vector<2x512xf32>
      %156 = math.erf %155 : vector<2x512xf32>
      %cst_67 = arith.constant 1.000000e+00 : f32
      %157 = vector.broadcast %cst_67 : f32 to vector<2x512xf32>
      %158 = arith.addf %157, %156 : vector<2x512xf32>
      %159 = arith.mulf %153, %158 : vector<2x512xf32>
      %c0_68 = arith.constant 0 : index
      %c0_69 = arith.constant 0 : index
      %c0_70 = arith.constant 0 : index
      %160 = vector.load %arg16[%c0_68, %c0_69, %c0_70] : memref<1x512x128xbf16, #tpu.memory_space<vmem>>, vector<1x512x128xbf16>
      %161 = vector.shape_cast %160 : vector<1x512x128xbf16> to vector<512x128xbf16>
      %162 = arith.truncf %159 : vector<2x512xf32> to vector<2x512xbf16>
      %cst_71 = arith.constant dense<0.000000e+00> : vector<2x128xf32>
      %163 = tpu.matmul %162, %161, %cst_71 {dimension_numbers = #tpu.dot_dimension_numbers<[1], [0], [0], [1], [0, 0, 1, 1], [], []>} : vector<2x512xbf16>, vector<512x128xbf16>, vector<2x128xf32> -> vector<2x128xf32>
      %164 = arith.addf %119, %163 : vector<2x128xf32>
      %c0_72 = arith.constant 0 : index
      %c0_73 = arith.constant 0 : index
      %c0_74 = arith.constant 0 : index
      %165 = vector.load %arg17[%c0_72, %c0_73, %c0_74] : memref<1x1x128xf32, #tpu.memory_space<vmem>>, vector<1x1x128xf32>
      %166 = vector.shape_cast %165 : vector<1x1x128xf32> to vector<1x128xf32>
      %167 = vector.broadcast %166 : vector<1x128xf32> to vector<2x128xf32>
      %168 = arith.addf %164, %167 : vector<2x128xf32>
      %c0_75 = arith.constant 0 : index
      %c0_76 = arith.constant 0 : index
      %169 = vector.load %arg18[%c0_75, %c0_76] : memref<1x128xf32, #tpu.memory_space<vmem>>, vector<1x128xf32>
      %c0_77 = arith.constant 0 : index
      %c0_78 = arith.constant 0 : index
      %170 = vector.load %arg19[%c0_77, %c0_78] : memref<1x128xf32, #tpu.memory_space<vmem>>, vector<1x128xf32>
      %cst_79 = arith.constant dense<0.000000e+00> : vector<2xf32>
      %171 = vector.multi_reduction <add>, %168, %cst_79 [1] : vector<2x128xf32> to vector<2xf32>
      %172 = vector.shape_cast %171 : vector<2xf32> to vector<2x1xf32>
      %cst_80 = arith.constant 1.280000e+02 : f32
      %173 = vector.broadcast %cst_80 : f32 to vector<2x1xf32>
      %174 = arith.divf %172, %173 : vector<2x1xf32>
      %175 = vector.broadcast %174 : vector<2x1xf32> to vector<2x128xf32>
      %176 = arith.subf %168, %175 : vector<2x128xf32>
      %177 = arith.mulf %176, %176 : vector<2x128xf32>
      %cst_81 = arith.constant dense<0.000000e+00> : vector<2xf32>
      %178 = vector.multi_reduction <add>, %177, %cst_81 [1] : vector<2x128xf32> to vector<2xf32>
      %179 = vector.shape_cast %178 : vector<2xf32> to vector<2x1xf32>
      %cst_82 = arith.constant 1.280000e+02 : f32
      %180 = vector.broadcast %cst_82 : f32 to vector<2x1xf32>
      %181 = arith.divf %179, %180 : vector<2x1xf32>
      %cst_83 = arith.constant 9.99999974E-6 : f32
      %182 = vector.broadcast %cst_83 : f32 to vector<2x1xf32>
      %183 = arith.addf %181, %182 : vector<2x1xf32>
      %184 = math.rsqrt %183 : vector<2x1xf32>
      %185 = vector.broadcast %184 : vector<2x1xf32> to vector<2x128xf32>
      %186 = arith.mulf %176, %185 : vector<2x128xf32>
      %187 = vector.broadcast %169 : vector<1x128xf32> to vector<2x128xf32>
      %188 = arith.mulf %186, %187 : vector<2x128xf32>
      %189 = vector.broadcast %170 : vector<1x128xf32> to vector<2x128xf32>
      %190 = arith.addf %188, %189 : vector<2x128xf32>
      %c0_84 = arith.constant 0 : index
      %c0_85 = arith.constant 0 : index
      %191 = vector.load %arg20[%c0_84, %c0_85] : memref<128x256xbf16, #tpu.memory_space<vmem>>, vector<128x256xbf16>
      %192 = arith.truncf %190 : vector<2x128xf32> to vector<2x128xbf16>
      %cst_86 = arith.constant dense<0.000000e+00> : vector<2x256xf32>
      %193 = tpu.matmul %192, %191, %cst_86 {dimension_numbers = #tpu.dot_dimension_numbers<[1], [0], [0], [1], [0, 0, 1, 1], [], []>} : vector<2x128xbf16>, vector<128x256xbf16>, vector<2x256xf32> -> vector<2x256xf32>
      %c0_87 = arith.constant 0 : index
      %c0_88 = arith.constant 0 : index
      %194 = vector.load %arg21[%c0_87, %c0_88] : memref<2x256xf32, #tpu.memory_space<vmem>>, vector<2x256xf32>
      tpu.vector_store %arg21[%c0_87, %c0_88], %193 {strides = array<i32>} : memref<2x256xf32, #tpu.memory_space<vmem>>, vector<2x256xf32>,
    } else {
    }
    return
  }
  func.func @transform_0(%arg0: i32) -> (i32, i32) {
    %c0_i32 = arith.constant 0 : i32
    %c0_i32_0 = arith.constant 0 : i32
    %c0_i32_1 = arith.constant 0 : i32
    return %c0_i32, %c0_i32_0 : i32, i32
  }
  func.func @transform_1(%arg0: i32) -> (i32, i32) {
    %c0_i32 = arith.constant 0 : i32
    %c0_i32_0 = arith.constant 0 : i32
    %c0_i32_1 = arith.constant 0 : i32
    return %c0_i32, %c0_i32_0 : i32, i32
  }
  func.func @transform_2(%arg0: i32) -> (i32, i32) {
    %c0_i32 = arith.constant 0 : i32
    %c0_i32_0 = arith.constant 0 : i32
    %c0_i32_1 = arith.constant 0 : i32
    return %c0_i32, %c0_i32_0 : i32, i32
  }
  func.func @transform_3(%arg0: i32) -> (i32, i32) {
    %c0_i32 = arith.constant 0 : i32
    %c0_i32_0 = arith.constant 0 : i32
    %c0_i32_1 = arith.constant 0 : i32
    return %c0_i32, %c0_i32_0 : i32, i32
  }
  func.func @transform_4(%arg0: i32) -> (i32, i32) {
    %c0_i32 = arith.constant 0 : i32
    %c0_i32_0 = arith.constant 0 : i32
    %c0_i32_1 = arith.constant 0 : i32
    return %c0_i32, %c0_i32_0 : i32, i32
  }
  func.func @transform_5(%arg0: i32) -> (i32, i32, i32) {
    %c0_i32 = arith.constant 0 : i32
    %c0_i32_0 = arith.constant 0 : i32
    %c0_i32_1 = arith.constant 0 : i32
    return %arg0, %c0_i32, %c0_i32_0 : i32, i32, i32
  }
  func.func @transform_6(%arg0: i32) -> (i32, i32, i32) {
    %c0_i32 = arith.constant 0 : i32
    %c0_i32_0 = arith.constant 0 : i32
    %c0_i32_1 = arith.constant 0 : i32
    return %arg0, %c0_i32, %c0_i32_0 : i32, i32, i32
  }
  func.func @transform_7(%arg0: i32) -> (i32, i32, i32) {
    %c0_i32 = arith.constant 0 : i32
    %c0_i32_0 = arith.constant 0 : i32
    %c0_i32_1 = arith.constant 0 : i32
    return %arg0, %c0_i32, %c0_i32_0 : i32, i32, i32
  }
  func.func @transform_8(%arg0: i32) -> (i32, i32, i32) {
    %c0_i32 = arith.constant 0 : i32
    %c0_i32_0 = arith.constant 0 : i32
    %c0_i32_1 = arith.constant 0 : i32
    return %arg0, %c0_i32, %c0_i32_0 : i32, i32, i32
  }
  func.func @transform_9(%arg0: i32) -> (i32, i32, i32) {
    %c0_i32 = arith.constant 0 : i32
    %c0_i32_0 = arith.constant 0 : i32
    %c0_i32_1 = arith.constant 0 : i32
    return %arg0, %c0_i32, %c0_i32_0 : i32, i32, i32
  }
  func.func @transform_10(%arg0: i32) -> (i32, i32, i32) {
    %c0_i32 = arith.constant 0 : i32
    %c0_i32_0 = arith.constant 0 : i32
    %c0_i32_1 = arith.constant 0 : i32
    return %arg0, %c0_i32, %c0_i32_0 : i32, i32, i32
  }
  func.func @transform_11(%arg0: i32) -> (i32, i32, i32) {
    %c0_i32 = arith.constant 0 : i32
    %c0_i32_0 = arith.constant 0 : i32
    %c0_i32_1 = arith.constant 0 : i32
    return %arg0, %c0_i32, %c0_i32_0 : i32, i32, i32
  }
  func.func @transform_12(%arg0: i32) -> (i32, i32, i32) {
    %c0_i32 = arith.constant 0 : i32
    %c0_i32_0 = arith.constant 0 : i32
    %c0_i32_1 = arith.constant 0 : i32
    return %arg0, %c0_i32, %c0_i32_0 : i32, i32, i32
  }
  func.func @transform_13(%arg0: i32) -> (i32, i32, i32) {
    %c0_i32 = arith.constant 0 : i32
    %c0_i32_0 = arith.constant 0 : i32
    %c0_i32_1 = arith.constant 0 : i32
    return %arg0, %c0_i32, %c0_i32_0 : i32, i32, i32
  }
  func.func @transform_14(%arg0: i32) -> (i32, i32, i32) {
    %c0_i32 = arith.constant 0 : i32
    %c0_i32_0 = arith.constant 0 : i32
    %c0_i32_1 = arith.constant 0 : i32
    return %arg0, %c0_i32, %c0_i32_0 : i32, i32, i32
  }
  func.func @transform_15(%arg0: i32) -> (i32, i32, i32) {
    %c0_i32 = arith.constant 0 : i32
    %c0_i32_0 = arith.constant 0 : i32
    %c0_i32_1 = arith.constant 0 : i32
    return %arg0, %c0_i32, %c0_i32_0 : i32, i32, i32
  }
  func.func @transform_16(%arg0: i32) -> (i32, i32, i32) {
    %c0_i32 = arith.constant 0 : i32
    %c0_i32_0 = arith.constant 0 : i32
    %c0_i32_1 = arith.constant 0 : i32
    return %arg0, %c0_i32, %c0_i32_0 : i32, i32, i32
  }
  func.func @transform_17(%arg0: i32) -> (i32, i32) {
    %c0_i32 = arith.constant 0 : i32
    %c0_i32_0 = arith.constant 0 : i32
    %c0_i32_1 = arith.constant 0 : i32
    return %c0_i32, %c0_i32_0 : i32, i32
  }
  func.func @transform_18(%arg0: i32) -> (i32, i32) {
    %c0_i32 = arith.constant 0 : i32
    %c0_i32_0 = arith.constant 0 : i32
    %c0_i32_1 = arith.constant 0 : i32
    return %c0_i32, %c0_i32_0 : i32, i32
  }
  func.func @transform_19(%arg0: i32) -> (i32, i32) {
    %c0_i32 = arith.constant 0 : i32
    %c0_i32_0 = arith.constant 0 : i32
    %c0_i32_1 = arith.constant 0 : i32
    return %c0_i32, %c0_i32_0 : i32, i32
  }
  func.func @transform_20(%arg0: i32) -> (i32, i32) {
    %c0_i32 = arith.constant 0 : i32
    %c0_i32_0 = arith.constant 0 : i32
    %c0_i32_1 = arith.constant 0 : i32
    return %c0_i32, %c0_i32_0 : i32, i32
  }
}

</mosaic_0001>

<bundles_post_ra>
// kernel: echo_forward.1
= control target key start
LH: loop header
LB: loop body
LE: loop exit
PB: predicated region body
PF: predicated region fallthrough
CT: control target
= control target key end

     0   :  { %s8940_s0 = inlined_call_operand.vmem [shape: s32[16,1], index: 0, kind: input, shape index: {}]   ;;  %s8941_s1 = inlined_call_operand.vmem [shape: f32[16,16], index: 1, kind: input, shape index: {}]   ;;  %s8942_s2 = inlined_call_operand.vmem [shape: f32[2,16], index: 2, kind: input, shape index: {}]   ;;  %s8943_s3 = inlined_call_operand.hbm [shape: bf16[256,128], index: 3, kind: input, shape index: {}]   ;;  %s8944_s4 = inlined_call_operand.vmem [shape: f32[16,128], index: 4, kind: input, shape index: {}]   ;;  %s8945_s5 = inlined_call_operand.hbm [shape: f32[2,1,128], index: 5, kind: input, shape index: {}]   ;;  %s8946_s6 = inlined_call_operand.hbm [shape: f32[2,1,128], index: 6, kind: input, shape index: {}]   ;;  %s8947_s7 = inlined_call_operand.hbm [shape: bf16[2,128,384], index: 7, kind: input, shape index: {}]   ;;  %s8948_s8 = inlined_call_operand.hbm [shape: f32[2,1,384], index: 8, kind: input, shape index: {}]   ;;  %s8949_s9 = inlined_call_operand.hbm [shape: bf16[2,128,128], index: 9, kind: input, shape index: {}]   ;;  %s8950_s10 = inlined_call_operand.hbm [shape: f32[2,1,128], index: 10, kind: input, shape index: {}]   ;;  %s8951_s11 = inlined_call_operand.hbm [shape: f32[2,1,128], index: 11, kind: input, shape index: {}]   ;;  %s8952_s12 = inlined_call_operand.hbm [shape: f32[2,1,128], index: 12, kind: input, shape index: {}]   ;;  %s8953_s13 = inlined_call_operand.hbm [shape: bf16[2,128,512], index: 13, kind: input, shape index: {}]   ;;  %s8954_s14 = inlined_call_operand.hbm [shape: f32[2,1,512], index: 14, kind: input, shape index: {}]   ;;  %s8955_s15 = inlined_call_operand.hbm [shape: bf16[2,512,128], index: 15, kind: input, shape index: {}]   ;;  %s8956_s16 = inlined_call_operand.hbm [shape: f32[2,1,128], index: 16, kind: input, shape index: {}]   ;;  %s8957_s17 = inlined_call_operand.hbm [shape: f32[1,128], index: 17, kind: input, shape index: {}]   ;;  %s8958_s18 = inlined_call_operand.hbm [shape: f32[1,128], index: 18, kind: input, shape index: {}]   ;;  %s8959_s19 = inlined_call_operand.hbm [shape: bf16[128,256], index: 19, kind: input, shape index: {}]   ;;  %s8960_s20 = inlined_call_operand.vmem [shape: f32[2,256], index: 20, kind: output, shape index: {}]  }
   0x1   :  { %8979 = sst [smem:[#allocation43_spill]] %s8940_s0 }
   0x2   :  { %8980 = sst [smem:[#allocation44_spill]] %s8941_s1 }
   0x3   :  { %8981 = sst [smem:[#allocation45_spill]] %s8942_s2 }
   0x4   :  { %8982 = sst [smem:[#allocation46_spill]] %s8943_s3 }
   0x5   :  { %8983 = sst [smem:[#allocation47_spill]] %s8944_s4 }
   0x6   :  { %8984 = sst [smem:[#allocation48_spill]] %s8945_s5 }
   0x7   :  { %8985 = sst [smem:[#allocation49_spill]] %s8947_s7 }
   0x8   :  { %8986 = sst [smem:[#allocation50_spill]] %s8949_s9 }
   0x9   :  { %8987 = sst [smem:[#allocation51_spill]] %s8954_s14 }
   0xa   :  { %8988 = sst [smem:[#allocation52_spill]] %s8956_s16 }
   0xb   :  { %8989 = sst [smem:[#allocation53_spill]] %s8957_s17 }
   0xc   :  { %8990 = sst [smem:[#allocation54_spill]] %s8958_s18 }
   0xd   :  { %8991 = sst [smem:[#allocation55_spill]] %s8960_s20 }
   0xe   :  { %25 = vsyncpa [#allocation4], 0 }
   0xf   :  { %26 = vsyncpa [#allocation6], 0 }
  0x10   :  { %28 = vsyncpa [#allocation6 + $0x1], 0 }
  0x11   :  { %29 = vsyncpa [#allocation9], 0 }
  0x12   :  { %31 = vsyncpa [#allocation9 + $0x1], 0 }
  0x13   :  { %32 = vsyncpa [#allocation12], 0 }
  0x14   :  { %34 = vsyncpa [#allocation12 + $0x1], 0 }
  0x15   :  { %35 = vsyncpa [#allocation15], 0 }
  0x16   :  { %37 = vsyncpa [#allocation15 + $0x1], 0 }
  0x17   :  { %38 = vsyncpa [#allocation18], 0 }
  0x18   :  { %40 = vsyncpa [#allocation18 + $0x1], 0 }
  0x19   :  { %41 = vsyncpa [#allocation21], 0 }
  0x1a   :  { %43 = vsyncpa [#allocation21 + $0x1], 0 }
  0x1b   :  { %44 = vsyncpa [#allocation24], 0 }
  0x1c   :  { %45 = vsyncpa [#allocation27], 0  ;;  %s7381_s1 = smov 0   ;;  %s7383_s22 = smov 0  }
  0x1d   :  { %s7385_s23 = smov 0   ;;  %s7387_s24 = smov 0  }
  0x1e LB: > { %8992 = sst [smem:[#allocation37_spill]] %s7242_s22  ;;  %s7400_s2 = sadd.s32 4294967295, %s7250_s24   ;;  %s7250_s24 = sphi %s7387_s24, %s9042_s24   ;;  %s7246_s23 = sphi %s7385_s23, %s9046_s23   ;;  %s7242_s22 = sphi %s7383_s22, %s9045_s22   ;;  %s7238_s1 = sphi %s7381_s1, %s9043_s1  }
  0x1f   : > { %8993 = sst [smem:[#allocation38_spill]] %s7400_s2  ;;  %s7403_s25 = sadd.s32 1, %s7250_s24  }
  0x20   : > { %8994 = sst [smem:[#allocation39_spill]] %s7403_s25  ;;  %s160_s3 = ssub.s32 %s7250_s24, %s7403_s25 }
  0x21   : > { %s163_s26 = sadd.s32 1, %s7246_s23  ;;  %p161_p0 = scmp.eq.s32.totalorder %s160_s3, 0 }
  0x22   : > { %p170_p1 = scmp.ne.s32.totalorder %s7246_s23, %s7242_s22  ;;  %p171_p2 = scmp.eq.s32.totalorder %s7250_s24, 0 }
  0x23   : > { %p176_p3 = scmp.ne.s32.totalorder %s7242_s22, %s7238_s1  ;;  %p177_p5 = scmp.eq.s32.totalorder %s7400_s2, 0 }
  0x24   : > { %s7413_s27 = scalar_select %p161_p0, %s7246_s23, %s163_s26  }
  0x25   : > { %p7415_p4 = por %p171_p2, %p170_p1  ;;  %p5232_p6 = scmp.ge.s32.totalorder %s7250_s24, 1 }
  0x26   : > { %8995 = sst [smem:[#allocation40_spill]] %s7413_s27  ;;  %p557_p7 = scmp.lt.s32.totalorder %s7250_s24, 3 }
  0x27   : > { %p7424_p8 = por %p177_p5, %p176_p3  ;;  %p5233_p9 = scmp.ne.s32.totalorder %s7400_s2, 0 }
  0x28   : > { %p7429_p10 = pnand %p5232_p6, %p557_p7  ;;  %s9001_s17 = sld [smem:[#allocation53_spill]] }
  0x29   : > { %s8997_s4 = scalar_select %p7424_p8, 1, 0 }
  0x2a   : > { %s8999_s29 = scalar_select %p7429_p10, 1, 0 }
  0x2b   : > { %8998 = sst [smem:[#allocation41_spill]] %s8997_s4  ;;  %p6493_p11 = pneg %p7429_p10 }
  0x2c   : > { %9000 = sst [smem:[#allocation42_spill]] %s8999_s29  ;;  %s7252_s1 = smov [#allocation23]  }
  0x2d   : > { %s597_s3 = sshll.u32 %s7252_s1, 4  ;;  %s9002_s25 = sld [smem:[#allocation46_spill]]  ;;  %s598_s3 = int_to_ptr.vmem [resolvable:$true] %s597_s3 }
  0x2e   : > { %s595_s21 = sshll.u32 %s9001_s17, 4  ;;  %p7443_p12 = pnand %p6493_p11, %p177_p5  ;;  %s596_s21 = int_to_ptr.hbm [resolvable:$true] %s595_s21 }
  0x2f   : > { %s7253_s30 = smov [#allocation3]   ;;  %s7254_s1 = smov 64  }
  0x30   : > { %s579_s0 = sshll.u32 %s7253_s30, 4  ;;  %s7255_s17 = smov 4   ;;  %s580_s0 = int_to_ptr.vmem [resolvable:$true] %s579_s0 }
  0x31   : > { %6499 = dma.hbm_to_vmem [thread:$0]  (!%p7443_p12), %s596_s21, 16, %s598_s3, [#allocation24]  }
  0x32   : > { %s9004_s18 = sld [smem:[#allocation54_spill]]  ;;  %s7256_s22 = smov [#allocation25]  }
  0x33   : > { %s577_s20 = sshll.u32 %s9002_s25, 4  ;;  %s609_s2 = sshll.u32 %s7256_s22, 4  ;;  %s578_s20 = int_to_ptr.hbm [resolvable:$true] %s577_s20  ;;  %s610_s2 = int_to_ptr.vmem [resolvable:$true] %s609_s2 }
  0x34   : > { %6496 = dma.hbm_to_vmem [thread:$0]  (!%p7443_p12), %s578_s20, 2048, %s580_s0, [#allocation4], %s7254_s1, %s7254_s1, %s7255_s17  }
  0x35   : > { %s618_s30 = sshll.u32 %s8959_s19, 4  ;;  %s7257_s21 = smov [#allocation26]   ;;  %s619_s30 = int_to_ptr.hbm [resolvable:$true] %s618_s30 }
  0x36   : > { %s620_s3 = sshll.u32 %s7257_s21, 4  ;;  %s7258_s14 = smov 128   ;;  %s621_s3 = int_to_ptr.vmem [resolvable:$true] %s620_s3 }
  0x37   : > { %s7259_s17 = smov 8   ;;  %p5237_p13 = scmp.ge.s32.totalorder %s7250_s24, 2 }
  0x38   : > { %s607_s26 = sshll.u32 %s9004_s18, 4  ;;  %s7463_s20 = sand.u32 (!%p5237_p13), 1, %s7250_s24   ;;  %s608_s26 = int_to_ptr.hbm [resolvable:$true] %s607_s26 }
  0x39   : > { %6502 = dma.hbm_to_vmem [thread:$0]  (!%p7443_p12), %s608_s26, 16, %s610_s2, [#allocation24]  }
  0x3a   : > { %6505 = dma.hbm_to_vmem [thread:$0]  (!%p7443_p12), %s619_s30, 2048, %s621_s3, [#allocation27], %s7258_s14, %s7258_s14, %s7259_s17  }
  0x3b   : > { %630 = sbr.rel (%p5237_p13) target bundleno = 266 (0x10a), region = 48  ;;  %s7466_s16 = sand.u32 (!%p5237_p13), 1, %s7246_s23  }
  0x3c   : > { %s9005_s5 = sld [smem:[#allocation48_spill]] (!%p5237_p13)  ;;  %s637_s0 = scalar_lea.vmem (!%p5237_p13), [#allocation5], %s7466_s16 }
  0x3d   : > { %s644_s4 = sshll.u32 (!%p5237_p13), %s637_s0, 4  ;;  %s8973_s1 = scalar_lea.sflag (!%p5237_p13), [#allocation6], %s7463_s20  ;;  %s645_s4 = int_to_ptr.vmem [resolvable:$true] %s644_s4 }
  0x42   : > { %s640_s29 = scalar_lea.hbm %s9005_s5, %s7250_s24  ;;  %s6854_s21 = scalar_lea.hbm %s9005_s5, 2 }
  0x43   : > { %s642_s14 = sshll.u32 %s640_s29, 4  ;;  %s643_s14 = int_to_ptr.hbm [resolvable:$true] %s642_s14 }
  0x44   : > { %s6848_s25 = sshra.s32 %s643_s14, 4  ;;  %s6849_s25 = int_to_ptr.hbm [resolvable:$true] %s6848_s25 }
  0x45   : > { %s6850_s27 = scalar_lea.hbm %s6849_s25, 1  ;;  %p6855_p3 = scmp.lt.s32.totalorder %s6849_s25, %s9005_s5 }
  0x46   : > { %p6851_p0 = scmp.ne.s32.totalorder %s6849_s25, %s6850_s27  ;;  %p6856_p6 = scmp.lt.s32.totalorder %s6854_s21, %s6850_s27 }
  0x48   : > { %p6852_p1 = pnand %p6851_p0, %p7415_p4  ;;  %p6857_p7 = por %p6856_p6, %p6855_p3 }
  0x4a   : > { %p6853_p2 = pneg %p6852_p1 }
  0x4c   : > { %p6858_p11 = pnand %p6857_p7, %p6853_p2 }
  0x4e   : > { %6861 = shalt.err (!%p6858_p11)
}
  0x4f   : > { %6461 = dma.hbm_to_vmem [thread:$0]  (%p7415_p4), %s643_s14, 16, %s645_s4, %s8973_s1  }
  0x50   : > { %s6447_s22 = smul.u32 192, %s7466_s16  ;;  %s9006_s7 = sld [smem:[#allocation49_spill]] }
  0x51   : > { %s6448_s2 = smul.u32 192, %s7250_s24  ;;  %s5239_s21 = sshll.u32 %s7466_s16, 6 }
  0x52   : > { %s672_s27 = scalar_lea.vmem [#allocation8], %s6447_s22  ;;  %s8976_s3 = scalar_lea.sflag [#allocation9], %s7463_s20 }
  0x53   : > { %s680_s26 = sshll.u32 %s672_s27, 4  ;;  %s681_s26 = int_to_ptr.vmem [resolvable:$true] %s680_s26 }
  0x56   : > { %s677_s25 = scalar_lea.hbm %s9006_s7, %s6448_s2  ;;  %s6882_s1 = scalar_lea.hbm %s9006_s7, 384 }
  0x57   : > { %s678_s30 = sshll.u32 %s677_s25, 4  ;;  %s679_s30 = int_to_ptr.hbm [resolvable:$true] %s678_s30 }
  0x58   : > { %s6876_s17 = sshra.s32 %s679_s30, 4  ;;  %s6877_s17 = int_to_ptr.hbm [resolvable:$true] %s6876_s17 }
  0x59   : > { %s6878_s5 = scalar_lea.hbm %s6877_s17, 192  ;;  %p6883_p1 = scmp.lt.s32.totalorder %s6877_s17, %s9006_s7 }
  0x5a   : > { %p6879_p12 = scmp.ne.s32.totalorder %s6877_s17, %s6878_s5  ;;  %p6884_p2 = scmp.lt.s32.totalorder %s6882_s1, %s6878_s5 }
  0x5c   : > { %p6880_p13 = pnand %p6879_p12, %p7415_p4  ;;  %p6885_p3 = por %p6884_p2, %p6883_p1 }
  0x5e   : > { %p6881_p0 = pneg %p6880_p13 }
  0x60   : > { %p6886_p6 = pnand %p6885_p3, %p6881_p0 }
  0x62   : > { %6889 = shalt.err (!%p6886_p6)
}
  0x63   : > { %s7260_s22 = smov 192   ;;  %s7261_s0 = smov 12  }
  0x64   : > { %6463 = dma.hbm_to_vmem [thread:$0]  (%p7415_p4), %s679_s30, 3072, %s681_s26, %s8976_s3, %s7260_s22, %s7260_s22, %s7261_s0  }
  0x65   : > { %s6220_s25 = sshll.u32 %s7250_s24, 6  ;;  %s9007_s9 = sld [smem:[#allocation50_spill]] }
  0x66   : > { %s713_s17 = scalar_lea.vmem [#allocation11], %s5239_s21  ;;  %s8974_s29 = scalar_lea.sflag [#allocation12], %s7463_s20 }
  0x67   : > { %s721_s5 = sshll.u32 %s713_s17, 4  ;;  %s722_s5 = int_to_ptr.vmem [resolvable:$true] %s721_s5 }
  0x6b   : > { %s718_s14 = scalar_lea.hbm %s9007_s9, %s6220_s25  ;;  %s6910_s30 = scalar_lea.hbm %s9007_s9, 128 }
  0x6c   : > { %s719_s1 = sshll.u32 %s718_s14, 4  ;;  %s720_s1 = int_to_ptr.hbm [resolvable:$true] %s719_s1 }
  0x6d   : > { %s6904_s2 = sshra.s32 %s720_s1, 4  ;;  %s6905_s2 = int_to_ptr.hbm [resolvable:$true] %s6904_s2 }
  0x6e   : > { %s6906_s7 = scalar_lea.hbm %s6905_s2, 64  ;;  %p6911_p13 = scmp.lt.s32.totalorder %s6905_s2, %s9007_s9 }
  0x6f   : > { %p6907_p7 = scmp.ne.s32.totalorder %s6905_s2, %s6906_s7  ;;  %p6912_p0 = scmp.lt.s32.totalorder %s6910_s30, %s6906_s7 }
  0x71   : > { %p6908_p11 = pnand %p6907_p7, %p7415_p4  ;;  %p6913_p1 = por %p6912_p0, %p6911_p13 }
  0x73   : > { %p6909_p12 = pneg %p6908_p11 }
  0x75   : > { %p6914_p2 = pnand %p6913_p1, %p6909_p12 }
  0x77   : > { %6917 = shalt.err (!%p6914_p2)
}
  0x78   : > { %s8977_s21 = smov 64   ;;  %s8978_s25 = smov 4  }
  0x79   : > { %6465 = dma.hbm_to_vmem [thread:$0]  (%p7415_p4), %s720_s1, 1024, %s722_s5, %s8974_s29, %s8977_s21, %s8977_s21, %s8978_s25  }
  0x7a   : > { %s754_s7 = scalar_lea.hbm %s8951_s11, %s7250_s24  ;;  %s751_s14 = scalar_lea.vmem [#allocation14], %s7466_s16 }
  0x7b   : > { %s756_s4 = sshll.u32 %s754_s7, 4  ;;  %s758_s17 = sshll.u32 %s751_s14, 4  ;;  %s757_s4 = int_to_ptr.hbm [resolvable:$true] %s756_s4  ;;  %s759_s17 = int_to_ptr.vmem [resolvable:$true] %s758_s17 }
  0x7c   : > { %s8975_s2 = scalar_lea.sflag [#allocation15], %s7463_s20  ;;  %s6932_s26 = sshra.s32 %s757_s4, 4  ;;  %s6933_s26 = int_to_ptr.hbm [resolvable:$true] %s6932_s26 }
  0x7d   : > { %s6934_s30 = scalar_lea.hbm %s6933_s26, 1  ;;  %s6938_s5 = scalar_lea.hbm %s8951_s11, 2 }
  0x7e   : > { %p6935_p3 = scmp.ne.s32.totalorder %s6933_s26, %s6934_s30  ;;  %p6939_p11 = scmp.lt.s32.totalorder %s6933_s26, %s8951_s11 }
  0x7f   : > { %p6940_p12 = scmp.lt.s32.totalorder %s6938_s5, %s6934_s30 }
  0x80   : > { %p6936_p6 = pnand %p6935_p3, %p7415_p4 }
  0x81   : > { %p6941_p13 = por %p6940_p12, %p6939_p11 }
  0x82   : > { %p6937_p7 = pneg %p6936_p6 }
  0x84   : > { %p6942_p0 = pnand %p6941_p13, %p6937_p7 }
  0x86   : > { %6945 = shalt.err (!%p6942_p0)
}
  0x87   : > { %6467 = dma.hbm_to_vmem [thread:$0]  (%p7415_p4), %s757_s4, 16, %s759_s17, %s8975_s2  }
  0x88   : > { %s5242_s27 = sshll.u32 %s7466_s16, 8  ;;  %s6221_s7 = sshll.u32 %s7250_s24, 8 }
  0x89   : > { %s791_s0 = scalar_lea.hbm %s8953_s13, %s6221_s7  ;;  %s786_s26 = scalar_lea.vmem [#allocation17], %s5242_s27 }
  0x8a   : > { %s794_s30 = sshll.u32 %s786_s26, 4  ;;  %s792_s5 = sshll.u32 %s791_s0, 4  ;;  %s795_s30 = int_to_ptr.vmem [resolvable:$true] %s794_s30  ;;  %s793_s5 = int_to_ptr.hbm [resolvable:$true] %s792_s5 }
  0x8b   : > { %s783_s1 = scalar_lea.sflag [#allocation18], %s7463_s20  ;;  %s6960_s18 = sshra.s32 %s793_s5, 4  ;;  %s6961_s18 = int_to_ptr.hbm [resolvable:$true] %s6960_s18 }
  0x8c   : > { %s6962_s29 = scalar_lea.hbm %s6961_s18, 256  ;;  %s6966_s2 = scalar_lea.hbm %s8953_s13, 512 }
  0x8d   : > { %p6963_p1 = scmp.ne.s32.totalorder %s6961_s18, %s6962_s29  ;;  %p6967_p6 = scmp.lt.s32.totalorder %s6961_s18, %s8953_s13 }
  0x8e   : > { %p6968_p7 = scmp.lt.s32.totalorder %s6966_s2, %s6962_s29 }
  0x8f   : > { %p6964_p2 = pnand %p6963_p1, %p7415_p4 }
  0x90   : > { %p6969_p11 = por %p6968_p7, %p6967_p6 }
  0x91   : > { %p6965_p3 = pneg %p6964_p2 }
  0x93   : > { %p6970_p12 = pnand %p6969_p11, %p6965_p3 }
  0x95   : > { %6973 = shalt.err (!%p6970_p12)
}
  0x96   : > { %s7264_s22 = smov 256   ;;  %s7265_s0 = smov 16  }
  0x97   : > { %6469 = dma.hbm_to_vmem [thread:$0]  (%p7415_p4), %s793_s5, 4096, %s795_s30, %s783_s1, %s7264_s22, %s7264_s22, %s7265_s0  }
  0x98   : > { %s832_s17 = scalar_lea.hbm %s8955_s15, %s6221_s7  ;;  %s827_s3 = scalar_lea.vmem [#allocation20], %s5242_s27 }
  0x99   : > { %s833_s21 = sshll.u32 %s832_s17, 4  ;;  %s835_s18 = sshll.u32 %s827_s3, 4  ;;  %s834_s21 = int_to_ptr.hbm [resolvable:$true] %s833_s21  ;;  %s836_s18 = int_to_ptr.vmem [resolvable:$true] %s835_s18 }
  0x9a   : > { %s824_s29 = scalar_lea.sflag [#allocation21], %s7463_s20  ;;  %s6988_s2 = sshra.s32 %s834_s21, 4  ;;  %s6989_s2 = int_to_ptr.hbm [resolvable:$true] %s6988_s2 }
  0x9b   : > { %s6990_s14 = scalar_lea.hbm %s6989_s2, 256  ;;  %s6994_s30 = scalar_lea.hbm %s8955_s15, 512 }
  0x9c   : > { %p6991_p13 = scmp.ne.s32.totalorder %s6989_s2, %s6990_s14  ;;  %p6995_p2 = scmp.lt.s32.totalorder %s6989_s2, %s8955_s15 }
  0x9d   : > { %p6996_p3 = scmp.lt.s32.totalorder %s6994_s30, %s6990_s14 }
  0x9e   : > { %p6992_p0 = pnand %p6991_p13, %p7415_p4 }
  0x9f   : > { %p6997_p6 = por %p6996_p3, %p6995_p2 }
  0xa0   : > { %p6993_p1 = pneg %p6992_p0 }
  0xa2   : > { %p6998_p7 = pnand %p6997_p6, %p6993_p1 }
  0xa4   : > { %7001 = shalt.err (!%p6998_p7)
}
  0xa5   : > { %s9008_s27 = smov 4   ;;  %s9009_s7 = smov 64  }
  0xa6   : > { %6471 = dma.hbm_to_vmem [thread:$0]  (%p7415_p4), %s834_s21, 4096, %s836_s18, %s824_s29, %s9009_s7, %s9009_s7, %s9008_s27  }
  0xa7   : > { %s657_s0 = scalar_lea.hbm %s8946_s6, %s7250_s24  ;;  %s654_s4 = scalar_lea.vmem [#allocation7], %s7466_s16 }
  0xa8   : > { %s659_s26 = sshll.u32 %s657_s0, 4  ;;  %s661_s17 = sshll.u32 %s654_s4, 4  ;;  %s660_s26 = int_to_ptr.hbm [resolvable:$true] %s659_s26  ;;  %s662_s17 = int_to_ptr.vmem [resolvable:$true] %s661_s17 }
  0xa9   : > { %s7016_s3 = sshra.s32 %s660_s26, 4  ;;  %s7022_s21 = scalar_lea.hbm %s8946_s6, 2  ;;  %s7017_s3 = int_to_ptr.hbm [resolvable:$true] %s7016_s3 }
  0xaa   : > { %s7018_s2 = scalar_lea.hbm %s7017_s3, 1  ;;  %p7023_p0 = scmp.lt.s32.totalorder %s7017_s3, %s8946_s6 }
  0xab   : > { %p7019_p11 = scmp.ne.s32.totalorder %s7017_s3, %s7018_s2  ;;  %p7024_p1 = scmp.lt.s32.totalorder %s7022_s21, %s7018_s2 }
  0xad   : > { %p7020_p12 = pnand %p7019_p11, %p7415_p4  ;;  %p7025_p2 = por %p7024_p1, %p7023_p0 }
  0xaf   : > { %p7021_p13 = pneg %p7020_p12 }
  0xb1   : > { %p7026_p3 = pnand %p7025_p2, %p7021_p13 }
  0xb3   : > { %7029 = shalt.err (!%p7026_p3)
}
  0xb4   : > { %s9010_s22 = scalar_lea.sflag [#allocation6], %s7463_s20  ;;  %s6449_s27 = smul.u32 3, %s7466_s16 }
  0xb5   : > { %6462 = dma.hbm_to_vmem [thread:$0]  (%p7415_p4), %s660_s26, 16, %s662_s17, %s9010_s22  }
  0xb6   : > { %s6450_s7 = smul.u32 3, %s7250_s24  ;;  %s737_s0 = scalar_lea.hbm %s8950_s10, %s7250_s24 }
  0xb7   : > { %s7603_s4 = sshll.u32 %s737_s0, 4  ;;  %s694_s30 = scalar_lea.vmem [#allocation10], %s6449_s27  ;;  %s740_s4 = int_to_ptr.hbm [resolvable:$true] %s7603_s4 }
  0xb8   : > { %s698_s14 = scalar_lea.hbm %s8948_s8, %s6450_s7  ;;  %s702_s21 = sshll.u32 %s694_s30, 4  ;;  %s703_s21 = int_to_ptr.vmem [resolvable:$true] %s702_s21 }
  0xb9   : > { %s700_s18 = sshll.u32 %s698_s14, 4  ;;  %s7050_s9 = scalar_lea.hbm %s8948_s8, 6  ;;  %s701_s18 = int_to_ptr.hbm [resolvable:$true] %s700_s18 }
  0xba   : > { %s7044_s26 = sshra.s32 %s701_s18, 4  ;;  %s7045_s26 = int_to_ptr.hbm [resolvable:$true] %s7044_s26 }
  0xbb   : > { %s7046_s17 = scalar_lea.hbm %s7045_s26, 3  ;;  %p7051_p12 = scmp.lt.s32.totalorder %s7045_s26, %s8948_s8 }
  0xbc   : > { %p7047_p6 = scmp.ne.s32.totalorder %s7045_s26, %s7046_s17  ;;  %p7052_p13 = scmp.lt.s32.totalorder %s7050_s9, %s7046_s17 }
  0xbe   : > { %p7048_p7 = pnand %p7047_p6, %p7415_p4  ;;  %p7053_p0 = por %p7052_p13, %p7051_p12 }
  0xc0   : > { %p7049_p11 = pneg %p7048_p7 }
  0xc2   : > { %p7054_p1 = pnand %p7053_p0, %p7049_p11 }
  0xc4   : > { %7057 = shalt.err (!%p7054_p1)
}
  0xc5   : > { %s9011_s27 = scalar_lea.sflag [#allocation9], %s7463_s20  ;;  %s734_s7 = scalar_lea.vmem [#allocation13], %s7466_s16 }
  0xc6   : > { %6464 = dma.hbm_to_vmem [thread:$0]  (%p7415_p4), %s701_s18, 48, %s703_s21, %s9011_s27  }
  0xc7   : > { %s741_s3 = sshll.u32 %s734_s7, 4  ;;  %s771_s30 = scalar_lea.hbm %s8952_s12, %s7250_s24  ;;  %s742_s3 = int_to_ptr.vmem [resolvable:$true] %s741_s3 }
  0xc8   : > { %s7072_s26 = sshra.s32 %s740_s4, 4  ;;  %s7078_s9 = scalar_lea.hbm %s8950_s10, 2  ;;  %s7073_s26 = int_to_ptr.hbm [resolvable:$true] %s7072_s26 }
  0xc9   : > { %s7074_s17 = scalar_lea.hbm %s7073_s26, 1  ;;  %p7079_p7 = scmp.lt.s32.totalorder %s7073_s26, %s8950_s10 }
  0xca   : > { %p7075_p2 = scmp.ne.s32.totalorder %s7073_s26, %s7074_s17  ;;  %p7080_p11 = scmp.lt.s32.totalorder %s7078_s9, %s7074_s17 }
  0xcc   : > { %p7076_p3 = pnand %p7075_p2, %p7415_p4  ;;  %p7081_p12 = por %p7080_p11, %p7079_p7 }
  0xce   : > { %p7077_p6 = pneg %p7076_p3 }
  0xd0   : > { %p7082_p13 = pnand %p7081_p12, %p7077_p6 }
  0xd2   : > { %7085 = shalt.err (!%p7082_p13)
}
  0xd3   : > { %s9012_s25 = scalar_lea.sflag [#allocation12], %s7463_s20  ;;  %s773_s0 = sshll.u32 %s771_s30, 4  ;;  %s774_s0 = int_to_ptr.hbm [resolvable:$true] %s773_s0 }
  0xd4   : > { %6466 = dma.hbm_to_vmem [thread:$0]  (%p7415_p4), %s740_s4, 16, %s742_s3, %s9012_s25  }
  0xd5   : > { %s768_s27 = scalar_lea.vmem [#allocation16], %s7466_s16  ;;  %s7100_s2 = sshra.s32 %s774_s0, 4  ;;  %s7101_s2 = int_to_ptr.hbm [resolvable:$true] %s7100_s2 }
  0xd6   : > { %s775_s7 = sshll.u32 %s768_s27, 4  ;;  %s7102_s14 = scalar_lea.hbm %s7101_s2, 1  ;;  %s776_s7 = int_to_ptr.vmem [resolvable:$true] %s775_s7 }
  0xd7   : > { %p7103_p0 = scmp.ne.s32.totalorder %s7101_s2, %s7102_s14  ;;  %s7106_s5 = scalar_lea.hbm %s8952_s12, 2 }
  0xd8   : > { %p7107_p3 = scmp.lt.s32.totalorder %s7101_s2, %s8952_s12  ;;  %p7108_p6 = scmp.lt.s32.totalorder %s7106_s5, %s7102_s14 }
  0xd9   : > { %p7104_p1 = pnand %p7103_p0, %p7415_p4 }
  0xda   : > { %p7109_p7 = por %p7108_p6, %p7107_p3 }
  0xdb   : > { %p7105_p2 = pneg %p7104_p1 }
  0xdd   : > { %p7110_p11 = pnand %p7109_p7, %p7105_p2 }
  0xdf   : > { %7113 = shalt.err (!%p7110_p11)
}
  0xe0   : > { %s9013_s4 = scalar_lea.sflag [#allocation15], %s7463_s20  ;;  %s5245_s3 = sshll.u32 %s7466_s16, 2 }
  0xe1   : > { %6468 = dma.hbm_to_vmem [thread:$0]  (%p7415_p4), %s774_s0, 16, %s776_s7, %s9013_s4  }
  0xe2   : > { %s5246_s30 = sshll.u32 %s7250_s24, 2  ;;  %s9014_s25 = sld [smem:[#allocation51_spill]] }
  0xe3   : > { %s808_s2 = scalar_lea.vmem [#allocation19], %s5245_s3 }
  0xe4   : > { %s816_s14 = sshll.u32 %s808_s2, 4  ;;  %s817_s14 = int_to_ptr.vmem [resolvable:$true] %s816_s14 }
  0xe8   : > { %s812_s27 = scalar_lea.hbm %s9014_s25, %s5246_s30  ;;  %s7134_s7 = scalar_lea.hbm %s9014_s25, 8 }
  0xe9   : > { %s814_s26 = sshll.u32 %s812_s27, 4  ;;  %s815_s26 = int_to_ptr.hbm [resolvable:$true] %s814_s26 }
  0xea   : > { %s7128_s17 = sshra.s32 %s815_s26, 4  ;;  %s7129_s17 = int_to_ptr.hbm [resolvable:$true] %s7128_s17 }
  0xeb   : > { %s7130_s5 = scalar_lea.hbm %s7129_s17, 4  ;;  %p7135_p1 = scmp.lt.s32.totalorder %s7129_s17, %s9014_s25 }
  0xec   : > { %p7131_p12 = scmp.ne.s32.totalorder %s7129_s17, %s7130_s5  ;;  %p7136_p2 = scmp.lt.s32.totalorder %s7134_s7, %s7130_s5 }
  0xee   : > { %p7132_p13 = pnand %p7131_p12, %p7415_p4  ;;  %p7137_p3 = por %p7136_p2, %p7135_p1 }
  0xf0   : > { %p7133_p0 = pneg %p7132_p13 }
  0xf2   : > { %p7138_p6 = pnand %p7137_p3, %p7133_p0 }
  0xf4   : > { %7141 = shalt.err (!%p7138_p6)
}
  0xf5   : > { %6470 = dma.hbm_to_vmem [thread:$0]  (%p7415_p4), %s815_s26, 64, %s817_s14, %s783_s1  }
  0xf6   : > { %s9015_s21 = sld [smem:[#allocation52_spill]]  ;;  %s848_s2 = scalar_lea.vmem [#allocation22], %s7466_s16 }
  0xf7   : > { %s855_s22 = sshll.u32 %s848_s2, 4  ;;  %s856_s22 = int_to_ptr.vmem [resolvable:$true] %s855_s22 }
  0xfc   : > { %s851_s18 = scalar_lea.hbm %s9015_s21, %s7250_s24  ;;  %s7162_s1 = scalar_lea.hbm %s9015_s21, 2 }
  0xfd   : > { %s853_s27 = sshll.u32 %s851_s18, 4  ;;  %s854_s27 = int_to_ptr.hbm [resolvable:$true] %s853_s27 }
  0xfe   : > { %s7156_s17 = sshra.s32 %s854_s27, 4  ;;  %s7157_s17 = int_to_ptr.hbm [resolvable:$true] %s7156_s17 }
  0xff   : > { %s7158_s5 = scalar_lea.hbm %s7157_s17, 1  ;;  %p7163_p13 = scmp.lt.s32.totalorder %s7157_s17, %s9015_s21 }
 0x100   : > { %p7159_p7 = scmp.ne.s32.totalorder %s7157_s17, %s7158_s5  ;;  %p7164_p0 = scmp.lt.s32.totalorder %s7162_s1, %s7158_s5 }
 0x102   : > { %p7160_p11 = pnand %p7159_p7, %p7415_p4  ;;  %p7165_p1 = por %p7164_p0, %p7163_p13 }
 0x104   : > { %p7161_p12 = pneg %p7160_p11 }
 0x106   : > { %p7166_p2 = pnand %p7165_p1, %p7161_p12 }
 0x108   : > { %7169 = shalt.err (!%p7166_p2)
}
 0x109   : > { %6472 = dma.hbm_to_vmem [thread:$0]  (%p7415_p4), %s854_s27, 16, %s856_s22, %s824_s29  }
 0x10a PF: > { %864 = sbr.rel (%p7429_p10) target bundleno = 6349 (0x18cd), region = 100  ;;  %s9017_s16 = sld [smem:[#allocation38_spill]] (!%p7429_p10) }
 0x10f   : > { %7201 = dma.done.wait (%p177_p5), [#allocation4], 2048  }
 0x110   : > { %7203 = vsyncadd (%p177_p5), [#allocation4], 4294965248  ;;  %s9018_s9 = sld [smem:[#allocation37_spill]]  ;;  %s7696_s3 = sand.u32 1, %s9017_s16  }
 0x111   : > { %s872_s20 = scalar_lea.sflag [#allocation6], %s7696_s3 }
 0x116   : > { %s7699_s28 = sand.u32 1, %s9018_s9  }
 0x117   : > { %s874_s29 = scalar_lea.vmem [#allocation5], %s7699_s28 }
 0x118   : > { %7205 = dma.done.wait (%p7424_p8), %s872_s20, 32  }
 0x119   : > { %7207 = vsyncadd (%p7424_p8), %s872_s20, 4294967264  ;;  %s6451_s30 = smul.u32 192, %s7699_s28  ;;  %s883_s18 = scalar_lea.vmem [#allocation7], %s7699_s28 }
 0x11a   : > { %s890_s27 = scalar_lea.sflag [#allocation9], %s7696_s3 }
 0x11b   : > { %s7710_s2 = scalar_lea.vmem [#allocation8], %s6451_s30 }
 0x11c   : > { %7209 = dma.done.wait (%p7424_p8), %s890_s27, 3120  }
 0x11d   : > { %7211 = vsyncadd (%p7424_p8), %s890_s27, 4294964176  ;;  %s6452_s22 = smul.u32 3, %s7699_s28  ;;  %s5252_s17 = sshll.u32 %s7699_s28, 6 }
 0x11e   : > { %s910_s0 = scalar_lea.sflag [#allocation12], %s7696_s3  ;;  %s7721_s7 = scalar_lea.vmem [#allocation11], %s5252_s17 }
 0x11f   : > { %s7718_s5 = scalar_lea.vmem [#allocation10], %s6452_s22 }
 0x120   : > { %7213 = dma.done.wait (%p7424_p8), %s910_s0, 1040  }
 0x121   : > { %7215 = vsyncadd (%p7424_p8), %s910_s0, 4294966256  ;;  %s922_s1 = scalar_lea.vmem [#allocation13], %s7699_s28  ;;  %s929_s26 = scalar_lea.sflag [#allocation15], %s7696_s3 }
 0x122   : > { %s931_s14 = scalar_lea.vmem [#allocation14], %s7699_s28 }
 0x123   : > { %7217 = dma.done.wait (%p7424_p8), %s929_s26, 32  }
 0x124   : > { %7219 = vsyncadd (%p7424_p8), %s929_s26, 4294967264  ;;  %s5253_s24 = sshll.u32 %s7699_s28, 8  ;;  %s940_s9 = scalar_lea.vmem [#allocation16], %s7699_s28 }
 0x125   : > { %s947_s20 = scalar_lea.sflag [#allocation18], %s7696_s3  ;;  %s7737_s30 = scalar_lea.vmem [#allocation17], %s5253_s24 }
 0x126   : > { %7221 = dma.done.wait (%p7424_p8), %s947_s20, 4160  }
 0x127   : > { %7223 = vsyncadd (%p7424_p8), %s947_s20, 4294963136  ;;  %s5254_s27 = sshll.u32 %s7699_s28, 2  ;;  %s967_s17 = scalar_lea.sflag [#allocation21], %s7696_s3 }
 0x128   : > { %s7744_s22 = scalar_lea.vmem [#allocation19], %s5254_s27  ;;  %s7747_s0 = scalar_lea.vmem [#allocation20], %s5253_s24 }
 0x129   : > { %7225 = dma.done.wait (%p7424_p8), %s967_s17, 4112  }
 0x12a   : > { %7227 = vsyncadd (%p7424_p8), %s967_s17, 4294963184  ;;  %s979_s26 = scalar_lea.vmem [#allocation22], %s7699_s28 }
 0x12b   : > { %7229 = dma.done.wait (%p177_p5), [#allocation24], 32  }
 0x12c   : > { %7231 = vsyncadd (%p177_p5), [#allocation24], 4294967264 }
 0x12d   : > { %7233 = dma.done.wait (%p177_p5), [#allocation27], 2048  }
 0x12e   : > { %7235 = vsyncadd (%p177_p5), [#allocation27], 4294965248  ;;  %1099 = sbr.rel (%p5233_p9) target bundleno = 574 (0x23e), region = 168  ;;  %s9020_s24 = sld [smem:[#allocation43_spill]] (!%p5233_p9) }
 0x12f   : > { %s9022_s4 = sld [smem:[#allocation47_spill]] (!%p5233_p9) }
 0x133   : > { %v6230_v1 = vld [vmem:[#allocation3 + $0x38] sm:$0xff]  ;;  %v7266_v2 = vmov 0   ;;  %v6229_v4 = vld [vmem:[#allocation3 + $0x30] sm:$0xff]  ;;  %v6228_v6 = vld [vmem:[#allocation3 + $0x28] sm:$0xff]  ;;  %v1102_v19 = vlaneseq  ;;  %v7267_v24 = vmov 1.0|1.0  }
 0x134   : > { %s9021_s20 = smov %s9020_s24  ;;  %v1100_v0 = vld [vmem:[%s9020_s24] sm:$0xff]  ;;  %6570 = vset.pattern.permute.xlu0 %v7266_v2  ;;  %v6238_v3 = vld [vmem:[#allocation3 + $0x78] sm:$0xff]  ;;  %1253 = vmatpush.bf16.msra.mxu0 %v6230_v1  ;;  %v6236_v8 = vld [vmem:[#allocation3 + $0x68] sm:$0xff] }
 0x135   : > { %1106 = vperm.xlu0 %6570, %v1100_v0   ;;  %1267 = vmatpush.bf16.msra.mxu1 %v6238_v3  ;;  %v6237_v5 = vld [vmem:[#allocation3 + $0x70] sm:$0xff]  ;;  %v1101_v7 = vld [vmem:[%s9021_s20 + $0x8] sm:$0xff]  ;;  %v6227_v9 = vld [vmem:[#allocation3 + $0x20] sm:$0xff]  ;;  %v1103_v21 = vand.u32 127, %v1102_v19 }
 0x136   : > { %v6235_v10 = vld [vmem:[#allocation3 + $0x60] sm:$0xff]  ;;  %v6226_v11 = vld [vmem:[#allocation3 + $0x18] sm:$0xff]  ;;  %v6225_v13 = vld [vmem:[#allocation3 + $0x10] sm:$0xff] }
 0x137   : > { %v6234_v12 = vld [vmem:[#allocation3 + $0x58] sm:$0xff]  ;;  %v6233_v14 = vld [vmem:[#allocation3 + $0x50] sm:$0xff]  ;;  %v6224_v15 = vld [vmem:[#allocation3 + $0x8] sm:$0xff]  ;;  %v1104_v22 = vadd.s32 128, %v1103_v21 }
 0x138   : > { %1254 = vmatpush.bf16.msra.mxu0 %v6229_v4  ;;  %v6232_v16 = vld [vmem:[#allocation3 + $0x48] sm:$0xff]  ;;  %v6223_v17 = vld [vmem:[#allocation3] sm:$0xff]  ;;  %v1281_v27 = vld [vmem:[%s9022_s4] sm:$0xff] }
 0x139   : > { %1268 = vmatpush.bf16.msra.mxu1 %v6237_v5  ;;  %v6231_v18 = vld [vmem:[#allocation3 + $0x40] sm:$0xff] }
 0x13c   : > { %1255 = vmatpush.bf16.msra.mxu0 %v6228_v6 }
 0x13d   : > { %1109 = vperm.xlu0 %6570, %v1101_v7   ;;  %1269 = vmatpush.bf16.msra.mxu1 %v6236_v8 }
 0x140   : > { %1256 = vmatpush.bf16.msra.mxu0 %v6227_v9 }
 0x141   : > { %1270 = vmatpush.bf16.msra.mxu1 %v6235_v10 }
 0x144   : > { %1257 = vmatpush.bf16.msra.mxu0 %v6226_v11 }
 0x145   : > { %1271 = vmatpush.bf16.msra.mxu1 %v6234_v12 }
 0x148   : > { %1258 = vmatpush.bf16.msra.mxu0 %v6225_v13 }
 0x149   : > { %1272 = vmatpush.bf16.msra.mxu1 %v6233_v14 }
 0x14c   : > { %1259 = vmatpush.bf16.msra.mxu0 %v6224_v15 }
 0x14d   : > { %1273 = vmatpush.bf16.msra.mxu1 %v6232_v16 }
 0x150   : > { %1260 = vmatpush.bf16.msra.mxu0 %v6223_v17 }
 0x151   : > { %1274 = vmatpush.bf16.msra.mxu1 %v6231_v18 }
 0x1a7   : > { %v1107_v20 = vpop.permute.xlu0 %1106 }
 0x1a8   : > { %vm1111_vm0 = vcmp.eq.s32.totalorder %v1107_v20, %v1103_v21  ;;  %vm1112_vm3 = vcmp.eq.s32.totalorder %v1107_v20, %v1104_v22 }
 0x1af   : > { %v1110_v23 = vpop.permute.xlu0 %1109 }
 0x1b0   : > { %vm1113_vm1 = vcmp.eq.s32.totalorder %v1110_v23, %v1103_v21  ;;  %vm1114_vm2 = vcmp.eq.s32.totalorder %v1110_v23, %v1104_v22 }
 0x1b1   : > { %vm5328_vm4 = vmpackc.low %vm1113_vm1, %vm1111_vm0 }
 0x1b2   : > { %vm5330_vm5 = vmpackc.low %vm1114_vm2, %vm1112_vm3  ;;  %5329 = vmatmul.msk.bf16.vlgmr.msra.gmra.mxu0 %vm5328_vm4, %v7267_v24 }
 0x1b3   : > { %5331 = vmatmul.msk.bf16.vlgmr.msra.gmra.mxu1 %vm5330_vm5, %v7267_v24 }
 0x22f   : > { %v1262_v25 = vpop.f32.mrf.mxu0 }
 0x230   : > { %v1276_v26 = vpop.f32.mrf.mxu1 }
 0x231   : > { %v1277_v28 = vadd.f32 %v1276_v26, %v1262_v25 }
 0x233   : > { %v1282_v29 = vadd.f32 %v1281_v27, %v1277_v28 }
 0x235   : > { %1284 = vst [vmem:[#allocation2] sm:$0xff] %v1282_v29 }
 0x237   : > { %v1264_v30 = vpop.f32.mrf.mxu0 }
 0x238   : > { %v1278_v31 = vpop.f32.mrf.mxu1 }
 0x239   : > { %v1279_v32 = vadd.f32 %v1278_v31, %v1264_v30 }
 0x23b   : > { %v1283_v33 = vadd.f32 %v1281_v27, %v1279_v32 }
 0x23d   : > { %1285 = vst [vmem:[#allocation2 + $0x8] sm:$0xff] %v1283_v33 }
 0x23e PF: > { %s9023_s24 = sld [smem:[#allocation38_spill]] }
 0x244   : > { %p5332_p4 = scmp.ge.s32.totalorder %s9023_s24, 1 }
 0x245   : > { %s7269_s27 = smov (!%p5332_p4), 96   ;;  %s9024_s3 = sld [smem:[#allocation44_spill]] (!%p5332_p4) }
 0x246   : > { %1289 = sbr.rel (%p5332_p4) target bundleno = 2889 (0xb49), region = 172  ;;  %s7270_s17 = smov (!%p5332_p4), 64  }
 0x247   : > { %s7271_s16 = smov (!%p5332_p4), 32  }
 0x24b   : > { %v1290_v34 = vld [vmem:[#allocation2] sm:$0xff]  ;;  %v1291_v35 = vld [vmem:[#allocation2 + $0x8] sm:$0xff]  ;;  %v7268_v36 = vmov 128.0   ;;  %v5419_v51 = vld [vmem:[%s7710_s2 + $0xa8] sm:$0xf]  ;;  %vm1564_vm13 = vcmask 261120  }
 0x24c   : > { %1294 = vadd.xlane.f32.xlu0 %v1290_v34  ;;  %6607 = vrcp.f32 %v7268_v36  ;;  %v6261_v52 = vld [vmem:[%s7710_s2 + $0xb0] sm:$0xf0]  ;;  %v6260_v53 = vld [vmem:[%s7710_s2 + $0xac] sm:$0xf]  ;;  %v5421_v55 = vld [vmem:[%s7710_s2 + $0xb4] sm:$0xf0] }
 0x24d   : > { %v5420_v54 = vor.u32 %v6261_v52, %v5419_v51  ;;  %v5427_v56 = vld [vmem:[%s7710_s2 + $0xb0] sm:$0xf]  ;;  %v6262_v57 = vld [vmem:[%s7710_s2 + $0xb8] sm:$0xf0]  ;;  %v5424_v58 = vor.u32 %v6260_v53, %v5421_v55  ;;  %v6257_v62 = vld [vmem:[%s7710_s2 + $0x94] sm:$0xf] }
 0x24e   : > { %v5428_v59 = vor.u32 %v6262_v57, %v5427_v56  ;;  %v5407_v60 = vld [vmem:[%s7710_s2 + $0x90] sm:$0xf]  ;;  %v6258_v61 = vld [vmem:[%s7710_s2 + $0x98] sm:$0xf0]  ;;  %v5409_v0 = vld [vmem:[%s7710_s2 + $0x9c] sm:$0xf0] }
 0x24f   : > { %1520 = vmatpush.bf16.msra.mxu0 %v5420_v54  ;;  %1534 = vmatpush.bf16.msra.mxu1 %v5424_v58  ;;  %v5408_v63 = vor.u32 %v6258_v61, %v5407_v60  ;;  %v5415_v1 = vld [vmem:[%s7710_s2 + $0x98] sm:$0xf]  ;;  %v6259_v2 = vld [vmem:[%s7710_s2 + $0xa0] sm:$0xf0]  ;;  %v5412_v3 = vor.u32 %v6257_v62, %v5409_v0  ;;  %v6254_v7 = vld [vmem:[%s7710_s2 + $0x7c] sm:$0xf] }
 0x250   : > { %1548 = vmatpush.bf16.msra.mxu2 %v5428_v59  ;;  %v5416_v4 = vor.u32 %v6259_v2, %v5415_v1  ;;  %v5395_v5 = vld [vmem:[%s7710_s2 + $0x78] sm:$0xf]  ;;  %v6255_v6 = vld [vmem:[%s7710_s2 + $0x80] sm:$0xf0]  ;;  %v5397_v9 = vld [vmem:[%s7710_s2 + $0x84] sm:$0xf0] }
 0x251   : > { %v5396_v8 = vor.u32 %v6255_v6, %v5395_v5  ;;  %v5403_v10 = vld [vmem:[%s7710_s2 + $0x80] sm:$0xf]  ;;  %v6256_v11 = vld [vmem:[%s7710_s2 + $0x88] sm:$0xf0]  ;;  %v5400_v12 = vor.u32 %v6254_v7, %v5397_v9  ;;  %v6251_v16 = vld [vmem:[%s7710_s2 + $0x64] sm:$0xf] }
 0x252   : > { %v6608_v37 = vpop.eup %6607  ;;  %v5404_v13 = vor.u32 %v6256_v11, %v5403_v10  ;;  %v5383_v14 = vld [vmem:[%s7710_s2 + $0x60] sm:$0xf]  ;;  %v6252_v15 = vld [vmem:[%s7710_s2 + $0x68] sm:$0xf0]  ;;  %v5385_v18 = vld [vmem:[%s7710_s2 + $0x6c] sm:$0xf0] }
 0x253   : > { %v1299_v38 = vmul.f32 128.0, %v6608_v37  ;;  %vm1303_vm6 = vweird.f32 %v6608_v37  ;;  %1521 = vmatpush.bf16.msra.mxu0 %v5408_v63  ;;  %1535 = vmatpush.bf16.msra.mxu1 %v5412_v3  ;;  %v5384_v17 = vor.u32 %v6252_v15, %v5383_v14  ;;  %v5391_v19 = vld [vmem:[%s7710_s2 + $0x68] sm:$0xf]  ;;  %v6253_v20 = vld [vmem:[%s7710_s2 + $0x70] sm:$0xf0]  ;;  %v5388_v21 = vor.u32 %v6251_v16, %v5385_v18 }
 0x254   : > { %1296 = vadd.xlane.f32.xlu0 %v1291_v35  ;;  %1549 = vmatpush.bf16.msra.mxu2 %v5416_v4  ;;  %v5392_v22 = vor.u32 %v6253_v20, %v5391_v19  ;;  %v5371_v23 = vld [vmem:[%s7710_s2 + $0x48] sm:$0xf]  ;;  %v6249_v24 = vld [vmem:[%s7710_s2 + $0x50] sm:$0xf0]  ;;  %v6248_v25 = vld [vmem:[%s7710_s2 + $0x4c] sm:$0xf] }
 0x255   : > { %v1300_v39 = vsub.f32 1.0, %v1299_v38  ;;  %v5372_v26 = vor.u32 %v6249_v24, %v5371_v23  ;;  %v5373_v27 = vld [vmem:[%s7710_s2 + $0x54] sm:$0xf0]  ;;  %v5379_v28 = vld [vmem:[%s7710_s2 + $0x50] sm:$0xf]  ;;  %vm1600_vm14 = vcmask 130048  }
 0x256   : > { %v6250_v29 = vld [vmem:[%s7710_s2 + $0x58] sm:$0xf0]  ;;  %v5376_v30 = vor.u32 %v6248_v25, %v5373_v27  ;;  %v5359_v32 = vld [vmem:[%s7710_s2 + $0x30] sm:$0xf]  ;;  %v5361_v36 = vld [vmem:[%s7710_s2 + $0x3c] sm:$0xf0] }
 0x257   : > { %v1301_v40 = vmul.f32 %v6608_v37, %v1300_v39  ;;  %1522 = vmatpush.bf16.msra.mxu0 %v5396_v8  ;;  %1536 = vmatpush.bf16.msra.mxu1 %v5400_v12  ;;  %v5380_v31 = vor.u32 %v6250_v29, %v5379_v28  ;;  %v6246_v33 = vld [vmem:[%s7710_s2 + $0x38] sm:$0xf0]  ;;  %v6247_v38 = vld [vmem:[%s7710_s2 + $0x40] sm:$0xf0]  ;;  %v5335_v53 = vld [vmem:[%s7710_s2] sm:$0xf] }
 0x258   : > { %1550 = vmatpush.bf16.msra.mxu2 %v5404_v13  ;;  %v6240_v54 = vld [vmem:[%s7710_s2 + $0x8] sm:$0xf0]  ;;  %v6239_v55 = vld [vmem:[%s7710_s2 + $0x4] sm:$0xf]  ;;  %v5337_v58 = vld [vmem:[%s7710_s2 + $0xc] sm:$0xf0] }
 0x259   : > { %v1302_v41 = vadd.f32 %v6608_v37, %v1301_v40  ;;  %v5336_v57 = vor.u32 %v6240_v54, %v5335_v53  ;;  %v5343_v59 = vld [vmem:[%s7710_s2 + $0x8] sm:$0xf]  ;;  %v6241_v60 = vld [vmem:[%s7710_s2 + $0x10] sm:$0xf0]  ;;  %v5340_v62 = vor.u32 %v6239_v55, %v5337_v58 }
 0x25a   : > { %v5344_v63 = vor.u32 %v6241_v60, %v5343_v59 }
 0x25b   : > { %v7774_v42 = vsel %vm1303_vm6, %v6608_v37, %v1302_v41  ;;  %1523 = vmatpush.bf16.msra.mxu0 %v5384_v17  ;;  %1537 = vmatpush.bf16.msra.mxu1 %v5388_v21  ;;  %v5367_v37 = vld [vmem:[%s7710_s2 + $0x38] sm:$0xf]  ;;  %v6601_v17 = vld [vmem:[%s874_s29] ss:$0 sm:$0xff] }
 0x25c   : > { %1551 = vmatpush.bf16.msra.mxu2 %v5392_v22  ;;  %v5368_v40 = vor.u32 %v6247_v38, %v5367_v37  ;;  %v5347_v41 = vld [vmem:[%s7710_s2 + $0x18] sm:$0xf]  ;;  %v6602_v22 = vld [vmem:[%s883_s18] ss:$0 sm:$0xff] }
 0x25f   : > { %1524 = vmatpush.bf16.msra.mxu0 %v5372_v26  ;;  %1538 = vmatpush.bf16.msra.mxu1 %v5376_v30 }
 0x260   : > { %1552 = vmatpush.bf16.msra.mxu2 %v5380_v31 }
 0x264   : > { %1553 = vmatpush.bf16.msra.mxu2 %v5368_v40 }
 0x2bf   : > { %v1295_v43 = vpop.xlane.xlu0 %1294 }
 0x2c0   : > { %v1305_v44 = vmul.f32 %v7774_v42, %v1295_v43  ;;  %v6243_v43 = vld [vmem:[%s7710_s2 + $0x20] sm:$0xf0] }
 0x2c2   : > { %v7777_v45 = vsub.f32 %v1290_v34, %v1305_v44  ;;  %v6245_v34 = vld [vmem:[%s7710_s2 + $0x34] sm:$0xf]  ;;  %v6242_v44 = vld [vmem:[%s7710_s2 + $0x1c] sm:$0xf] }
 0x2c3   : > { %v5364_v39 = vor.u32 %v6245_v34, %v5361_v36 }
 0x2c4   : > { %v1309_v46 = vmul.f32 %v7777_v45, %v7777_v45 }
 0x2c5   : > { %1539 = vmatpush.bf16.msra.mxu1 %v5364_v39 }
 0x2c6   : > { %1311 = vadd.xlane.f32.xlu1 %v1309_v46  ;;  %v5348_v46 = vor.u32 %v6243_v43, %v5347_v41  ;;  %v7858_v43 = vld [vmem:[%s9024_s3] sm:$0xff] }
 0x2c7   : > { %v1297_v47 = vpop.xlane.xlu0 %1296 }
 0x2c8   : > { %v1306_v48 = vmul.f32 %v7774_v42, %v1297_v47  ;;  %v5349_v47 = vld [vmem:[%s7710_s2 + $0x24] sm:$0xf0] }
 0x2c9   : > { %v5352_v51 = vor.u32 %v6242_v44, %v5349_v47 }
 0x2ca   : > { %v7782_v49 = vsub.f32 %v1291_v35, %v1306_v48  ;;  %v5360_v35 = vor.u32 %v6246_v33, %v5359_v32  ;;  %v5355_v48 = vld [vmem:[%s7710_s2 + $0x20] sm:$0xf] }
 0x2cb   : > { %1540 = vmatpush.bf16.msra.mxu1 %v5352_v51 }
 0x2cc   : > { %v1310_v50 = vmul.f32 %v7782_v49, %v7782_v49  ;;  %1525 = vmatpush.bf16.msra.mxu0 %v5360_v35 }
 0x2ce   : > { %1313 = vadd.xlane.f32.xlu1 %v1310_v50  ;;  %v6244_v50 = vld [vmem:[%s7710_s2 + $0x28] sm:$0xf0] }
 0x2cf   : > { %v5356_v52 = vor.u32 %v6244_v50, %v5355_v48  ;;  %1541 = vmatpush.bf16.msra.mxu1 %v5340_v62  ;;  %v7865_v48 = vld [vmem:[%s9024_s3 + $0x8] sm:$0xff] }
 0x2d0   : > { %1526 = vmatpush.bf16.msra.mxu0 %v5348_v46 }
 0x2d1   : > { %1554 = vmatpush.bf16.msra.mxu2 %v5356_v52 }
 0x2d4   : > { %1527 = vmatpush.bf16.msra.mxu0 %v5336_v57 }
 0x2d5   : > { %1555 = vmatpush.bf16.msra.mxu2 %v5344_v63 }
 0x339   : > { %v1312_v56 = vpop.xlane.xlu1 %1311 }
 0x33a   : > { %v1315_v61 = vmul.f32 %v1312_v56, %v7774_v42 }
 0x33c   : > { %v1317_v0 = vadd.f32 1e-05, %v1315_v61 }
 0x33e   : > { %6609 = vrsqrt.f32 %v1317_v0  ;;  %vm1325_vm8 = vweird.f32 %v1317_v0 }
 0x341   : > { %v1314_v1 = vpop.xlane.xlu1 %1313 }
 0x342   : > { %v1316_v2 = vmul.f32 %v1314_v1, %v7774_v42 }
 0x344   : > { %v6610_v3 = vpop.eup %6609  ;;  %v1318_v4 = vadd.f32 1e-05, %v1316_v2 }
 0x345   : > { %v1320_v5 = vmul.f32 %v6610_v3, %v1317_v0  ;;  %vm1326_vm7 = vweird.f32 %v6610_v3 }
 0x346   : > { %6611 = vrsqrt.f32 %v1318_v4  ;;  %vm1327_vm9 = vmor %vm1325_vm8, %vm1326_vm7  ;;  %vm1335_vm11 = vweird.f32 %v1318_v4 }
 0x347   : > { %v1321_v6 = vmul.f32 %v6610_v3, %v1320_v5 }
 0x349   : > { %v1322_v7 = vmul.f32 0.5, %v1321_v6 }
 0x34b   : > { %v1323_v8 = vsub.f32 1.5, %v1322_v7 }
 0x34c   : > { %v6612_v9 = vpop.eup %6611 }
 0x34d   : > { %v1324_v10 = vmul.f32 %v6610_v3, %v1323_v8  ;;  %v1330_v11 = vmul.f32 %v6612_v9, %v1318_v4  ;;  %vm1336_vm10 = vweird.f32 %v6612_v9 }
 0x34e   : > { %vm1337_vm12 = vmor %vm1335_vm11, %vm1336_vm10 }
 0x34f   : > { %v1331_v12 = vmul.f32 %v6612_v9, %v1330_v11  ;;  %v1328_v13 = vsel %vm1327_vm9, %v6610_v3, %v1324_v10 }
 0x350   : > { %v1339_v16 = vmul.f32 %v1328_v13, %v7777_v45  ;;  %v1384_v45 = vld [vmem:[%s7718_s5] sm:$0x7] }
 0x351   : > { %v1332_v14 = vmul.f32 0.5, %v1331_v12  ;;  %v1386_v27 = vperm.slane %v1384_v45, 0  ;;  %v1387_v28 = vperm.slane %v1384_v45, 1  ;;  %v1388_v35 = vperm.slane %v1384_v45, 2 }
 0x352   : > { %v1344_v21 = vmul.f32 %v6601_v17, %v1339_v16 }
 0x353   : > { %v1333_v15 = vsub.f32 1.5, %v1332_v14 }
 0x354   : > { %v1349_v24 = vadd.f32 %v6602_v22, %v1344_v21 }
 0x355   : > { %v1334_v18 = vmul.f32 %v6612_v9, %v1333_v15 }
 0x357   : > { %v1338_v19 = vsel %vm1337_vm12, %v6612_v9, %v1334_v18 }
 0x358   : > { %v1340_v20 = vmul.f32 %v1338_v19, %v7782_v49 }
 0x35a   : > { %v1345_v23 = vmul.f32 %v6601_v17, %v1340_v20 }
 0x35c   : > { %v1350_v25 = vadd.f32 %v6602_v22, %v1345_v23 }
 0x35e   : > { %v1383_v26 = vpack.c.bf16 %v1350_v25, %v1349_v24 }
 0x360   : > { %1528 = vmatmul.bf16.vlgmr.msra.gmra.mxu0 %v1383_v26  ;;  %1542 = vmatmul.bf16.vlgmr.msra.gmra.mxu1 %v1383_v26 }
 0x361   : > { %1556 = vmatmul.bf16.vlgmr.msra.gmra.mxu2 %v1383_v26 }
 0x3dd   : > { %v1529_v29 = vpop.f32.mrf.mxu0  ;;  %v1543_v30 = vpop.f32.mrf.mxu1 }
 0x3de   : > { %v7843_v31 = vadd.f32 %v1529_v29, %v1386_v27  ;;  %v1544_v32 = vadd.f32 %v1543_v30, %v1387_v28 }
 0x3e0   : > { %1682 = vrot.lane.b32.xlu0 %v1544_v32, %s7269_s27  ;;  %1678 = vrot.lane.b32.xlu1 %v7843_v31, %s7269_s27 }
 0x3e4   : > { %v1557_v49 = vpop.f32.mrf.mxu2 }
 0x3e5   : > { %v1545_v33 = vpop.f32.mrf.mxu1  ;;  %v1558_v37 = vadd.f32 %v1557_v49, %v1388_v35  ;;  %v1531_v40 = vpop.f32.mrf.mxu0 }
 0x3e6   : > { %v1546_v34 = vadd.f32 %v1545_v33, %v1387_v28  ;;  %v1532_v41 = vadd.f32 %v1531_v40, %v1386_v27 }
 0x3e8   : > { %5429 = vmatpush.xpose.msk.msra.mxu3 %vm1564_vm13, %v1546_v34 }
 0x3ec   : > { %v1559_v36 = vpop.f32.mrf.mxu2  ;;  %5430 = vmatpush.xpose.msk.msra.mxu3 %vm1564_vm13, %v1544_v32 }
 0x3ed   : > { %v1560_v38 = vadd.f32 %v1559_v36, %v1388_v35 }
 0x3ef   : > { %v7850_v39 = vpack.i.bf16 %v1558_v37, %v1560_v38  ;;  %5431 = vmatmul.msk.f32.vlgmr.msra.gmra.mxu3 %vm1564_vm13, %v7843_v31 }
 0x3f0   : > { %1669 = vmatpush.msrb.mxu3 %v1560_v38 }
 0x3f2   : > { %1670 = vmatpush.msrb.mxu3 %v1558_v37 }
 0x3f7   : > { %5432 = vmatmul.msk.f32.gmra.mxu3 %vm1564_vm13, %v1532_v41 }
 0x452   : > { %v1683_v63 = vpop.permute.xlu0 %1682  ;;  %v1679_v2 = vpop.permute.xlu1 %1678 }
 0x472   : > { %v1594_v44 = vpop.f32.mrf.mxu3 }
 0x473   : > { %v1595_v46 = vadd.f32 %v1594_v44, %v7858_v43 }
 0x475   : > { %v1601_v47 = vsel %vm1600_vm14, %v1595_v46, -inf }
 0x476   : > { %1602 = vmax.xlane.f32.xlu2 %v1601_v47 }
 0x47a   : > { %v1597_v50 = vpop.f32.mrf.mxu3 }
 0x47b   : > { %v1598_v51 = vadd.f32 %v1597_v50, %v7865_v48 }
 0x47d   : > { %v1604_v52 = vsel %vm1600_vm14, %v1598_v51, -inf }
 0x47e   : > { %1605 = vmax.xlane.f32.xlu2 %v1604_v52 }
 0x496   : > { %1684 = vrot.lane.b32.xlu2 %v1546_v34, %s7269_s27 }
 0x49e   : > { %1808 = vrot.lane.b32.xlu2 %v1546_v34, %s7270_s17 }
 0x4a6   : > { %1680 = vrot.lane.b32.xlu2 %v1532_v41, %s7269_s27 }
 0x4ae   : > { %1928 = vrot.lane.b32.xlu2 %v1544_v32, %s7271_s16 }
 0x4b6   : > { %1926 = vrot.lane.b32.xlu2 %v1532_v41, %s7271_s16 }
 0x4e9   : > { %v1603_v53 = vpop.xlane.xlu2 %1602 }
 0x4ea   : > { %v1607_v54 = vsub.f32 %v1595_v46, %v1603_v53 }
 0x4ec   : > { %v1609_v55 = vmul.f32 1.442695, %v1607_v54 }
 0x4ee   : > { %6613 = vpow2.f32 %v1609_v55 }
 0x4f1   : > { %v1606_v56 = vpop.xlane.xlu2 %1605 }
 0x4f2   : > { %v1608_v57 = vsub.f32 %v1598_v51, %v1606_v56 }
 0x4f4   : > { %v6614_v58 = vpop.eup %6613  ;;  %v1611_v59 = vmul.f32 1.442695, %v1608_v57 }
 0x4f5   : > { %v1613_v60 = vsel %vm1600_vm14, %v6614_v58, 0.0 }
 0x4f6   : > { %6615 = vpow2.f32 %v1611_v59  ;;  %1614 = vadd.xlane.f32.xlu0 %v1613_v60 }
 0x4f9   : > { %v1685_v61 = vpop.permute.xlu2 %1684 }
 0x4fa   : > { %5435 = vmatpush.xpose.msk.msra.mxu3 %vm1564_vm13, %v1685_v61 }
 0x4fc   : > { %v6616_v62 = vpop.eup %6615 }
 0x4fd   : > { %v1616_v0 = vsel %vm1600_vm14, %v6616_v62, 0.0 }
 0x4fe   : > { %1617 = vadd.xlane.f32.xlu1 %v1616_v0  ;;  %5436 = vmatpush.xpose.msk.msra.mxu3 %vm1564_vm13, %v1683_v63 }
 0x501   : > { %v1809_v1 = vpop.permute.xlu2 %1808 }
 0x502   : > { %5441 = vmatpush.xpose.msk.msrb.mxu2 %vm1564_vm13, %v1809_v1 }
 0x509   : > { %v1681_v23 = vpop.permute.xlu2 %1680 }
 0x50a   : > { %1806 = vrot.lane.b32.xlu0 %v1544_v32, %s7270_s17 }
 0x511   : > { %v1929_v29 = vpop.permute.xlu2 %1928 }
 0x512   : > { %1930 = vrot.lane.b32.xlu0 %v1546_v34, %s7271_s16 }
 0x517   : > { %1802 = vrot.lane.b32.xlu1 %v7843_v31, %s7270_s17 }
 0x519   : > { %v1927_v49 = vpop.permute.xlu2 %1926 }
 0x51a   : > { %1804 = vrot.lane.b32.xlu0 %v1532_v41, %s7270_s17 }
 0x51f   : > { %1924 = vrot.lane.b32.xlu1 %v7843_v31, %s7271_s16 }
 0x569   : > { %v1615_v3 = vpop.xlane.xlu0 %1614 }
 0x56a   : > { %6617 = vrcp.f32 %v1615_v3  ;;  %v1630_v8 = vand.u32 2147483648, %v1615_v3  ;;  %v1628_v10 = vand.u32 2147483647, %v1615_v3  ;;  %vm1624_vm0 = vweird.f32 %v1615_v3 }
 0x56c   : > { %v1631_v13 = vor.u32 1.1754944e-38, %v1630_v8  ;;  %vm1629_vm2 = vcmp.eq.f32.partialorder %v1628_v10, 8.507059e+37 }
 0x570   : > { %v6618_v4 = vpop.eup %6617 }
 0x571   : > { %v1620_v5 = vmul.f32 %v6618_v4, %v1615_v3  ;;  %v1618_v6 = vpop.xlane.xlu1 %1617  ;;  %vm1625_vm15 = vweird.f32 %v6618_v4 }
 0x572   : > { %6619 = vrcp.f32 %v1618_v6  ;;  %vm1626_vm1 = vmor %vm1624_vm0, %vm1625_vm15  ;;  %v1645_v19 = vand.u32 2147483648, %v1618_v6  ;;  %v1643_v22 = vand.u32 2147483647, %v1618_v6  ;;  %vm1639_vm4 = vweird.f32 %v1618_v6 }
 0x573   : > { %v1621_v7 = vsub.f32 1.0, %v1620_v5 }
 0x574   : > { %v1646_v25 = vor.u32 1.1754944e-38, %v1645_v19  ;;  %vm1644_vm6 = vcmp.eq.f32.partialorder %v1643_v22, 8.507059e+37 }
 0x575   : > { %v1622_v9 = vmul.f32 %v6618_v4, %v1621_v7 }
 0x577   : > { %v1623_v11 = vadd.f32 %v6618_v4, %v1622_v9 }
 0x578   : > { %v6620_v12 = vpop.eup %6619 }
 0x579   : > { %v1635_v14 = vmul.f32 %v6620_v12, %v1618_v6  ;;  %v1627_v15 = vsel %vm1626_vm1, %v6618_v4, %v1623_v11  ;;  %vm1640_vm3 = vweird.f32 %v6620_v12 }
 0x57a   : > { %v1632_v16 = vsel %vm1629_vm2, %v1631_v13, %v1627_v15  ;;  %vm1641_vm5 = vmor %vm1639_vm4, %vm1640_vm3 }
 0x57b   : > { %v1636_v17 = vsub.f32 1.0, %v1635_v14  ;;  %v1633_v18 = vmul.f32 %v6614_v58, %v1632_v16 }
 0x57c   : > { %v1807_v20 = vpop.permute.xlu0 %1806 }
 0x57d   : > { %v1637_v21 = vmul.f32 %v6620_v12, %v1636_v17  ;;  %5433 = vmatmul.msk.f32.vlgmr.msrb.gmra.mxu3 %vm1600_vm14, %v1633_v18  ;;  %5442 = vmatpush.xpose.msk.msrb.mxu2 %vm1564_vm13, %v1807_v20 }
 0x57f   : > { %v1638_v24 = vadd.f32 %v6620_v12, %v1637_v21 }
 0x581   : > { %v1642_v26 = vsel %vm1641_vm5, %v6620_v12, %v1638_v24 }
 0x582   : > { %v1647_v45 = vsel %vm1644_vm6, %v1646_v25, %v1642_v26 }
 0x583   : > { %v1648_v27 = vmul.f32 %v6616_v62, %v1647_v45 }
 0x584   : > { %v1931_v28 = vpop.permute.xlu0 %1930 }
 0x585   : > { %5434 = vmatmul.msk.f32.gmra.mxu3 %vm1600_vm14, %v1648_v27 }
 0x586   : > { %5447 = vmatpush.xpose.msk.msrb.mxu3 %vm1564_vm13, %v1931_v28 }
 0x589   : > { %v1803_v30 = vpop.permute.xlu1 %1802 }
 0x58a   : > { %5448 = vmatpush.xpose.msk.msrb.mxu3 %vm1564_vm13, %v1929_v29  ;;  %5443 = vmatmul.msk.f32.vlgmr.msrb.gmra.mxu2 %vm1564_vm13, %v1803_v30 }
 0x58c   : > { %v1805_v31 = vpop.permute.xlu0 %1804 }
 0x58d   : > { %5437 = vmatmul.msk.f32.vlgmr.msra.gmra.mxu3 %vm1564_vm13, %v1679_v2 }
 0x591   : > { %v1925_v32 = vpop.permute.xlu1 %1924 }
 0x592   : > { %5444 = vmatmul.msk.f32.gmra.mxu2 %vm1564_vm13, %v1805_v31 }
 0x595   : > { %5438 = vmatmul.msk.f32.gmra.mxu3 %vm1564_vm13, %v1681_v23 }
 0x59d   : > { %5449 = vmatmul.msk.f32.vlgmr.msrb.gmra.mxu3 %vm1564_vm13, %v1925_v32 }
 0x5a5   : > { %5450 = vmatmul.msk.f32.gmra.mxu3 %vm1564_vm13, %v1927_v49 }
 0x600   : > { %v7897_v33 = vpop.f32.mrf.mxu3 }
 0x608   : > { %v7899_v34 = vpop.f32.mrf.mxu3 }
 0x60d   : > { %v1835_v35 = vpop.f32.mrf.mxu2 }
 0x60e   : > { %v1836_v36 = vadd.f32 %v1835_v35, %v7858_v43 }
 0x610   : > { %v1711_v37 = vpop.f32.mrf.mxu3  ;;  %v1841_v38 = vsel %vm1600_vm14, %v1836_v36, -inf }
 0x611   : > { %v1712_v40 = vadd.f32 %v1711_v37, %v7858_v43  ;;  %1842 = vmax.xlane.f32.xlu2 %v1841_v38 }
 0x613   : > { %v1717_v41 = vsel %vm1600_vm14, %v1712_v40, -inf }
 0x614   : > { %1718 = vmax.xlane.f32.xlu1 %v1717_v41 }
 0x615   : > { %v1838_v50 = vpop.f32.mrf.mxu2 }
 0x616   : > { %v1839_v51 = vadd.f32 %v1838_v50, %v7865_v48 }
 0x618   : > { %v1714_v44 = vpop.f32.mrf.mxu3  ;;  %v1844_v54 = vsel %vm1600_vm14, %v1839_v51, -inf }
 0x619   : > { %v1715_v46 = vadd.f32 %v1714_v44, %v7865_v48 }
 0x61b   : > { %v1720_v47 = vsel %vm1600_vm14, %v1715_v46, -inf }
 0x61c   : > { %1721 = vmax.xlane.f32.xlu0 %v1720_v47 }
 0x620   : > { %v1957_v52 = vpop.f32.mrf.mxu3 }
 0x621   : > { %v1958_v53 = vadd.f32 %v1957_v52, %v7858_v43 }
 0x623   : > { %v1963_v55 = vsel %vm1600_vm14, %v1958_v53, -inf }
 0x624   : > { %1845 = vmax.xlane.f32.xlu0 %v1844_v54  ;;  %1964 = vmax.xlane.f32.xlu1 %v1963_v55 }
 0x628   : > { %v1960_v56 = vpop.f32.mrf.mxu3 }
 0x629   : > { %v1961_v57 = vadd.f32 %v1960_v56, %v7865_v48 }
 0x62b   : > { %v1966_v58 = vsel %vm1600_vm14, %v1961_v57, -inf }
 0x62c   : > { %1967 = vmax.xlane.f32.xlu2 %v1966_v58 }
 0x684   : > { %v1843_v59 = vpop.xlane.xlu2 %1842 }
 0x685   : > { %v1847_v60 = vsub.f32 %v1836_v36, %v1843_v59 }
 0x687   : > { %v1849_v61 = vmul.f32 1.442695, %v1847_v60  ;;  %v1719_v62 = vpop.xlane.xlu1 %1718 }
 0x688   : > { %v1723_v63 = vsub.f32 %v1712_v40, %v1719_v62 }
 0x689   : > { %6621 = vpow2.f32 %v1849_v61 }
 0x68a   : > { %v1725_v0 = vmul.f32 1.442695, %v1723_v63 }
 0x68c   : > { %6623 = vpow2.f32 %v1725_v0 }
 0x68f   : > { %v7913_v43 = vpop.eup %6621  ;;  %v1722_v1 = vpop.xlane.xlu0 %1721 }
 0x690   : > { %v1724_v2 = vsub.f32 %v1715_v46, %v1722_v1  ;;  %v1853_v3 = vsel %vm1600_vm14, %v7913_v43, 0.0 }
 0x691   : > { %1854 = vadd.xlane.f32.xlu2 %v1853_v3 }
 0x692   : > { %v7917_v48 = vpop.eup %6623  ;;  %v1727_v4 = vmul.f32 1.442695, %v1724_v2 }
 0x693   : > { %v1729_v5 = vsel %vm1600_vm14, %v7917_v48, 0.0 }
 0x694   : > { %6625 = vpow2.f32 %v1727_v4  ;;  %1730 = vadd.xlane.f32.xlu1 %v1729_v5 }
 0x697   : > { %v1846_v6 = vpop.xlane.xlu0 %1845  ;;  %v1965_v7 = vpop.xlane.xlu1 %1964 }
 0x698   : > { %v1848_v8 = vsub.f32 %v1839_v51, %v1846_v6  ;;  %v1969_v9 = vsub.f32 %v1958_v53, %v1965_v7 }
 0x69a   : > { %v7921_v10 = vpop.eup %6625  ;;  %v1851_v11 = vmul.f32 1.442695, %v1848_v8  ;;  %v1971_v12 = vmul.f32 1.442695, %v1969_v9 }
 0x69b   : > { %v1732_v13 = vsel %vm1600_vm14, %v7921_v10, 0.0 }
 0x69c   : > { %6627 = vpow2.f32 %v1851_v11  ;;  %1733 = vadd.xlane.f32.xlu0 %v1732_v13 }
 0x69d   : > { %6629 = vpow2.f32 %v1971_v12 }
 0x69f   : > { %v1968_v14 = vpop.xlane.xlu2 %1967 }
 0x6a0   : > { %v1970_v15 = vsub.f32 %v1961_v57, %v1968_v14 }
 0x6a2   : > { %v7925_v16 = vpop.eup %6627  ;;  %v1973_v17 = vmul.f32 1.442695, %v1970_v15 }
 0x6a3   : > { %v7927_v18 = vpop.eup %6629  ;;  %v1856_v19 = vsel %vm1600_vm14, %v7925_v16, 0.0 }
 0x6a4   : > { %6631 = vpow2.f32 %v1973_v17  ;;  %v1975_v20 = vsel %vm1600_vm14, %v7927_v18, 0.0  ;;  %1857 = vadd.xlane.f32.xlu2 %v1856_v19 }
 0x6a5   : > { %1976 = vadd.xlane.f32.xlu1 %v1975_v20 }
 0x6aa   : > { %v7933_v21 = vpop.eup %6631 }
 0x6ab   : > { %v1978_v22 = vsel %vm1600_vm14, %v7933_v21, 0.0 }
 0x6ad   : > { %1979 = vadd.xlane.f32.xlu1 %v1978_v22 }
 0x6b0   : > { %6572 = vrot.lane.b32.xlu0 %v7850_v39, %s7269_s27 }
 0x6bc   : > { %6577 = vrot.lane.b32.xlu2 %v7850_v39, %s7270_s17 }
 0x6c6   : > { %6582 = vrot.lane.b32.xlu1 %v7850_v39, %s7271_s16 }
 0x704   : > { %v1855_v23 = vpop.xlane.xlu2 %1854 }
 0x705   : > { %6633 = vrcp.f32 %v1855_v23  ;;  %v1870_v38 = vand.u32 2147483648, %v1855_v23  ;;  %vm1864_vm8 = vweird.f32 %v1855_v23  ;;  %v1868_v40 = vand.u32 2147483647, %v1855_v23 }
 0x707   : > { %v1731_v24 = vpop.xlane.xlu1 %1730  ;;  %v1871_v50 = vor.u32 1.1754944e-38, %v1870_v38  ;;  %vm1869_vm12 = vcmp.eq.f32.partialorder %v1868_v40, 8.507059e+37 }
 0x708   : > { %6635 = vrcp.f32 %v1731_v24  ;;  %v1746_v46 = vand.u32 2147483648, %v1731_v24  ;;  %vm1740_vm11 = vweird.f32 %v1731_v24  ;;  %v1744_v51 = vand.u32 2147483647, %v1731_v24 }
 0x70a   : > { %v1747_v58 = vor.u32 1.1754944e-38, %v1746_v46  ;;  %vm1745_vm0 = vcmp.eq.f32.partialorder %v1744_v51, 8.507059e+37 }
 0x70b   : > { %v6634_v25 = vpop.eup %6633 }
 0x70c   : > { %v1860_v26 = vmul.f32 %v6634_v25, %v1855_v23  ;;  %vm1865_vm7 = vweird.f32 %v6634_v25 }
 0x70d   : > { %vm1866_vm9 = vmor %vm1864_vm8, %vm1865_vm7 }
 0x70e   : > { %v6636_v45 = vpop.eup %6635  ;;  %v1861_v29 = vsub.f32 1.0, %v1860_v26 }
 0x70f   : > { %v1736_v27 = vmul.f32 %v6636_v45, %v1731_v24  ;;  %v7943_v28 = vpop.xlane.xlu0 %1733  ;;  %vm1741_vm10 = vweird.f32 %v6636_v45 }
 0x710   : > { %6637 = vrcp.f32 %v7943_v28  ;;  %v1862_v31 = vmul.f32 %v6634_v25, %v1861_v29  ;;  %vm7953_vm15 = vmor %vm1740_vm11, %vm1741_vm10  ;;  %vm1755_vm2 = vweird.f32 %v7943_v28  ;;  %v1761_v8 = vand.u32 2147483648, %v7943_v28 }
 0x711   : > { %v1737_v30 = vsub.f32 1.0, %v1736_v27  ;;  %v1759_v15 = vand.u32 2147483647, %v7943_v28 }
 0x712   : > { %v1863_v39 = vadd.f32 %v6634_v25, %v1862_v31  ;;  %v1762_v22 = vor.u32 1.1754944e-38, %v1761_v8 }
 0x713   : > { %v1738_v49 = vmul.f32 %v6636_v45, %v1737_v30  ;;  %vm1760_vm8 = vcmp.eq.f32.partialorder %v1759_v15, 8.507059e+37 }
 0x714   : > { %v1867_v44 = vsel %vm1866_vm9, %v6634_v25, %v1863_v39 }
 0x715   : > { %v1739_v41 = vadd.f32 %v6636_v45, %v1738_v49  ;;  %v1872_v54 = vsel %vm1869_vm12, %v1871_v50, %v1867_v44 }
 0x716   : > { %v7946_v32 = vpop.eup %6637  ;;  %v1873_v2 = vmul.f32 %v7913_v43, %v1872_v54  ;;  %v6268_v54 = vld [vmem:[%s7721_s7 + $0x28] sm:$0xff] }
 0x717   : > { %v1858_v35 = vpop.xlane.xlu2 %1857  ;;  %v1751_v36 = vmul.f32 %v7946_v32, %v7943_v28  ;;  %v1743_v57 = vsel %vm7953_vm15, %v6636_v45, %v1739_v41  ;;  %vm1756_vm3 = vweird.f32 %v7946_v32 }
 0x718   : > { %v7950_v37 = vpop.xlane.xlu1 %1976  ;;  %6639 = vrcp.f32 %v1858_v35  ;;  %v1885_v62 = vand.u32 2147483648, %v1858_v35  ;;  %v1748_v3 = vsel %vm1745_vm0, %v1747_v58, %v1743_v57  ;;  %v1883_v7 = vand.u32 2147483647, %v1858_v35  ;;  %vm1757_vm7 = vmor %vm1755_vm2, %vm1756_vm3  ;;  %v6267_v57 = vld [vmem:[%s7721_s7 + $0x20] sm:$0xff] }
 0x719   : > { %v1752_v47 = vsub.f32 1.0, %v1751_v36  ;;  %6641 = vrcp.f32 %v7950_v37  ;;  %vm1879_vm4 = vweird.f32 %v1858_v35  ;;  %v1749_v14 = vmul.f32 %v7917_v48, %v1748_v3 }
 0x71a   : > { %v1886_v13 = vor.u32 1.1754944e-38, %v1885_v62  ;;  %vm1884_vm6 = vcmp.eq.f32.partialorder %v1883_v7, 8.507059e+37  ;;  %v1992_v30 = vand.u32 2147483648, %v7950_v37  ;;  %vm1986_vm10 = vweird.f32 %v7950_v37  ;;  %v6266_v62 = vld [vmem:[%s7721_s7 + $0x18] sm:$0xff] }
 0x71b   : > { %v1753_v59 = vmul.f32 %v7946_v32, %v1752_v47  ;;  %v1990_v31 = vand.u32 2147483647, %v7950_v37  ;;  %vm2075_vm3 = vcmask 785408  }
 0x71c   : > { %v1993_v49 = vor.u32 1.1754944e-38, %v1992_v30 }
 0x71d   : > { %v1754_v9 = vadd.f32 %v7946_v32, %v1753_v59  ;;  %vm1991_vm12 = vcmp.eq.f32.partialorder %v1990_v31, 8.507059e+37 }
 0x71e   : > { %v6640_v52 = vpop.eup %6639 }
 0x71f   : > { %v1875_v55 = vmul.f32 %v6640_v52, %v1858_v35  ;;  %v6578_v56 = vpop.permute.xlu2 %6577  ;;  %v6642_v4 = vpop.eup %6641  ;;  %vm1880_vm1 = vweird.f32 %v6640_v52  ;;  %v1758_v20 = vsel %vm1757_vm7, %v7946_v32, %v1754_v9 }
 0x720   : > { %v6579_v60 = vunpack.i.l.bf16 %v6578_v56  ;;  %v7960_v63 = vpop.xlane.xlu1 %1979  ;;  %v6580_v0 = vunpack.i.h.bf16 %v6578_v56  ;;  %v1982_v12 = vmul.f32 %v6642_v4, %v7950_v37  ;;  %vm1881_vm5 = vmor %vm1879_vm4, %vm1880_vm1  ;;  %v1763_v25 = vsel %vm1760_vm8, %v1762_v22, %v1758_v20  ;;  %v6603_v20 = vld [vmem:[%s922_s1] ss:$0 sm:$0xff] }
 0x721   : > { %v1876_v61 = vsub.f32 1.0, %v1875_v55  ;;  %6643 = vrcp.f32 %v7960_v63  ;;  %v1764_v27 = vmul.f32 %v7921_v10, %v1763_v25  ;;  %vm1987_vm9 = vweird.f32 %v6642_v4  ;;  %v6666_v25 = vld [vmem:[#allocation2 + $0x8] sm:$0xff] }
 0x722   : > { %v6573_v1 = vpop.permute.xlu0 %6572  ;;  %1915 = vmatpush.msra.mxu2 %v6579_v60  ;;  %v1983_v23 = vsub.f32 1.0, %v1982_v12  ;;  %vm1988_vm11 = vmor %vm1986_vm10, %vm1987_vm9  ;;  %v2007_v38 = vand.u32 2147483648, %v7960_v63  ;;  %vm2001_vm0 = vweird.f32 %v7960_v63  ;;  %v2005_v41 = vand.u32 2147483647, %v7960_v63 }
 0x723   : > { %v1877_v5 = vmul.f32 %v6640_v52, %v1876_v61  ;;  %v6574_v6 = vunpack.i.l.bf16 %v6573_v1  ;;  %v6575_v43 = vunpack.i.h.bf16 %v6573_v1  ;;  %v6263_v1 = vld [vmem:[%s7721_s7] sm:$0xff] }
 0x724   : > { %1916 = vmatpush.msra.mxu2 %v6580_v0  ;;  %v1984_v26 = vmul.f32 %v6642_v4, %v1983_v23  ;;  %v2008_v46 = vor.u32 1.1754944e-38, %v2007_v38  ;;  %vm2006_vm2 = vcmp.eq.f32.partialorder %v2005_v41, 8.507059e+37  ;;  %v6264_v0 = vld [vmem:[%s7721_s7 + $0x8] sm:$0xff] }
 0x725   : > { %1793 = vmatpush.msrb.mxu0 %v6574_v6  ;;  %5445 = vmatmul.msk.f32.vlgmr.msra.gmra.mxu2 %vm1600_vm14, %v1873_v2  ;;  %v1878_v11 = vadd.f32 %v6640_v52, %v1877_v5  ;;  %v6665_v23 = vld [vmem:[#allocation2] sm:$0xff]  ;;  %v5607_v38 = vld [vmem:[%s7737_s30 + $0xe8] sm:$0xf] }
 0x726   : > { %v1985_v28 = vadd.f32 %v6642_v4, %v1984_v26 }
 0x727   : > { %1794 = vmatpush.msrb.mxu0 %v6575_v43  ;;  %v1882_v17 = vsel %vm1881_vm5, %v6640_v52, %v1878_v11  ;;  %v6644_v48 = vpop.eup %6643  ;;  %v6270_v52 = vld [vmem:[%s7721_s7 + $0x38] sm:$0xff] }
 0x728   : > { %5439 = vmatmul.msk.f32.vlgmr.msrb.gmra.mxu0 %vm1600_vm14, %v1749_v14  ;;  %v1887_v19 = vsel %vm1884_vm6, %v1886_v13, %v1882_v17  ;;  %v1997_v45 = vmul.f32 %v6644_v48, %v7960_v63  ;;  %vm2002_vm15 = vweird.f32 %v6644_v48  ;;  %2143 = vmatpush.bf16.msrb.mxu1 %v6270_v52  ;;  %v6265_v63 = vld [vmem:[%s7721_s7 + $0x10] sm:$0xff]  ;;  %v6295_v52 = vld [vmem:[%s7737_s30 + $0xc4] sm:$0xf] }
 0x729   : > { %v1888_v24 = vmul.f32 %v7925_v16, %v1887_v19  ;;  %v1989_v16 = vsel %vm1988_vm11, %v6642_v4, %v1985_v28  ;;  %vm2003_vm1 = vmor %vm2001_vm0, %vm2002_vm15 }
 0x72a   : > { %v1998_v29 = vsub.f32 1.0, %v1997_v45  ;;  %v1994_v39 = vsel %vm1991_vm12, %v1993_v49, %v1989_v16  ;;  %v5599_v49 = vld [vmem:[%s7737_s30 + $0xe0] sm:$0xf] }
 0x72b   : > { %v1995_v37 = vmul.f32 %v7927_v18, %v1994_v39  ;;  %v6269_v18 = vld [vmem:[%s7721_s7 + $0x30] sm:$0xff]  ;;  %v6299_v39 = vld [vmem:[%s7737_s30 + $0xe4] sm:$0xf] }
 0x72c   : > { %v1999_v32 = vmul.f32 %v6644_v48, %v1998_v29  ;;  %2144 = vmatpush.bf16.msrb.mxu1 %v6269_v18 }
 0x72d   : > { %5446 = vmatmul.msk.f32.gmra.mxu2 %vm1600_vm14, %v1888_v24 }
 0x72e   : > { %v2000_v10 = vadd.f32 %v6644_v48, %v1999_v32 }
 0x730   : > { %5440 = vmatmul.msk.f32.gmra.mxu0 %vm1600_vm14, %v1764_v27  ;;  %v2004_v44 = vsel %vm2003_vm1, %v6644_v48, %v2000_v10  ;;  %2145 = vmatpush.bf16.msrb.mxu1 %v6268_v54  ;;  %v5601_v10 = vld [vmem:[%s7737_s30 + $0xf0] sm:$0xf0]  ;;  %v5591_v54 = vld [vmem:[%s7737_s30 + $0xc8] sm:$0xf] }
 0x731   : > { %v2009_v47 = vsel %vm2006_vm2, %v2008_v46, %v2004_v44  ;;  %v6300_v44 = vld [vmem:[%s7737_s30 + $0xec] sm:$0xf]  ;;  %v5609_v46 = vld [vmem:[%s7737_s30 + $0xf8] sm:$0xf0] }
 0x732   : > { %v2010_v50 = vmul.f32 %v7933_v21, %v2009_v47  ;;  %v5612_v47 = vor.u32 %v6300_v44, %v5609_v46  ;;  %v6280_v46 = vld [vmem:[%s7737_s30 + $0x4c] sm:$0xf] }
 0x734   : > { %2146 = vmatpush.bf16.msrb.mxu1 %v6267_v57 }
 0x738   : > { %v6583_v35 = vpop.permute.xlu1 %6582  ;;  %2147 = vmatpush.bf16.msrb.mxu1 %v6266_v62  ;;  %v6291_v62 = vld [vmem:[%s7737_s30 + $0xa4] sm:$0xf] }
 0x739   : > { %v6584_v36 = vunpack.i.l.bf16 %v6583_v35  ;;  %v6585_v40 = vunpack.i.h.bf16 %v6583_v35  ;;  %v6301_v35 = vld [vmem:[%s7737_s30 + $0xec] sm:$0xf0] }
 0x73b   : > { %2037 = vmatpush.msra.mxu0 %v6584_v36  ;;  %v5600_v36 = vor.u32 %v6301_v35, %v5599_v49  ;;  %v5519_v35 = vld [vmem:[%s7737_s30 + $0x40] sm:$0xf] }
 0x73c   : > { %2148 = vmatpush.bf16.msrb.mxu1 %v6265_v63 }
 0x73d   : > { %2038 = vmatpush.msra.mxu0 %v6585_v40  ;;  %v6302_v40 = vld [vmem:[%s7737_s30 + $0xf4] sm:$0xf0]  ;;  %2420 = vmatpush.bf16.msrb.mxu2 %v5600_v36  ;;  %v6279_v36 = vld [vmem:[%s7737_s30 + $0x44] sm:$0xf] }
 0x73e   : > { %5451 = vmatmul.msk.f32.vlgmr.msra.gmra.mxu0 %vm1600_vm14, %v1995_v37  ;;  %v5604_v37 = vor.u32 %v6299_v39, %v5601_v10  ;;  %v5608_v41 = vor.u32 %v6302_v40, %v5607_v38  ;;  %v6281_v39 = vld [vmem:[%s7737_s30 + $0x4c] sm:$0xf0]  ;;  %v5521_v38 = vld [vmem:[%s7737_s30 + $0x50] sm:$0xf0]  ;;  %v5527_v40 = vld [vmem:[%s7737_s30 + $0x48] sm:$0xf] }
 0x73f   : > { %v5520_v10 = vor.u32 %v6281_v39, %v5519_v35  ;;  %v6605_v35 = vld [vmem:[%s940_s9] ss:$0 sm:$0xff] }
 0x740   : > { %2149 = vmatpush.bf16.msrb.mxu1 %v6264_v0  ;;  %2434 = vmatpush.bf16.msra.mxu3 %v5604_v37  ;;  %v5569_v0 = vld [vmem:[%s7737_s30 + $0xb0] sm:$0xf0]  ;;  %v6282_v37 = vld [vmem:[%s7737_s30 + $0x54] sm:$0xf0] }
 0x741   : > { %2448 = vmatpush.bf16.msrb.mxu0 %v5608_v41  ;;  %v5524_v41 = vor.u32 %v6279_v36, %v5521_v38  ;;  %v5528_v44 = vor.u32 %v6282_v37, %v5527_v40 }
 0x744   : > { %2150 = vmatpush.bf16.msrb.mxu1 %v6263_v1  ;;  %v5575_v1 = vld [vmem:[%s7737_s30 + $0xa8] sm:$0xf] }
 0x746   : > { %5452 = vmatmul.msk.f32.gmra.mxu0 %vm1600_vm14, %v2010_v50  ;;  %vm2072_vm14 = vcmask 523264   ;;  %v5583_v50 = vld [vmem:[%s7737_s30 + $0xc0] sm:$0xf] }
 0x748   : > { %2462 = vmatpush.bf16.msra.mxu1 %v5612_v47  ;;  %v5529_v47 = vld [vmem:[%s7737_s30 + $0x58] sm:$0xf0] }
 0x7a5   : > { %v1796_v51 = vpop.f32.mrf.mxu0 }
 0x7a8   : > { %v1918_v53 = vpop.f32.mrf.mxu2 }
 0x7ad   : > { %v1799_v55 = vpop.f32.mrf.mxu0 }
 0x7ae   : > { %v6586_v56 = vpack.i.bf16 %v1799_v55, %v1796_v51  ;;  %v6297_v51 = vld [vmem:[%s7737_s30 + $0xcc] sm:$0xf0]  ;;  %v6298_v55 = vld [vmem:[%s7737_s30 + $0xd4] sm:$0xf0] }
 0x7af   : > { %v5584_v18 = vor.u32 %v6297_v51, %v5583_v50  ;;  %v5592_v57 = vor.u32 %v6298_v55, %v5591_v54  ;;  %v5532_v50 = vor.u32 %v6280_v46, %v5529_v47  ;;  %v5503_v51 = vld [vmem:[%s7737_s30 + $0x20] sm:$0xf]  ;;  %v5505_v55 = vld [vmem:[%s7737_s30 + $0x30] sm:$0xf0] }
 0x7b0   : > { %6587 = vrot.lane.b32.xlu0 %v6586_v56, %s7271_s16  ;;  %v1921_v21 = vpop.f32.mrf.mxu2 }
 0x7b1   : > { %v6591_v58 = vpack.i.bf16 %v1921_v21, %v1918_v53  ;;  %v5585_v53 = vld [vmem:[%s7737_s30 + $0xd0] sm:$0xf0]  ;;  %v6296_v21 = vld [vmem:[%s7737_s30 + $0xcc] sm:$0xf]  ;;  %2421 = vmatpush.bf16.msrb.mxu2 %v5584_v18  ;;  %2449 = vmatpush.bf16.msrb.mxu0 %v5592_v57  ;;  %v6275_v18 = vld [vmem:[%s7737_s30 + $0x24] sm:$0xf] }
 0x7b2   : > { %v5588_v56 = vor.u32 %v6295_v52, %v5585_v53  ;;  %v6277_v52 = vld [vmem:[%s7737_s30 + $0x2c] sm:$0xf0]  ;;  %v6278_v57 = vld [vmem:[%s7737_s30 + $0x34] sm:$0xf0] }
 0x7b3   : > { %v5504_v54 = vor.u32 %v6277_v52, %v5503_v51 }
 0x7b4   : > { %2435 = vmatpush.bf16.msra.mxu3 %v5588_v56  ;;  %v5511_v56 = vld [vmem:[%s7737_s30 + $0x28] sm:$0xf] }
 0x7b8   : > { %6592 = vrot.lane.b32.xlu0 %v6591_v58, %s7270_s17  ;;  %v5593_v58 = vld [vmem:[%s7737_s30 + $0xd8] sm:$0xf0] }
 0x7bb   : > { %v2040_v59 = vpop.f32.mrf.mxu0 }
 0x7c3   : > { %v2043_v60 = vpop.f32.mrf.mxu0 }
 0x7c4   : > { %v6596_v61 = vpack.i.bf16 %v2043_v60, %v2040_v59  ;;  %v5596_v59 = vor.u32 %v6296_v21, %v5593_v58  ;;  %v5567_v60 = vld [vmem:[%s7737_s30 + $0xa0] sm:$0xf]  ;;  %v5508_v58 = vor.u32 %v6275_v18, %v5505_v55 }
 0x7c6   : > { %6597 = vrot.lane.b32.xlu2 %v6596_v61, %s7269_s27  ;;  %v6293_v61 = vld [vmem:[%s7737_s30 + $0xac] sm:$0xf0]  ;;  %2463 = vmatpush.bf16.msra.mxu1 %v5596_v59  ;;  %v5512_v59 = vor.u32 %v6278_v57, %v5511_v56 }
 0x7c7   : > { %v5568_v63 = vor.u32 %v6293_v61, %v5567_v60  ;;  %v6276_v60 = vld [vmem:[%s7737_s30 + $0x2c] sm:$0xf]  ;;  %v5513_v61 = vld [vmem:[%s7737_s30 + $0x38] sm:$0xf0] }
 0x7c9   : > { %2422 = vmatpush.bf16.msrb.mxu2 %v5568_v63  ;;  %v5516_v63 = vor.u32 %v6276_v60, %v5513_v61 }
 0x820   : > { %v6598_v5 = vpop.permute.xlu2 %6597 }
 0x821   : > { %v6600_v9 = vunpack.i.h.bf16 %v6598_v5  ;;  %v6599_v43 = vunpack.i.l.bf16 %v6598_v5  ;;  %v6292_v5 = vld [vmem:[%s7737_s30 + $0xac] sm:$0xf] }
 0x822   : > { %v6588_v2 = vpop.permute.xlu0 %6587 }
 0x823   : > { %v6590_v3 = vunpack.i.h.bf16 %v6588_v2  ;;  %v6589_v4 = vunpack.i.l.bf16 %v6588_v2  ;;  %v6294_v2 = vld [vmem:[%s7737_s30 + $0xb4] sm:$0xf0] }
 0x825   : > { %v2071_v11 = vsel %vm1564_vm13, %v7899_v34, %v6590_v3  ;;  %v2070_v12 = vsel %vm1564_vm13, %v7897_v33, %v6589_v4  ;;  %v5572_v3 = vor.u32 %v6291_v62, %v5569_v0  ;;  %v5576_v4 = vor.u32 %v6294_v2, %v5575_v1  ;;  %v5487_v62 = vld [vmem:[%s7737_s30] sm:$0xf]  ;;  %v6273_v0 = vld [vmem:[%s7737_s30 + $0xc] sm:$0xf0]  ;;  %v6271_v1 = vld [vmem:[%s7737_s30 + $0x4] sm:$0xf] }
 0x826   : > { %v5489_v2 = vld [vmem:[%s7737_s30 + $0x10] sm:$0xf0] }
 0x827   : > { %2436 = vmatpush.bf16.msra.mxu3 %v5572_v3  ;;  %2450 = vmatpush.bf16.msrb.mxu0 %v5576_v4  ;;  %v5488_v4 = vor.u32 %v6273_v0, %v5487_v62 }
 0x82a   : > { %v6593_v6 = vpop.permute.xlu0 %6592 }
 0x82b   : > { %v6595_v7 = vunpack.i.h.bf16 %v6593_v6  ;;  %v6594_v8 = vunpack.i.l.bf16 %v6593_v6  ;;  %v5577_v6 = vld [vmem:[%s7737_s30 + $0xb8] sm:$0xf0] }
 0x82d   : > { %v2074_v13 = vsel %vm2072_vm14, %v2071_v11, %v6595_v7  ;;  %v2073_v14 = vsel %vm2072_vm14, %v2070_v12, %v6594_v8  ;;  %v5580_v7 = vor.u32 %v6292_v5, %v5577_v6  ;;  %v5551_v8 = vld [vmem:[%s7737_s30 + $0x80] sm:$0xf]  ;;  %v5553_v12 = vld [vmem:[%s7737_s30 + $0x90] sm:$0xf0]  ;;  %v5495_v5 = vld [vmem:[%s7737_s30 + $0x8] sm:$0xf] }
 0x82e   : > { %v2076_v15 = vsel %vm2075_vm3, %v2073_v14, %v6599_v43  ;;  %v2077_v17 = vsel %vm2075_vm3, %v2074_v13, %v6600_v9  ;;  %v6289_v9 = vld [vmem:[%s7737_s30 + $0x8c] sm:$0xf0]  ;;  %v6287_v43 = vld [vmem:[%s7737_s30 + $0x84] sm:$0xf]  ;;  %v5559_v13 = vld [vmem:[%s7737_s30 + $0x88] sm:$0xf] }
 0x82f   : > { %v2094_v19 = vpack.c.bf16 %v2077_v17, %v2076_v15  ;;  %2464 = vmatpush.bf16.msra.mxu1 %v5580_v7  ;;  %v5552_v11 = vor.u32 %v6289_v9, %v5551_v8  ;;  %v6290_v14 = vld [vmem:[%s7737_s30 + $0x94] sm:$0xf0]  ;;  %v5556_v15 = vor.u32 %v6287_v43, %v5553_v12  ;;  %v5492_v7 = vor.u32 %v6271_v1, %v5489_v2  ;;  %v6272_v9 = vld [vmem:[%s7737_s30 + $0xc] sm:$0xf]  ;;  %v5497_v43 = vld [vmem:[%s7737_s30 + $0x18] sm:$0xf0] }
 0x830   : > { %v5560_v17 = vor.u32 %v6290_v14, %v5559_v13  ;;  %v6274_v6 = vld [vmem:[%s7737_s30 + $0x14] sm:$0xf0] }
 0x831   : > { %2151 = vmatmul.bf16.vlgmr.msrb.gmra.mxu1 %v2094_v19  ;;  %v6288_v19 = vld [vmem:[%s7737_s30 + $0x8c] sm:$0xf]  ;;  %2423 = vmatpush.bf16.msrb.mxu2 %v5552_v11  ;;  %v5496_v8 = vor.u32 %v6274_v6, %v5495_v5  ;;  %v5500_v11 = vor.u32 %v6272_v9, %v5497_v43 }
 0x832   : > { %2437 = vmatpush.bf16.msra.mxu3 %v5556_v15  ;;  %2451 = vmatpush.bf16.msrb.mxu0 %v5560_v17 }
 0x8ae   : > { %v2152_v22 = vpop.f32.mrf.mxu1 }
 0x8af   : > { %v2157_v48 = vadd.f32 %v6665_v23, %v2152_v22  ;;  %v5535_v23 = vld [vmem:[%s7737_s30 + $0x60] sm:$0xf] }
 0x8b1   : > { %v8011_v24 = vadd.f32 %v6603_v20, %v2157_v48  ;;  %v6285_v48 = vld [vmem:[%s7737_s30 + $0x6c] sm:$0xf0] }
 0x8b3   : > { %2167 = vadd.xlane.f32.xlu0 %v8011_v24 }
 0x8b6   : > { %v2154_v34 = vpop.f32.mrf.mxu1 }
 0x8b7   : > { %v2158_v33 = vadd.f32 %v6666_v25, %v2154_v34  ;;  %v6283_v34 = vld [vmem:[%s7737_s30 + $0x64] sm:$0xf]  ;;  %v5536_v25 = vor.u32 %v6285_v48, %v5535_v23 }
 0x8b9   : > { %v8014_v26 = vadd.f32 %v6603_v20, %v2158_v33  ;;  %v5561_v20 = vld [vmem:[%s7737_s30 + $0x98] sm:$0xf0]  ;;  %v5537_v33 = vld [vmem:[%s7737_s30 + $0x70] sm:$0xf0]  ;;  %2424 = vmatpush.bf16.msrb.mxu2 %v5536_v25 }
 0x8ba   : > { %v5564_v22 = vor.u32 %v6288_v19, %v5561_v20 }
 0x8bb   : > { %2169 = vadd.xlane.f32.xlu1 %v8014_v26 }
 0x8bc   : > { %2465 = vmatpush.bf16.msra.mxu1 %v5564_v22 }
 0x8bd   : > { %2425 = vmatpush.bf16.msrb.mxu2 %v5520_v10 }
 0x8c1   : > { %2426 = vmatpush.bf16.msrb.mxu2 %v5504_v54 }
 0x8c5   : > { %2427 = vmatpush.bf16.msrb.mxu2 %v5488_v4 }
 0x926   : > { %v2168_v45 = vpop.xlane.xlu0 %2167 }
 0x927   : > { %v2171_v27 = vmul.f32 %v2168_v45, %v7774_v42  ;;  %v5543_v45 = vld [vmem:[%s7737_s30 + $0x68] sm:$0xf] }
 0x929   : > { %v8019_v28 = vsub.f32 %v8011_v24, %v2171_v27  ;;  %v6286_v27 = vld [vmem:[%s7737_s30 + $0x74] sm:$0xf0] }
 0x92b   : > { %v2175_v29 = vmul.f32 %v8019_v28, %v8019_v28 }
 0x92d   : > { %2177 = vadd.xlane.f32.xlu2 %v2175_v29  ;;  %v5540_v29 = vor.u32 %v6283_v34, %v5537_v33 }
 0x92e   : > { %v2170_v30 = vpop.xlane.xlu1 %2169 }
 0x92f   : > { %v2172_v31 = vmul.f32 %v2170_v30, %v7774_v42  ;;  %v5544_v30 = vor.u32 %v6286_v27, %v5543_v45  ;;  %2438 = vmatpush.bf16.msra.mxu3 %v5540_v29  ;;  %v6604_v29 = vld [vmem:[%s931_s14] ss:$0 sm:$0xff] }
 0x931   : > { %v8025_v16 = vsub.f32 %v8014_v26, %v2172_v31  ;;  %v6284_v31 = vld [vmem:[%s7737_s30 + $0x6c] sm:$0xf]  ;;  %2452 = vmatpush.bf16.msrb.mxu0 %v5544_v30 }
 0x933   : > { %v2176_v32 = vmul.f32 %v8025_v16, %v8025_v16  ;;  %2439 = vmatpush.bf16.msra.mxu3 %v5524_v41 }
 0x935   : > { %2179 = vadd.xlane.f32.xlu0 %v2176_v32  ;;  %v5545_v32 = vld [vmem:[%s7737_s30 + $0x78] sm:$0xf0]  ;;  %2453 = vmatpush.bf16.msrb.mxu0 %v5528_v44 }
 0x936   : > { %v5548_v49 = vor.u32 %v6284_v31, %v5545_v32 }
 0x937   : > { %2440 = vmatpush.bf16.msra.mxu3 %v5508_v58 }
 0x938   : > { %2466 = vmatpush.bf16.msra.mxu1 %v5548_v49 }
 0x939   : > { %2454 = vmatpush.bf16.msrb.mxu0 %v5512_v59 }
 0x93b   : > { %2441 = vmatpush.bf16.msra.mxu3 %v5492_v7 }
 0x93c   : > { %2467 = vmatpush.bf16.msra.mxu1 %v5532_v50 }
 0x93d   : > { %2455 = vmatpush.bf16.msrb.mxu0 %v5496_v8 }
 0x940   : > { %2468 = vmatpush.bf16.msra.mxu1 %v5516_v63 }
 0x944   : > { %2469 = vmatpush.bf16.msra.mxu1 %v5500_v11 }
 0x9a0   : > { %v2178_v53 = vpop.xlane.xlu2 %2177 }
 0x9a1   : > { %v2181_v21 = vmul.f32 %v2178_v53, %v7774_v42 }
 0x9a3   : > { %v2183_v3 = vadd.f32 1e-05, %v2181_v21 }
 0x9a5   : > { %6645 = vrsqrt.f32 %v2183_v3  ;;  %vm2191_vm4 = vweird.f32 %v2183_v3 }
 0x9a8   : > { %v2180_v12 = vpop.xlane.xlu0 %2179 }
 0x9a9   : > { %v2182_v13 = vmul.f32 %v2180_v12, %v7774_v42 }
 0x9ab   : > { %v6646_v14 = vpop.eup %6645  ;;  %v2184_v15 = vadd.f32 1e-05, %v2182_v13 }
 0x9ac   : > { %v2186_v17 = vmul.f32 %v6646_v14, %v2183_v3  ;;  %vm2192_vm13 = vweird.f32 %v6646_v14 }
 0x9ad   : > { %6647 = vrsqrt.f32 %v2184_v15  ;;  %vm2193_vm5 = vmor %vm2191_vm4, %vm2192_vm13  ;;  %vm2201_vm7 = vweird.f32 %v2184_v15 }
 0x9ae   : > { %v2187_v19 = vmul.f32 %v6646_v14, %v2186_v17 }
 0x9b0   : > { %v2188_v20 = vmul.f32 0.5, %v2187_v19 }
 0x9b2   : > { %v2189_v22 = vsub.f32 1.5, %v2188_v20 }
 0x9b3   : > { %v6648_v23 = vpop.eup %6647 }
 0x9b4   : > { %v2190_v48 = vmul.f32 %v6646_v14, %v2189_v22  ;;  %v2196_v34 = vmul.f32 %v6648_v23, %v2184_v15  ;;  %vm2202_vm6 = vweird.f32 %v6648_v23 }
 0x9b5   : > { %vm2203_vm8 = vmor %vm2201_vm7, %vm2202_vm6 }
 0x9b6   : > { %v2197_v25 = vmul.f32 %v6648_v23, %v2196_v34  ;;  %v2194_v33 = vsel %vm2193_vm5, %v6646_v14, %v2190_v48 }
 0x9b7   : > { %v2205_v27 = vmul.f32 %v2194_v33, %v8019_v28  ;;  %v8102_v28 = vld [vmem:[%s7744_s22] sm:$0xf] }
 0x9b8   : > { %v2198_v45 = vmul.f32 0.5, %v2197_v25  ;;  %v2254_v40 = vperm.slane %v8102_v28, 2  ;;  %v2255_v37 = vperm.slane %v8102_v28, 3  ;;  %v2252_v47 = vperm.slane %v8102_v28, 0 }
 0x9b9   : > { %v2210_v49 = vmul.f32 %v6604_v29, %v2205_v27  ;;  %v2253_v52 = vperm.slane %v8102_v28, 1 }
 0x9ba   : > { %v2199_v42 = vsub.f32 1.5, %v2198_v45 }
 0x9bb   : > { %v2215_v36 = vadd.f32 %v6605_v35, %v2210_v49 }
 0x9bc   : > { %v2200_v30 = vmul.f32 %v6648_v23, %v2199_v42 }
 0x9be   : > { %v2204_v31 = vsel %vm2203_vm8, %v6648_v23, %v2200_v30 }
 0x9bf   : > { %v2206_v32 = vmul.f32 %v2204_v31, %v8025_v16 }
 0x9c1   : > { %v2211_v39 = vmul.f32 %v6604_v29, %v2206_v32 }
 0x9c3   : > { %v2216_v10 = vadd.f32 %v6605_v35, %v2211_v39 }
 0x9c5   : > { %v2249_v38 = vpack.c.bf16 %v2216_v10, %v2215_v36 }
 0x9c7   : > { %2428 = vmatmul.bf16.vlgmr.msrb.gmra.mxu2 %v2249_v38  ;;  %2442 = vmatmul.bf16.vlgmr.msra.gmra.mxu3 %v2249_v38 }
 0x9c8   : > { %2456 = vmatmul.bf16.vlgmr.msrb.gmra.mxu0 %v2249_v38  ;;  %2470 = vmatmul.bf16.vlgmr.msra.gmra.mxu1 %v2249_v38 }
 0xa45   : > { %v2457_v41 = vpop.f32.mrf.mxu0  ;;  %v2471_v44 = vpop.f32.mrf.mxu1 }
 0xa46   : > { %v8106_v16 = vadd.f32 %v2457_v41, %v2254_v40  ;;  %v8110_v46 = vadd.f32 %v2471_v44, %v2255_v37 }
 0xa48   : > { %v8114_v50 = vmul.f32 0.70710677, %v8106_v16  ;;  %v8117_v51 = vmul.f32 0.70710677, %v8110_v46 }
 0xa4a   : > { %v2572_v18 = vmul.f32 %v8114_v50, %v8114_v50  ;;  %v2612_v53 = vmul.f32 %v8117_v51, %v8117_v51  ;;  %v2429_v54 = vpop.f32.mrf.mxu2  ;;  %v2443_v55 = vpop.f32.mrf.mxu3 }
 0xa4b   : > { %v8126_v56 = vadd.f32 %v2429_v54, %v2252_v47  ;;  %v8134_v58 = vadd.f32 %v2443_v55, %v2253_v52 }
 0xa4c   : > { %v8128_v57 = vmin.f32 %v2572_v18, 16.0  ;;  %v8130_v21 = vmin.f32 %v2612_v53, 16.0 }
 0xa4d   : > { %v8137_v59 = vmul.f32 0.70710677, %v8126_v56  ;;  %v8146_v2 = vmul.f32 0.70710677, %v8134_v58  ;;  %v2459_v22 = vpop.f32.mrf.mxu0 }
 0xa4e   : > { %v2585_v60 = vmul.f32 3.8918573e-05, %v8128_v57  ;;  %v2574_v61 = vmul.f32 2.1237322e-06, %v8128_v57  ;;  %v2614_v62 = vmul.f32 2.1237322e-06, %v8130_v21  ;;  %v8164_v42 = vadd.f32 %v2459_v22, %v2254_v40 }
 0xa4f   : > { %v2625_v63 = vmul.f32 3.8918573e-05, %v8130_v21  ;;  %v2492_v0 = vmul.f32 %v8137_v59, %v8137_v59  ;;  %v2532_v11 = vmul.f32 %v8146_v2, %v8146_v2 }
 0xa50   : > { %v2586_v1 = vadd.f32 0.001143296, %v2585_v60  ;;  %v2575_v6 = vadd.f32 0.00028619796, %v2574_v61  ;;  %v2615_v7 = vadd.f32 0.00028619796, %v2614_v62  ;;  %v2473_v60 = vpop.f32.mrf.mxu1 }
 0xa51   : > { %v2626_v3 = vadd.f32 0.001143296, %v2625_v63  ;;  %v8148_v4 = vmin.f32 %v2492_v0, 16.0  ;;  %v8160_v48 = vmin.f32 %v2532_v11, 16.0  ;;  %v8171_v36 = vmul.f32 0.70710677, %v8164_v42 }
 0xa52   : > { %v2587_v5 = vmul.f32 %v2586_v1, %v8128_v57  ;;  %v2576_v15 = vmul.f32 %v2575_v6, %v8128_v57  ;;  %v2616_v17 = vmul.f32 %v2615_v7, %v8130_v21 }
 0xa53   : > { %v2627_v8 = vmul.f32 %v2626_v3, %v8130_v21  ;;  %v2505_v9 = vmul.f32 3.8918573e-05, %v8148_v4  ;;  %v2494_v45 = vmul.f32 2.1237322e-06, %v8148_v4  ;;  %v2534_v32 = vmul.f32 2.1237322e-06, %v8160_v48 }
 0xa54   : > { %v2588_v43 = vadd.f32 0.014752088, %v2587_v5  ;;  %v2577_v27 = vadd.f32 0.0036580483, %v2576_v15  ;;  %v2617_v29 = vadd.f32 0.0036580483, %v2616_v17  ;;  %v2732_v55 = vmul.f32 %v8171_v36, %v8171_v36 }
 0xa55   : > { %v2628_v12 = vadd.f32 0.014752088, %v2627_v8  ;;  %v2506_v13 = vadd.f32 0.001143296, %v2505_v9  ;;  %v2495_v39 = vadd.f32 0.00028619796, %v2494_v45  ;;  %v8187_v5 = vadd.f32 %v2473_v60, %v2255_v37 }
 0xa56   : > { %v2589_v14 = vmul.f32 %v2588_v43, %v8128_v57  ;;  %v2578_v10 = vmul.f32 %v2577_v27, %v8128_v57  ;;  %v2618_v38 = vmul.f32 %v2617_v29, %v8130_v21  ;;  %v2535_v41 = vadd.f32 0.00028619796, %v2534_v32 }
 0xa57   : > { %v2629_v19 = vmul.f32 %v2628_v12, %v8130_v21  ;;  %v2507_v20 = vmul.f32 %v2506_v13, %v8148_v4  ;;  %v2545_v44 = vmul.f32 3.8918573e-05, %v8160_v48  ;;  %v2496_v54 = vmul.f32 %v2495_v39, %v8148_v4 }
 0xa58   : > { %v2590_v23 = vadd.f32 0.112945676, %v2589_v14  ;;  %v2579_v61 = vadd.f32 0.05243302, %v2578_v10  ;;  %v2619_v62 = vadd.f32 0.05243302, %v2618_v38  ;;  %v2536_v0 = vmul.f32 %v2535_v41, %v8160_v48  ;;  %v2431_v14 = vpop.f32.mrf.mxu2 }
 0xa59   : > { %v2630_v34 = vadd.f32 0.112945676, %v2629_v19  ;;  %v2508_v25 = vadd.f32 0.014752088, %v2507_v20  ;;  %v2546_v1 = vadd.f32 0.001143296, %v2545_v44 }
 0xa5a   : > { %v2591_v33 = vmul.f32 %v2590_v23, %v8128_v57  ;;  %v2497_v6 = vadd.f32 0.0036580483, %v2496_v54  ;;  %v8189_v7 = vmin.f32 %v2732_v55, 16.0  ;;  %v2580_v8 = vmul.f32 %v2579_v61, %v8128_v57 }
 0xa5b   : > { %v2631_v31 = vmul.f32 %v2630_v34, %v8130_v21  ;;  %v2509_v49 = vmul.f32 %v2508_v25, %v8148_v4  ;;  %v2620_v9 = vmul.f32 %v2619_v62, %v8130_v21  ;;  %v2537_v11 = vadd.f32 0.0036580483, %v2536_v0 }
 0xa5c   : > { %v2592_v30 = vadd.f32 0.4994258, %v2591_v33  ;;  %v2547_v12 = vmul.f32 %v2546_v1, %v8160_v48  ;;  %v2734_v13 = vmul.f32 2.1237322e-06, %v8189_v7  ;;  %v2745_v17 = vmul.f32 3.8918573e-05, %v8189_v7 }
 0xa5d   : > { %v2632_v40 = vadd.f32 0.4994258, %v2631_v31  ;;  %v2510_v53 = vadd.f32 0.112945676, %v2509_v49  ;;  %v8199_v37 = vmul.f32 0.70710677, %v8187_v5  ;;  %v2498_v19 = vmul.f32 %v2497_v6, %v8148_v4 }
 0xa5e   : > { %v2593_v35 = vmul.f32 %v2592_v30, %v8128_v57  ;;  %v2581_v22 = vadd.f32 0.18741608, %v2580_v8  ;;  %v8206_v23 = vadd.f32 %v2431_v14, %v2252_v47  ;;  %v2621_v34 = vadd.f32 0.18741608, %v2620_v9 }
 0xa5f   : > { %v2633_v63 = vmul.f32 %v2632_v40, %v8130_v21  ;;  %v2511_v3 = vmul.f32 %v2510_v53, %v8148_v4  ;;  %v2538_v25 = vmul.f32 %v2537_v11, %v8160_v48  ;;  %v2548_v33 = vadd.f32 0.014752088, %v2547_v12 }
 0xa60   : > { %v8176_v18 = vadd.f32 1.0, %v2593_v35  ;;  %v2735_v45 = vadd.f32 0.00028619796, %v2734_v13  ;;  %v2746_v29 = vadd.f32 0.001143296, %v2745_v17  ;;  %v2772_v30 = vmul.f32 %v8199_v37, %v8199_v37 }
 0xa61   : > { %v8193_v43 = vadd.f32 1.0, %v2633_v63  ;;  %v2512_v15 = vadd.f32 0.4994258, %v2511_v3  ;;  %v2499_v32 = vadd.f32 0.05243302, %v2498_v19  ;;  %v2582_v47 = vmul.f32 %v2581_v22, %v8128_v57 }
 0xa62   : > { %6649 = vrcp.f32 %v8176_v18  ;;  %v2736_v49 = vmul.f32 %v2735_v45, %v8189_v7  ;;  %v2622_v35 = vmul.f32 %v2621_v34, %v8130_v21  ;;  %v2539_v39 = vadd.f32 0.05243302, %v2538_v25  ;;  %v6326_v34 = vld [vmem:[%s7747_s0 + $0xb8] sm:$0xff] }
 0xa63   : > { %6651 = vrcp.f32 %v8193_v43  ;;  %v2513_v27 = vmul.f32 %v2512_v15, %v8148_v4  ;;  %v2747_v10 = vmul.f32 %v2746_v29, %v8189_v7  ;;  %v2549_v40 = vmul.f32 %v2548_v33, %v8160_v48  ;;  %v6334_v25 = vld [vmem:[%s7747_s0 + $0xf8] sm:$0xff]  ;;  %3116 = vmatpush.bf16.msra.mxu0 %v6326_v34  ;;  %v2445_v34 = vpop.f32.mrf.mxu3 }
 0xa64   : > { %v8222_v41 = vmin.f32 %v2772_v30, 16.0  ;;  %v8225_v44 = vmul.f32 0.70710677, %v8206_v23  ;;  %v8228_v53 = vmul.f32 0.5, %v8106_v16  ;;  %v2500_v54 = vmul.f32 %v2499_v32, %v8148_v4  ;;  %3130 = vmatpush.bf16.msrb.mxu1 %v6334_v25  ;;  %v6324_v25 = vld [vmem:[%s7747_s0 + $0xa8] sm:$0xff] }
 0xa65   : > { %v8219_v38 = vadd.f32 1.0, %v2513_v27  ;;  %v2583_v21 = vadd.f32 1.1283791, %v2582_v47  ;;  %v8234_v60 = vmul.f32 0.5, %v8110_v46  ;;  %v8237_v61 = vmul.f32 0.5, %v8164_v42 }
 0xa66   : > { %v2737_v62 = vadd.f32 0.0036580483, %v2736_v49  ;;  %v2604_v63 = vand.u32 2147483647, %v8176_v18  ;;  %v2623_v0 = vadd.f32 1.1283791, %v2622_v35  ;;  %v8241_v1 = vmul.f32 %v2539_v39, %v8160_v48 }
 0xa67   : > { %v2748_v16 = vadd.f32 0.014752088, %v2747_v10  ;;  %6653 = vrcp.f32 %v8219_v38  ;;  %v2550_v3 = vadd.f32 0.112945676, %v2549_v40  ;;  %v2774_v6 = vmul.f32 2.1237322e-06, %v8222_v41 }
 0xa68   : > { %v8202_v20 = vpop.eup %6649  ;;  %v2652_v46 = vmul.f32 %v8225_v44, %v8225_v44  ;;  %v2501_v9 = vadd.f32 0.18741608, %v2500_v54  ;;  %v8252_v12 = vmul.f32 %v2583_v21, %v8114_v50  ;;  %v2738_v13 = vmul.f32 %v2737_v62, %v8189_v7  ;;  %v6325_v54 = vld [vmem:[%s7747_s0 + $0xb0] sm:$0xff] }
 0xa69   : > { %v2596_v31 = vmul.f32 %v8202_v20, %v8176_v18  ;;  %v8231_v55 = vpop.eup %6651  ;;  %v2749_v11 = vmul.f32 %v2748_v16, %v8189_v7  ;;  %v2785_v14 = vmul.f32 3.8918573e-05, %v8222_v41  ;;  %vm2600_vm9 = vweird.f32 %v8176_v18  ;;  %3117 = vmatpush.bf16.msra.mxu0 %v6325_v54 }
 0xa6a   : > { %v2636_v8 = vmul.f32 %v8231_v55, %v8193_v43  ;;  %v8256_v15 = vmin.f32 %v2652_v46, 16.0  ;;  %v2606_v17 = vand.u32 2147483648, %v8176_v18  ;;  %v8261_v19 = vmul.f32 %v2623_v0, %v8117_v51  ;;  %v6333_v18 = vld [vmem:[%s7747_s0 + $0xf0] sm:$0xff] }
 0xa6b   : > { %v2597_v57 = vsub.f32 1.0, %v2596_v31  ;;  %v2775_v22 = vadd.f32 0.00028619796, %v2774_v6  ;;  %vm8265_vm10 = vcmp.eq.f32.partialorder %v2604_v63, 8.507059e+37  ;;  %v2644_v50 = vand.u32 2147483647, %v8193_v43  ;;  %3131 = vmatpush.bf16.msrb.mxu1 %v6333_v18 }
 0xa6c   : > { %v2551_v45 = vmul.f32 %v2550_v3, %v8160_v48  ;;  %v2750_v27 = vadd.f32 0.112945676, %v2749_v11  ;;  %vm2601_vm11 = vweird.f32 %v8202_v20  ;;  %v2637_v30 = vsub.f32 1.0, %v2636_v8  ;;  %v6318_v8 = vld [vmem:[%s7747_s0 + $0x78] sm:$0xff] }
 0xa6d   : > { %v2598_v42 = vmul.f32 %v8202_v20, %v2597_v57  ;;  %v2646_v51 = vand.u32 2147483648, %v8193_v43  ;;  %v8274_v31 = vpop.eup %6653  ;;  %v2739_v32 = vadd.f32 0.05243302, %v2738_v13  ;;  %v2786_v49 = vadd.f32 0.001143296, %v2785_v14  ;;  %vm8287_vm15 = vmor %vm2600_vm9, %vm2601_vm11  ;;  %3102 = vmatpush.bf16.msrb.mxu3 %v6318_v8  ;;  %3118 = vmatpush.bf16.msra.mxu0 %v6324_v25  ;;  %v6316_v8 = vld [vmem:[%s7747_s0 + $0x68] sm:$0xff] }
 0xa6e   : > { %v2751_v47 = vmul.f32 %v2750_v27, %v8189_v7  ;;  %v2654_v35 = vmul.f32 2.1237322e-06, %v8256_v15  ;;  %v2607_v39 = vor.u32 1.1754944e-38, %v2606_v17  ;;  %vm2640_vm12 = vweird.f32 %v8193_v43 }
 0xa6f   : > { %v2599_v29 = vadd.f32 %v8202_v20, %v2598_v42  ;;  %v2502_v10 = vmul.f32 %v2501_v9, %v8148_v4  ;;  %v2776_v40 = vmul.f32 %v2775_v22, %v8222_v41  ;;  %v2665_v57 = vmul.f32 3.8918573e-05, %v8256_v15  ;;  %v6310_v42 = vld [vmem:[%s7747_s0 + $0x38] sm:$0xff] }
 0xa70   : > { %v2552_v62 = vadd.f32 0.4994258, %v2551_v45  ;;  %v2752_v63 = vadd.f32 0.4994258, %v2751_v47  ;;  %v2787_v0 = vmul.f32 %v2786_v49, %v8222_v41  ;;  %v2655_v16 = vadd.f32 0.00028619796, %v2654_v35  ;;  %3088 = vmatpush.bf16.msra.mxu2 %v6310_v42 }
 0xa71   : > { %v2603_v4 = vsel %vm8287_vm15, %v8202_v20, %v2599_v29  ;;  %v2638_v3 = vmul.f32 %v8231_v55, %v2637_v30  ;;  %v2516_v6 = vmul.f32 %v8274_v31, %v8219_v38  ;;  %v2666_v46 = vadd.f32 0.001143296, %v2665_v57  ;;  %v6332_v45 = vld [vmem:[%s7747_s0 + $0xe8] sm:$0xff]  ;;  %v6317_v57 = vld [vmem:[%s7747_s0 + $0x70] sm:$0xff] }
 0xa72   : > { %v2740_v9 = vmul.f32 %v2739_v32, %v8189_v7  ;;  %v2753_v11 = vmul.f32 %v2752_v63, %v8189_v7  ;;  %v2788_v13 = vadd.f32 0.014752088, %v2787_v0  ;;  %v2656_v14 = vmul.f32 %v2655_v16, %v8256_v15  ;;  %3132 = vmatpush.bf16.msrb.mxu1 %v6332_v45  ;;  %v6323_v16 = vld [vmem:[%s7747_s0 + $0xa0] sm:$0xff]  ;;  %3103 = vmatpush.bf16.msrb.mxu3 %v6317_v57  ;;  %v6308_v42 = vld [vmem:[%s7747_s0 + $0x28] sm:$0xff] }
 0xa73   : > { %vm2641_vm0 = vweird.f32 %v8231_v55  ;;  %vm8305_vm1 = vcmp.eq.f32.partialorder %v2644_v50, 8.507059e+37  ;;  %v2777_v17 = vadd.f32 0.0036580483, %v2776_v40  ;;  %v2667_v22 = vmul.f32 %v2666_v46, %v8256_v15  ;;  %v6309_v40 = vld [vmem:[%s7747_s0 + $0x30] sm:$0xff]  ;;  %3119 = vmatpush.bf16.msra.mxu0 %v6323_v16 }
 0xa74   : > { %v2526_v27 = vand.u32 2147483648, %v8219_v38  ;;  %v2553_v29 = vmul.f32 %v2552_v62, %v8160_v48  ;;  %v8314_v30 = vadd.f32 1.0, %v2753_v11  ;;  %v2789_v50 = vmul.f32 %v2788_v13, %v8222_v41  ;;  %3089 = vmatpush.bf16.msra.mxu2 %v6309_v40  ;;  %vm8335_vm2 = vmor %vm2640_vm12, %vm2641_vm0  ;;  %v6321_v16 = vld [vmem:[%s7747_s0 + $0x90] sm:$0xff] }
 0xa75   : > { %v2608_v32 = vsel %vm8265_vm10, %v2607_v39, %v2603_v4  ;;  %v2639_v47 = vadd.f32 %v8231_v55, %v2638_v3  ;;  %v2657_v49 = vadd.f32 0.0036580483, %v2656_v14  ;;  %v2668_v35 = vadd.f32 0.014752088, %v2667_v22  ;;  %v6331_v3 = vld [vmem:[%s7747_s0 + $0xe0] sm:$0xff]  ;;  %v6330_v22 = vld [vmem:[%s7747_s0 + $0xd8] sm:$0xff] }
 0xa76   : > { %v2517_v54 = vsub.f32 1.0, %v2516_v6  ;;  %v2741_v21 = vadd.f32 0.18741608, %v2740_v9  ;;  %6655 = vrcp.f32 %v8314_v30  ;;  %v8325_v62 = vadd.f32 %v2445_v34, %v2253_v52  ;;  %3133 = vmatpush.bf16.msrb.mxu1 %v6331_v3  ;;  %3104 = vmatpush.bf16.msrb.mxu3 %v6316_v8  ;;  %v6329_v4 = vld [vmem:[%s7747_s0 + $0xd0] sm:$0xff]  ;;  %v6314_v8 = vld [vmem:[%s7747_s0 + $0x58] sm:$0xff] }
 0xa77   : > { %v2647_v63 = vor.u32 1.1754944e-38, %v2646_v51  ;;  %v8327_v33 = vadd.f32 1.1283791, %v2502_v10  ;;  %v2778_v39 = vmul.f32 %v2777_v17, %v8222_v41  ;;  %v2790_v0 = vadd.f32 0.112945676, %v2789_v50  ;;  %v6322_v17 = vld [vmem:[%s7747_s0 + $0x98] sm:$0xff] }
 0xa78   : > { %v2524_v28 = vand.u32 2147483647, %v8219_v38  ;;  %v8340_v52 = vor.u32 1.1754944e-38, %v2526_v27  ;;  %v8342_v51 = vadd.f32 1.0, %v2553_v29  ;;  %v2669_v10 = vmul.f32 %v2668_v35, %v8256_v15  ;;  %3090 = vmatpush.bf16.msra.mxu2 %v6308_v42  ;;  %3120 = vmatpush.bf16.msra.mxu0 %v6322_v17  ;;  %v6306_v42 = vld [vmem:[%s7747_s0 + $0x18] sm:$0xff]  ;;  %v6327_v29 = vld [vmem:[%s7747_s0 + $0xc0] sm:$0xff] }
 0xa79   : > { %v8347_v6 = vmul.f32 %v2608_v32, %v8252_v12  ;;  %v2643_v43 = vsel %vm8335_vm2, %v8231_v55, %v2639_v47  ;;  %v2791_v46 = vmul.f32 %v2790_v0, %v8222_v41  ;;  %v2658_v18 = vmul.f32 %v2657_v49, %v8256_v15  ;;  %v6307_v47 = vld [vmem:[%s7747_s0 + $0x20] sm:$0xff] }
 0xa7a   : > { %v2518_v9 = vmul.f32 %v8274_v31, %v2517_v54  ;;  %v2742_v11 = vmul.f32 %v2741_v21, %v8189_v7  ;;  %v2670_v13 = vadd.f32 0.112945676, %v2669_v10  ;;  %v8359_v12 = vmul.f32 0.70710677, %v8325_v62  ;;  %v6315_v49 = vld [vmem:[%s7747_s0 + $0x60] sm:$0xff]  ;;  %3134 = vmatpush.bf16.msrb.mxu1 %v6330_v22 }
 0xa7b   : > { %vm2520_vm14 = vweird.f32 %v8219_v38  ;;  %vm2521_vm3 = vweird.f32 %v8274_v31  ;;  %v2779_v55 = vadd.f32 0.05243302, %v2778_v39  ;;  %v2792_v14 = vadd.f32 0.4994258, %v2791_v46  ;;  %3105 = vmatpush.bf16.msrb.mxu3 %v6315_v49 }
 0xa7c   : > { %v8365_v34 = vpop.eup %6655  ;;  %v2648_v7 = vsel %vm8305_vm1, %v2647_v63, %v2643_v43  ;;  %6657 = vrcp.f32 %v8342_v51  ;;  %v2671_v25 = vmul.f32 %v2670_v13, %v8256_v15  ;;  %v2692_v45 = vmul.f32 %v8359_v12, %v8359_v12  ;;  %3091 = vmatpush.bf16.msra.mxu2 %v6307_v47  ;;  %vm8400_vm4 = vmor %vm2520_vm14, %vm2521_vm3  ;;  %3121 = vmatpush.bf16.msra.mxu0 %v6321_v16 }
 0xa7d   : > { %v5615_v27 = vclamps-f32 %v8347_v6, 1.0  ;;  %vm8374_vm13 = vcmp.eq.f32.partialorder %v2524_v28, 8.507059e+37  ;;  %v2756_v50 = vmul.f32 %v8365_v34, %v8314_v30  ;;  %v2793_v20 = vmul.f32 %v2792_v14, %v8222_v41 }
 0xa7e   : > { %v2659_v32 = vadd.f32 0.05243302, %v2658_v18  ;;  %v2519_v35 = vadd.f32 %v8274_v31, %v2518_v9  ;;  %v2743_v40 = vadd.f32 1.1283791, %v2742_v11  ;;  %v2672_v57 = vadd.f32 0.4994258, %v2671_v25  ;;  %3135 = vmatpush.bf16.msrb.mxu1 %v6329_v4 }
 0xa7f   : > { %v8384_v54 = vmin.f32 %v2692_v45, 16.0  ;;  %v2757_v21 = vsub.f32 1.0, %v2756_v50  ;;  %v2764_v63 = vand.u32 2147483647, %v8314_v30  ;;  %v2780_v39 = vmul.f32 %v2779_v55, %v8222_v41  ;;  %v6320_v25 = vld [vmem:[%s7747_s0 + $0x88] sm:$0xff]  ;;  %3106 = vmatpush.bf16.msrb.mxu3 %v6314_v8 }
 0xa80   : > { %v8388_v0 = vadd.f32 1.0, %v2793_v20  ;;  %v2766_v28 = vand.u32 2147483648, %v8314_v30  ;;  %v2673_v10 = vmul.f32 %v2672_v57, %v8256_v15  ;;  %vm2761_vm5 = vweird.f32 %v8365_v34  ;;  %3092 = vmatpush.bf16.msra.mxu2 %v6306_v42  ;;  %3122 = vmatpush.bf16.msra.mxu0 %v6320_v25 }
 0xa81   : > { %v2694_v3 = vmul.f32 2.1237322e-06, %v8384_v54  ;;  %v2705_v6 = vmul.f32 3.8918573e-05, %v8384_v54  ;;  %v2758_v46 = vmul.f32 %v8365_v34, %v2757_v21  ;;  %v2660_v18 = vmul.f32 %v2659_v32, %v8256_v15  ;;  %v6305_v32 = vld [vmem:[%s7747_s0 + $0x10] sm:$0xff] }
 0xa82   : > { %6659 = vrcp.f32 %v8388_v0  ;;  %v8410_v9 = vpop.eup %6657  ;;  %v8413_v38 = vmul.f32 %v2648_v7, %v8261_v19  ;;  %v2523_v11 = vsel %vm8400_vm4, %v8274_v31, %v2519_v35  ;;  %v8418_v13 = vadd.f32 1.0, %v2673_v10  ;;  %v6328_v19 = vld [vmem:[%s7747_s0 + $0xc8] sm:$0xff] }
 0xa83   : > { %v2695_v55 = vadd.f32 0.00028619796, %v2694_v3  ;;  %v2759_v14 = vadd.f32 %v8365_v34, %v2758_v46  ;;  %vm2760_vm6 = vweird.f32 %v8314_v30  ;;  %v2781_v17 = vadd.f32 0.18741608, %v2780_v39  ;;  %3136 = vmatpush.bf16.msrb.mxu1 %v6328_v19  ;;  %v6312_v3 = vld [vmem:[%s7747_s0 + $0x48] sm:$0xff]  ;;  %v6303_v19 = vld [vmem:[%s7747_s0] sm:$0xff] }
 0xa84   : > { %v2706_v22 = vadd.f32 0.001143296, %v2705_v6  ;;  %v2814_v7 = vadd.f32 1.0, %v5615_v27  ;;  %v2744_v45 = vmul.f32 %v2743_v40, %v8171_v36  ;;  %vm2762_vm7 = vmor %vm2760_vm6, %vm2761_vm5  ;;  %v2767_v31 = vor.u32 1.1754944e-38, %v2766_v28  ;;  %v6313_v27 = vld [vmem:[%s7747_s0 + $0x50] sm:$0xff]  ;;  %3093 = vmatpush.bf16.msra.mxu2 %v6305_v32 }
 0xa85   : > { %6661 = vrcp.f32 %v8418_v13  ;;  %v2763_v30 = vsel %vm2762_vm7, %v8365_v34, %v2759_v14  ;;  %vm2765_vm8 = vcmp.eq.f32.partialorder %v2764_v63, 8.507059e+37  ;;  %v2661_v50 = vadd.f32 0.18741608, %v2660_v18  ;;  %3107 = vmatpush.bf16.msrb.mxu3 %v6313_v27 }
 0xa86   : > { %v2696_v20 = vmul.f32 %v2695_v55, %v8384_v54  ;;  %v2528_v36 = vsel %vm8374_vm13, %v8340_v52, %v2523_v11  ;;  %v8437_v47 = vmul.f32 %v8410_v9, %v8342_v51  ;;  %v2768_v49 = vsel %vm2765_vm8, %v2767_v31, %v2763_v30  ;;  %v6319_v52 = vld [vmem:[%s7747_s0 + $0x80] sm:$0xff] }
 0xa87   : > { %v2707_v34 = vmul.f32 %v2706_v22, %v8384_v54  ;;  %v2504_v40 = vmul.f32 %v8327_v33, %v8137_v59  ;;  %v8443_v57 = vadd.f32 0.18741608, %v8241_v1  ;;  %v2769_v21 = vmul.f32 %v2768_v49, %v2744_v45  ;;  %3123 = vmatpush.bf16.msra.mxu0 %v6319_v52  ;;  %3137 = vmatpush.bf16.msrb.mxu1 %v6327_v29 }
 0xa88   : > { %v6660_v35 = vpop.eup %6659  ;;  %v2782_v63 = vmul.f32 %v2781_v17, %v8222_v41  ;;  %v2822_v39 = vmul.f32 %v2814_v7, %v8228_v53  ;;  %v5616_v16 = vclamps-f32 %v8413_v38, 1.0  ;;  %v2662_v33 = vmul.f32 %v2661_v50, %v8256_v15  ;;  %v6304_v41 = vld [vmem:[%s7747_s0 + $0x8] sm:$0xff]  ;;  %v6311_v7 = vld [vmem:[%s7747_s0 + $0x40] sm:$0xff] }
 0xa89   : > { %v2796_v4 = vmul.f32 %v6660_v35, %v8388_v0  ;;  %v2708_v28 = vadd.f32 0.014752088, %v2707_v34  ;;  %v8451_v59 = vmul.f32 %v2528_v36, %v2504_v40  ;;  %v5619_v1 = vclamps-f32 %v2769_v21, 1.0  ;;  %3094 = vmatpush.bf16.msra.mxu2 %v6304_v41  ;;  %3108 = vmatpush.bf16.msrb.mxu3 %v6312_v3 }
 0xa8a   : > { %v2697_v10 = vadd.f32 0.0036580483, %v2696_v20  ;;  %v2557_v43 = vsub.f32 1.0, %v8437_v47  ;;  %v2806_v53 = vand.u32 2147483648, %v8388_v0  ;;  %v2783_v8 = vadd.f32 1.1283791, %v2782_v63 }
 0xa8b   : > { %v6662_v6 = vpop.eup %6661  ;;  %v2797_v46 = vsub.f32 1.0, %v2796_v4  ;;  %v2709_v18 = vmul.f32 %v2708_v28, %v8384_v54  ;;  %v2818_v42 = vadd.f32 1.0, %v5619_v1  ;;  %vm2800_vm9 = vweird.f32 %v8388_v0 }
 0xa8c   : > { %v2676_v15 = vmul.f32 %v6662_v6, %v8418_v13  ;;  %vm2801_vm10 = vweird.f32 %v6660_v35  ;;  %v2804_v11 = vand.u32 2147483647, %v8388_v0  ;;  %v2663_v17 = vadd.f32 1.1283791, %v2662_v33 }
 0xa8d   : > { %v2798_v38 = vmul.f32 %v6660_v35, %v2797_v46  ;;  %v2710_v55 = vadd.f32 0.112945676, %v2709_v18  ;;  %v2826_v14 = vmul.f32 %v2818_v42, %v8237_v61  ;;  %v2698_v25 = vmul.f32 %v2697_v10, %v8384_v54  ;;  %vm2802_vm11 = vmor %vm2800_vm9, %vm2801_vm10  ;;  %3095 = vmatpush.bf16.msra.mxu2 %v6303_v19  ;;  %3109 = vmatpush.bf16.msrb.mxu3 %v6311_v7 }
 0xa8e   : > { %v2677_v22 = vsub.f32 1.0, %v2676_v15  ;;  %v2807_v31 = vor.u32 1.1754944e-38, %v2806_v53  ;;  %v2686_v30 = vand.u32 2147483648, %v8418_v13  ;;  %vm2681_vm12 = vweird.f32 %v6662_v6 }
 0xa8f   : > { %v2799_v45 = vadd.f32 %v6660_v35, %v2798_v38  ;;  %v2711_v50 = vmul.f32 %v2710_v55, %v8384_v54  ;;  %v2894_v20 = vpack.c.bf16 %v2826_v14, %v2822_v39  ;;  %v2684_v61 = vand.u32 2147483647, %v8418_v13 }
 0xa90   : > { %v2678_v32 = vmul.f32 %v6662_v6, %v2677_v22  ;;  %v2784_v27 = vmul.f32 %v2783_v8, %v8199_v37  ;;  %vm2805_vm15 = vcmp.eq.f32.partialorder %v2804_v11, 8.507059e+37  ;;  %vm2680_vm0 = vweird.f32 %v8418_v13 }
 0xa91   : > { %v2803_v36 = vsel %vm2802_vm11, %v6660_v35, %v2799_v45  ;;  %v2712_v47 = vadd.f32 0.4994258, %v2711_v50  ;;  %v2699_v40 = vadd.f32 0.05243302, %v2698_v25  ;;  %3124 = vmatmul.bf16.vlgmr.msra.gmra.mxu0 %v2894_v20  ;;  %v2558_v0 = vmul.f32 %v8410_v9, %v2557_v43  ;;  %vm2682_vm1 = vmor %vm2680_vm0, %vm2681_vm12 }
 0xa92   : > { %v2808_v49 = vsel %vm2805_vm15, %v2807_v31, %v2803_v36  ;;  %v2679_v34 = vadd.f32 %v6662_v6, %v2678_v32  ;;  %v2687_v63 = vor.u32 1.1754944e-38, %v2686_v30  ;;  %v5613_v37 = vclamps-f32 %v8451_v59, 1.0 }
 0xa93   : > { %v2809_v21 = vmul.f32 %v2808_v49, %v2784_v27  ;;  %v2713_v52 = vmul.f32 %v2712_v47, %v8384_v54  ;;  %v2664_v35 = vmul.f32 %v2663_v17, %v8225_v44  ;;  %vm2685_vm2 = vcmp.eq.f32.partialorder %v2684_v61, 8.507059e+37 }
 0xa94   : > { %v2683_v29 = vsel %vm2682_vm1, %v6662_v6, %v2679_v34  ;;  %v2815_v39 = vadd.f32 1.0, %v5616_v16  ;;  %v2542_v1 = vmul.f32 %v8443_v57, %v8160_v48  ;;  %v2483_v33 = vmul.f32 0.5, %v8187_v5 }
 0xa95   : > { %v5620_v4 = vclamps-f32 %v2809_v21, 1.0  ;;  %v2688_v28 = vsel %vm2685_vm2, %v2687_v63, %v2683_v29  ;;  %v2714_v13 = vadd.f32 1.0, %v2713_v52  ;;  %v2700_v41 = vmul.f32 %v2699_v40, %v8384_v54 }
 0xa96   : > { %v2689_v10 = vmul.f32 %v2688_v28, %v2664_v35  ;;  %v2559_v3 = vadd.f32 %v8410_v9, %v2558_v0  ;;  %vm2561_vm14 = vweird.f32 %v8410_v9  ;;  %v2812_v44 = vadd.f32 1.0, %v5613_v37 }
 0xa97   : > { %v2819_v59 = vadd.f32 1.0, %v5620_v4  ;;  %6663 = vrcp.f32 %v2714_v13  ;;  %v2566_v16 = vand.u32 2147483648, %v8342_v51  ;;  %v2823_v43 = vmul.f32 %v2815_v39, %v8234_v60  ;;  %v6606_v39 = vld [vmem:[%s979_s26] ss:$0 sm:$0xff] }
 0xa98   : > { %v5617_v6 = vclamps-f32 %v2689_v10, 1.0  ;;  %vm2560_vm3 = vweird.f32 %v8342_v51  ;;  %v2564_v48 = vand.u32 2147483647, %v8342_v51  ;;  %v2476_v57 = vmul.f32 0.5, %v8126_v56 }
 0xa99   : > { %v2827_v5 = vmul.f32 %v2819_v59, %v2483_v33  ;;  %vm2562_vm13 = vmor %vm2560_vm3, %vm2561_vm14  ;;  %v2480_v46 = vmul.f32 0.5, %v8206_v23  ;;  %v2701_v18 = vadd.f32 0.18741608, %v2700_v41  ;;  %v2543_v42 = vadd.f32 1.1283791, %v2542_v1 }
 0xa9a   : > { %v2816_v53 = vadd.f32 1.0, %v5617_v6  ;;  %v2563_v8 = vsel %vm2562_vm13, %v8410_v9, %v2559_v3  ;;  %v2820_v38 = vmul.f32 %v2812_v44, %v2476_v57  ;;  %v2567_v11 = vor.u32 1.1754944e-38, %v2566_v16 }
 0xa9b   : > { %v2895_v15 = vpack.c.bf16 %v2827_v5, %v2823_v43  ;;  %vm2565_vm4 = vcmp.eq.f32.partialorder %v2564_v48, 8.507059e+37  ;;  %v2702_v17 = vmul.f32 %v2701_v18, %v8384_v54  ;;  %v2544_v22 = vmul.f32 %v2543_v42, %v8146_v2 }
 0xa9c   : > { %v2824_v55 = vmul.f32 %v2816_v53, %v2480_v46  ;;  %v2568_v14 = vsel %vm2565_vm4, %v2567_v11, %v2563_v8  ;;  %v2726_v19 = vand.u32 2147483648, %v2714_v13  ;;  %v2724_v45 = vand.u32 2147483647, %v2714_v13 }
 0xa9d   : > { %v6664_v60 = vpop.eup %6663  ;;  %3138 = vmatmul.bf16.vlgmr.msrb.gmra.mxu1 %v2895_v15  ;;  %v2569_v25 = vmul.f32 %v2568_v14, %v2544_v22  ;;  %v2703_v7 = vadd.f32 1.1283791, %v2702_v17  ;;  %vm2720_vm6 = vweird.f32 %v2714_v13  ;;  %v2477_v36 = vmul.f32 0.5, %v8134_v58 }
 0xa9e   : > { %v2892_v51 = vpack.c.bf16 %v2824_v55, %v2820_v38  ;;  %v2716_v56 = vmul.f32 %v6664_v60, %v2714_v13  ;;  %vm2721_vm5 = vweird.f32 %v6664_v60  ;;  %v2727_v30 = vor.u32 1.1754944e-38, %v2726_v19 }
 0xa9f   : > { %vm2722_vm7 = vmor %vm2720_vm6, %vm2721_vm5  ;;  %v5614_v50 = vclamps-f32 %v2569_v25, 1.0  ;;  %v2704_v20 = vmul.f32 %v2703_v7, %v8359_v12  ;;  %vm2725_vm8 = vcmp.eq.f32.partialorder %v2724_v45, 8.507059e+37  ;;  %v2481_v47 = vmul.f32 0.5, %v8325_v62 }
 0xaa0   : > { %v2717_v23 = vsub.f32 1.0, %v2716_v56  ;;  %3096 = vmatmul.bf16.vlgmr.msra.gmra.mxu2 %v2892_v51 }
 0xaa1   : > { %v2813_v2 = vadd.f32 1.0, %v5614_v50 }
 0xaa2   : > { %v2718_v9 = vmul.f32 %v6664_v60, %v2717_v23 }
 0xaa3   : > { %v2821_v34 = vmul.f32 %v2813_v2, %v2477_v36 }
 0xaa4   : > { %v2719_v31 = vadd.f32 %v6664_v60, %v2718_v9 }
 0xaa6   : > { %v2723_v32 = vsel %vm2722_vm7, %v6664_v60, %v2719_v31 }
 0xaa7   : > { %v2728_v54 = vsel %vm2725_vm8, %v2727_v30, %v2723_v32 }
 0xaa8   : > { %v2729_v61 = vmul.f32 %v2728_v54, %v2704_v20 }
 0xaaa   : > { %v5618_v27 = vclamps-f32 %v2729_v61, 1.0 }
 0xaac   : > { %v2817_v49 = vadd.f32 1.0, %v5618_v27 }
 0xaae   : > { %v2825_v40 = vmul.f32 %v2817_v49, %v2481_v47 }
 0xab0   : > { %v2893_v0 = vpack.c.bf16 %v2825_v40, %v2821_v34 }
 0xab2   : > { %3110 = vmatmul.bf16.vlgmr.msrb.gmra.mxu3 %v2893_v0 }
 0xb0e   : > { %v3125_v63 = vpop.f32.mrf.mxu0 }
 0xb16   : > { %v3127_v1 = vpop.f32.mrf.mxu0 }
 0xb1a   : > { %v3139_v37 = vpop.f32.mrf.mxu1 }
 0xb22   : > { %v3141_v10 = vpop.f32.mrf.mxu1 }
 0xb23   : > { %v3097_v21 = vpop.f32.mrf.mxu2 }
 0xb2b   : > { %v3099_v4 = vpop.f32.mrf.mxu2 }
 0xb35   : > { %v3111_v52 = vpop.f32.mrf.mxu3 }
 0xb36   : > { %v3112_v12 = vadd.f32 %v3111_v52, %v3097_v21 }
 0xb38   : > { %v3126_v35 = vadd.f32 %v3125_v63, %v3112_v12 }
 0xb3a   : > { %v3140_v29 = vadd.f32 %v3139_v37, %v3126_v35 }
 0xb3c   : > { %v3144_v28 = vadd.f32 %v3140_v29, %v8011_v24 }
 0xb3d   : > { %v3113_v58 = vpop.f32.mrf.mxu3 }
 0xb3e   : > { %v3150_v13 = vadd.f32 %v6606_v39, %v3144_v28  ;;  %v3114_v62 = vadd.f32 %v3113_v58, %v3099_v4 }
 0xb40   : > { %3152 = vst [vmem:[#allocation2] sm:$0xff] %v3150_v13  ;;  %v3128_v33 = vadd.f32 %v3127_v1, %v3114_v62 }
 0xb42   : > { %v3142_v41 = vadd.f32 %v3141_v10, %v3128_v33 }
 0xb44   : > { %v3145_v3 = vadd.f32 %v3142_v41, %v8014_v26 }
 0xb46   : > { %v3151_v59 = vadd.f32 %v6606_v39, %v3145_v3 }
 0xb48   : > { %3153 = vst [vmem:[#allocation2 + $0x8] sm:$0xff] %v3151_v59 }
 0xb49 PF: > { %s9039_s27 = sld [smem:[#allocation38_spill]] }
 0xb4f   : > { %p5749_p5 = scmp.ne.s32.totalorder %s9039_s27, 1 }
 0xb50   : > { %s9040_s4 = sld [smem:[#allocation45_spill]] (!%p5749_p5)  ;;  %s7275_s24 = smov (!%p5749_p5), 32  }
 0xb51   : > { %3157 = sbr.rel (%p5749_p5) target bundleno = 6349 (0x18cd), region = 176 }
 0xb56   : > { %v8502_v44 = vld [vmem:[#allocation2] sm:$0xff]  ;;  %v8505_v24 = vld [vmem:[#allocation2 + $0x8] sm:$0xff]  ;;  %v7272_v16 = vmov 128.0   ;;  %v5836_v55 = vld [vmem:[%s7710_s2 + $0xa8] sm:$0xf]  ;;  %vm3437_vm2 = vcmask 261120  }
 0xb57   : > { %3162 = vadd.xlane.f32.xlu0 %v8502_v44  ;;  %6690 = vrcp.f32 %v7272_v16  ;;  %v6357_v60 = vld [vmem:[%s7710_s2 + $0xb0] sm:$0xf0]  ;;  %v6356_v14 = vld [vmem:[%s7710_s2 + $0xac] sm:$0xf]  ;;  %v5838_v17 = vld [vmem:[%s7710_s2 + $0xb4] sm:$0xf0] }
 0xb58   : > { %v5837_v51 = vor.u32 %v6357_v60, %v5836_v55  ;;  %v5844_v56 = vld [vmem:[%s7710_s2 + $0xb0] sm:$0xf]  ;;  %v6358_v22 = vld [vmem:[%s7710_s2 + $0xb8] sm:$0xf0]  ;;  %v5841_v23 = vor.u32 %v6356_v14, %v5838_v17  ;;  %v6353_v9 = vld [vmem:[%s7710_s2 + $0x94] sm:$0xf] }
 0xb59   : > { %v5845_v25 = vor.u32 %v6358_v22, %v5844_v56  ;;  %v5824_v19 = vld [vmem:[%s7710_s2 + $0x90] sm:$0xf]  ;;  %v6354_v7 = vld [vmem:[%s7710_s2 + $0x98] sm:$0xf0]  ;;  %v5826_v31 = vld [vmem:[%s7710_s2 + $0x9c] sm:$0xf0] }
 0xb5a   : > { %3388 = vmatpush.bf16.msra.mxu0 %v5837_v51  ;;  %3402 = vmatpush.bf16.msra.mxu1 %v5841_v23  ;;  %v5825_v45 = vor.u32 %v6354_v7, %v5824_v19  ;;  %v5832_v30 = vld [vmem:[%s7710_s2 + $0x98] sm:$0xf]  ;;  %v6355_v50 = vld [vmem:[%s7710_s2 + $0xa0] sm:$0xf0]  ;;  %v5829_v20 = vor.u32 %v6353_v9, %v5826_v31  ;;  %v6350_v2 = vld [vmem:[%s7710_s2 + $0x7c] sm:$0xf] }
 0xb5b   : > { %3416 = vmatpush.bf16.msra.mxu2 %v5845_v25  ;;  %v5833_v32 = vor.u32 %v6355_v50, %v5832_v30  ;;  %v5812_v54 = vld [vmem:[%s7710_s2 + $0x78] sm:$0xf]  ;;  %v6351_v61 = vld [vmem:[%s7710_s2 + $0x80] sm:$0xf0]  ;;  %v5814_v36 = vld [vmem:[%s7710_s2 + $0x84] sm:$0xf0] }
 0xb5c   : > { %v5813_v27 = vor.u32 %v6351_v61, %v5812_v54  ;;  %v5820_v47 = vld [vmem:[%s7710_s2 + $0x80] sm:$0xf]  ;;  %v6352_v49 = vld [vmem:[%s7710_s2 + $0x88] sm:$0xf0]  ;;  %v5817_v34 = vor.u32 %v6350_v2, %v5814_v36  ;;  %v6347_v63 = vld [vmem:[%s7710_s2 + $0x64] sm:$0xf] }
 0xb5d   : > { %v6691_v6 = vpop.eup %6690  ;;  %v5821_v40 = vor.u32 %v6352_v49, %v5820_v47  ;;  %v5800_v0 = vld [vmem:[%s7710_s2 + $0x60] sm:$0xf]  ;;  %v6348_v21 = vld [vmem:[%s7710_s2 + $0x68] sm:$0xf0]  ;;  %v5802_v12 = vld [vmem:[%s7710_s2 + $0x6c] sm:$0xf0] }
 0xb5e   : > { %v3167_v43 = vmul.f32 128.0, %v6691_v6  ;;  %vm3171_vm9 = vweird.f32 %v6691_v6  ;;  %3389 = vmatpush.bf16.msra.mxu0 %v5825_v45  ;;  %3403 = vmatpush.bf16.msra.mxu1 %v5829_v20  ;;  %v5801_v52 = vor.u32 %v6348_v21, %v5800_v0  ;;  %v5808_v37 = vld [vmem:[%s7710_s2 + $0x68] sm:$0xf]  ;;  %v6349_v35 = vld [vmem:[%s7710_s2 + $0x70] sm:$0xf0]  ;;  %v5805_v29 = vor.u32 %v6347_v63, %v5802_v12 }
 0xb5f   : > { %3164 = vadd.xlane.f32.xlu0 %v8505_v24  ;;  %3417 = vmatpush.bf16.msra.mxu2 %v5833_v32  ;;  %v5809_v39 = vor.u32 %v6349_v35, %v5808_v37  ;;  %v5788_v4 = vld [vmem:[%s7710_s2 + $0x48] sm:$0xf]  ;;  %v6345_v28 = vld [vmem:[%s7710_s2 + $0x50] sm:$0xf0]  ;;  %v6344_v58 = vld [vmem:[%s7710_s2 + $0x4c] sm:$0xf] }
 0xb60   : > { %v3168_v26 = vsub.f32 1.0, %v3167_v43  ;;  %v5789_v13 = vor.u32 %v6345_v28, %v5788_v4  ;;  %v5790_v62 = vld [vmem:[%s7710_s2 + $0x54] sm:$0xf0]  ;;  %v5796_v1 = vld [vmem:[%s7710_s2 + $0x50] sm:$0xf]  ;;  %vm3435_vm14 = vcmask 1041409  }
 0xb61   : > { %v6346_v33 = vld [vmem:[%s7710_s2 + $0x58] sm:$0xf0]  ;;  %v5793_v10 = vor.u32 %v6344_v58, %v5790_v62  ;;  %v5776_v3 = vld [vmem:[%s7710_s2 + $0x30] sm:$0xf]  ;;  %v6341_v16 = vld [vmem:[%s7710_s2 + $0x34] sm:$0xf] }
 0xb62   : > { %v3169_v48 = vmul.f32 %v6691_v6, %v3168_v26  ;;  %3390 = vmatpush.bf16.msra.mxu0 %v5813_v27  ;;  %3404 = vmatpush.bf16.msra.mxu1 %v5817_v34  ;;  %v5797_v41 = vor.u32 %v6346_v33, %v5796_v1  ;;  %v6342_v59 = vld [vmem:[%s7710_s2 + $0x38] sm:$0xf0]  ;;  %v5778_v43 = vld [vmem:[%s7710_s2 + $0x3c] sm:$0xf0]  ;;  %v5784_v26 = vld [vmem:[%s7710_s2 + $0x38] sm:$0xf] }
 0xb63   : > { %3418 = vmatpush.bf16.msra.mxu2 %v5821_v40  ;;  %v5772_v55 = vld [vmem:[%s7710_s2 + $0x20] sm:$0xf]  ;;  %v6340_v60 = vld [vmem:[%s7710_s2 + $0x28] sm:$0xf0]  ;;  %v6335_v22 = vld [vmem:[%s7710_s2 + $0x4] sm:$0xf] }
 0xb64   : > { %v3170_v5 = vadd.f32 %v6691_v6, %v3169_v48  ;;  %v6343_v48 = vld [vmem:[%s7710_s2 + $0x40] sm:$0xf0]  ;;  %v5773_v51 = vor.u32 %v6340_v60, %v5772_v55  ;;  %v5752_v17 = vld [vmem:[%s7710_s2] sm:$0xf]  ;;  %v6336_v56 = vld [vmem:[%s7710_s2 + $0x8] sm:$0xf0] }
 0xb65   : > { %v5753_v25 = vor.u32 %v6336_v56, %v5752_v17  ;;  %v5754_v19 = vld [vmem:[%s7710_s2 + $0xc] sm:$0xf0]  ;;  %v5760_v7 = vld [vmem:[%s7710_s2 + $0x8] sm:$0xf]  ;;  %v6337_v9 = vld [vmem:[%s7710_s2 + $0x10] sm:$0xf0] }
 0xb66   : > { %v8508_v57 = vsel %vm3171_vm9, %v6691_v6, %v3170_v5  ;;  %3391 = vmatpush.bf16.msra.mxu0 %v5801_v52  ;;  %3405 = vmatpush.bf16.msra.mxu1 %v5805_v29  ;;  %v5777_v6 = vor.u32 %v6342_v59, %v5776_v3  ;;  %v5781_v5 = vor.u32 %v6341_v16, %v5778_v43  ;;  %v6682_v37 = vld [vmem:[%s874_s29] ss:$0 sm:$0xff]  ;;  %s7273_s29 = smov 96   ;;  %vm3466_vm3 = vcmask 123904  }
 0xb67   : > { %3419 = vmatpush.bf16.msra.mxu2 %v5809_v39  ;;  %v5757_v31 = vor.u32 %v6335_v22, %v5754_v19  ;;  %v5761_v30 = vor.u32 %v6337_v9, %v5760_v7  ;;  %v6683_v28 = vld [vmem:[%s883_s18] ss:$0 sm:$0xff]  ;;  %s7274_s18 = smov 64   ;;  %vm3491_vm7 = vcmask 130048  }
 0xb6a   : > { %3392 = vmatpush.bf16.msra.mxu0 %v5789_v13  ;;  %3406 = vmatpush.bf16.msra.mxu1 %v5793_v10 }
 0xb6b   : > { %3420 = vmatpush.bf16.msra.mxu2 %v5797_v41 }
 0xb6e   : > { %3393 = vmatpush.bf16.msra.mxu0 %v5777_v6  ;;  %3407 = vmatpush.bf16.msra.mxu1 %v5781_v5 }
 0xbca   : > { %v3163_v46 = vpop.xlane.xlu0 %3162 }
 0xbcb   : > { %v3173_v53 = vmul.f32 %v8508_v57, %v3163_v46  ;;  %v5785_v46 = vor.u32 %v6343_v48, %v5784_v26 }
 0xbcd   : > { %v8512_v18 = vsub.f32 %v8502_v44, %v3173_v53  ;;  %3421 = vmatpush.bf16.msra.mxu2 %v5785_v46  ;;  %v5764_v53 = vld [vmem:[%s7710_s2 + $0x18] sm:$0xf] }
 0xbcf   : > { %v3177_v42 = vmul.f32 %v8512_v18, %v8512_v18 }
 0xbd1   : > { %3179 = vadd.xlane.f32.xlu1 %v3177_v42  ;;  %v6339_v42 = vld [vmem:[%s7710_s2 + $0x20] sm:$0xf0]  ;;  %3422 = vmatpush.bf16.msra.mxu2 %v5773_v51  ;;  %v8611_v51 = vld [vmem:[%s9040_s4] sm:$0x3] }
 0xbd2   : > { %v3165_v8 = vpop.xlane.xlu0 %3164 }
 0xbd3   : > { %v3174_v15 = vmul.f32 %v8508_v57, %v3165_v8  ;;  %v6338_v8 = vld [vmem:[%s7710_s2 + $0x1c] sm:$0xf] }
 0xbd5   : > { %v8518_v38 = vsub.f32 %v8505_v24, %v3174_v15  ;;  %v5765_v15 = vor.u32 %v6339_v42, %v5764_v53  ;;  %3423 = vmatpush.bf16.msra.mxu2 %v5761_v30 }
 0xbd7   : > { %v3178_v11 = vmul.f32 %v8518_v38, %v8518_v38  ;;  %3394 = vmatpush.bf16.msra.mxu0 %v5765_v15 }
 0xbd9   : > { %3181 = vadd.xlane.f32.xlu1 %v3178_v11  ;;  %v5766_v11 = vld [vmem:[%s7710_s2 + $0x24] sm:$0xf0] }
 0xbda   : > { %v5769_v14 = vor.u32 %v6338_v8, %v5766_v11 }
 0xbdb   : > { %3395 = vmatpush.bf16.msra.mxu0 %v5753_v25 }
 0xbdc   : > { %3408 = vmatpush.bf16.msra.mxu1 %v5769_v14 }
 0xbe0   : > { %3409 = vmatpush.bf16.msra.mxu1 %v5757_v31 }
 0xc44   : > { %v3180_v23 = vpop.xlane.xlu1 %3179 }
 0xc45   : > { %v3183_v45 = vmul.f32 %v3180_v23, %v8508_v57 }
 0xc47   : > { %v3185_v50 = vadd.f32 1e-05, %v3183_v45 }
 0xc49   : > { %6692 = vrsqrt.f32 %v3185_v50  ;;  %vm3193_vm11 = vweird.f32 %v3185_v50 }
 0xc4c   : > { %v3182_v20 = vpop.xlane.xlu1 %3181 }
 0xc4d   : > { %v3184_v32 = vmul.f32 %v3182_v20, %v8508_v57 }
 0xc4f   : > { %v6693_v54 = vpop.eup %6692  ;;  %v3186_v61 = vadd.f32 1e-05, %v3184_v32 }
 0xc50   : > { %v3188_v2 = vmul.f32 %v6693_v54, %v3185_v50  ;;  %vm3194_vm10 = vweird.f32 %v6693_v54 }
 0xc51   : > { %6694 = vrsqrt.f32 %v3186_v61  ;;  %vm3195_vm12 = vmor %vm3193_vm11, %vm3194_vm10  ;;  %vm3203_vm0 = vweird.f32 %v3186_v61 }
 0xc52   : > { %v3189_v27 = vmul.f32 %v6693_v54, %v3188_v2 }
 0xc54   : > { %v3190_v36 = vmul.f32 0.5, %v3189_v27 }
 0xc56   : > { %v3191_v47 = vsub.f32 1.5, %v3190_v36 }
 0xc57   : > { %v6695_v49 = vpop.eup %6694 }
 0xc58   : > { %v3192_v34 = vmul.f32 %v6693_v54, %v3191_v47  ;;  %v3198_v40 = vmul.f32 %v6695_v49, %v3186_v61  ;;  %vm3204_vm15 = vweird.f32 %v6695_v49 }
 0xc59   : > { %vm3205_vm1 = vmor %vm3203_vm0, %vm3204_vm15 }
 0xc5a   : > { %v3199_v0 = vmul.f32 %v6695_v49, %v3198_v40  ;;  %v3196_v21 = vsel %vm3195_vm12, %v6693_v54, %v3192_v34 }
 0xc5b   : > { %v3207_v12 = vmul.f32 %v3196_v21, %v8512_v18  ;;  %v3252_v18 = vld [vmem:[%s7718_s5] sm:$0x7] }
 0xc5c   : > { %v3200_v63 = vmul.f32 0.5, %v3199_v0  ;;  %v3255_v33 = vperm.slane %v3252_v18, 1  ;;  %v3254_v59 = vperm.slane %v3252_v18, 0  ;;  %v3256_v5 = vperm.slane %v3252_v18, 2 }
 0xc5d   : > { %v3212_v4 = vmul.f32 %v6682_v37, %v3207_v12 }
 0xc5e   : > { %v3201_v52 = vsub.f32 1.5, %v3200_v63 }
 0xc5f   : > { %v3217_v13 = vadd.f32 %v6683_v28, %v3212_v4 }
 0xc60   : > { %v3202_v35 = vmul.f32 %v6695_v49, %v3201_v52 }
 0xc62   : > { %v3206_v29 = vsel %vm3205_vm1, %v6695_v49, %v3202_v35 }
 0xc63   : > { %v3208_v39 = vmul.f32 %v3206_v29, %v8518_v38 }
 0xc65   : > { %v3213_v58 = vmul.f32 %v6682_v37, %v3208_v39 }
 0xc67   : > { %v3218_v62 = vadd.f32 %v6683_v28, %v3213_v58 }
 0xc69   : > { %v3251_v1 = vpack.c.bf16 %v3218_v62, %v3217_v13 }
 0xc6b   : > { %3396 = vmatmul.bf16.vlgmr.msra.gmra.mxu0 %v3251_v1  ;;  %3410 = vmatmul.bf16.vlgmr.msra.gmra.mxu1 %v3251_v1 }
 0xc6c   : > { %3424 = vmatmul.bf16.vlgmr.msra.gmra.mxu2 %v3251_v1 }
 0xce8   : > { %v3397_v10 = vpop.f32.mrf.mxu0  ;;  %v3411_v41 = vpop.f32.mrf.mxu1 }
 0xce9   : > { %v8579_v3 = vadd.f32 %v3411_v41, %v3255_v33  ;;  %v3398_v48 = vadd.f32 %v3397_v10, %v3254_v59 }
 0xceb   : > { %3517 = vrot.lane.b32.xlu1 %v8579_v3, %s7273_s29  ;;  %v3433_v42 = vrot.slane %v3398_v48, 7 }
 0xcef   : > { %v3425_v38 = vpop.f32.mrf.mxu2 }
 0xcf0   : > { %v3399_v16 = vpop.f32.mrf.mxu0  ;;  %v3413_v6 = vpop.f32.mrf.mxu1  ;;  %v3426_v8 = vadd.f32 %v3425_v38, %v3256_v5 }
 0xcf1   : > { %v8583_v43 = vadd.f32 %v3413_v6, %v3255_v33  ;;  %v3400_v26 = vadd.f32 %v3399_v16, %v3254_v59 }
 0xcf3   : > { %3519 = vrot.lane.b32.xlu0 %v8583_v43, %s7273_s29  ;;  %5846 = vmatpush.xpose.msk.msra.mxu3 %vm3437_vm2, %v8583_v43  ;;  %v3434_v46 = vrot.slane %v3400_v26, 6 }
 0xcf5   : > { %v8592_v11 = vsel %vm3435_vm14, %v3434_v46, %v3433_v42 }
 0xcf7   : > { %v3427_v53 = vpop.f32.mrf.mxu2  ;;  %5847 = vmatpush.xpose.msk.msra.mxu3 %vm3437_vm2, %v8579_v3 }
 0xcf8   : > { %v3428_v15 = vadd.f32 %v3427_v53, %v3256_v5 }
 0xcfa   : > { %v8594_v55 = vpack.i.bf16 %v3426_v8, %v3428_v15  ;;  %5848 = vmatmul.msk.f32.vlgmr.msra.gmra.mxu3 %vm3437_vm2, %v8592_v11 }
 0xcfb   : > { %3509 = vmatpush.msrb.mxu3 %v3428_v15 }
 0xcfc   : > { %6668 = vrot.lane.b32.xlu1 %v8594_v55, %s7273_s29 }
 0xcfd   : > { %3510 = vmatpush.msrb.mxu3 %v3426_v8 }
 0xd04   : > { %3606 = vrot.lane.b32.xlu1 %v8583_v43, %s7274_s18 }
 0xd0c   : > { %3604 = vrot.lane.b32.xlu1 %v8579_v3, %s7274_s18 }
 0xd14   : > { %3602 = vrot.lane.b32.xlu1 %v8592_v11, %s7274_s18 }
 0xd5d   : > { %v3518_v14 = vpop.permute.xlu1 %3517 }
 0xd65   : > { %v3520_v60 = vpop.permute.xlu0 %3519 }
 0xd66   : > { %5850 = vmatpush.xpose.msk.msra.mxu3 %vm3437_vm2, %v3520_v60 }
 0xd6a   : > { %5851 = vmatpush.xpose.msk.msra.mxu3 %vm3437_vm2, %v3518_v14 }
 0xd6e   : > { %v6669_v32 = vpop.permute.xlu1 %6668 }
 0xd6f   : > { %v6670_v34 = vunpack.i.l.bf16 %v6669_v32  ;;  %v6671_v40 = vunpack.i.h.bf16 %v6669_v32 }
 0xd76   : > { %v3607_v0 = vpop.permute.xlu1 %3606 }
 0xd7d   : > { %v3463_v17 = vpop.f32.mrf.mxu3 }
 0xd7e   : > { %v3464_v56 = vadd.f32 %v3463_v17, %v8611_v51  ;;  %v3605_v63 = vpop.permute.xlu1 %3604 }
 0xd80   : > { %v3467_v22 = vsel %vm3466_vm3, %v3464_v56, -inf }
 0xd81   : > { %3468 = vmax.xlane.f32.xlu2 %v3467_v22 }
 0xd86   : > { %v3603_v53 = vpop.permute.xlu1 %3602 }
 0xdf4   : > { %v3469_v23 = vpop.xlane.xlu2 %3468 }
 0xdf5   : > { %v3470_v25 = vsub.f32 %v3464_v56, %v3469_v23 }
 0xdf7   : > { %v3471_v19 = vmul.f32 1.442695, %v3470_v25 }
 0xdf9   : > { %6696 = vpow2.f32 %v3471_v19 }
 0xdff   : > { %v6697_v7 = vpop.eup %6696 }
 0xe00   : > { %v3473_v9 = vsel %vm3466_vm3, %v6697_v7, 0.0 }
 0xe01   : > { %3474 = vadd.xlane.f32.xlu2 %v3473_v9 }
 0xe19   : > { %3515 = vrot.lane.b32.xlu2 %v8592_v11, %s7273_s29 }
 0xe74   : > { %v3475_v45 = vpop.xlane.xlu2 %3474 }
 0xe75   : > { %6698 = vrcp.f32 %v3475_v45  ;;  %v3487_v20 = vand.u32 2147483648, %v3475_v45  ;;  %v3485_v61 = vand.u32 2147483647, %v3475_v45  ;;  %vm3481_vm4 = vweird.f32 %v3475_v45 }
 0xe77   : > { %v3488_v27 = vor.u32 1.1754944e-38, %v3487_v20  ;;  %vm3486_vm6 = vcmp.eq.f32.partialorder %v3485_v61, 8.507059e+37 }
 0xe7b   : > { %v6699_v31 = vpop.eup %6698 }
 0xe7c   : > { %v3477_v30 = vmul.f32 %v6699_v31, %v3475_v45  ;;  %vm3482_vm13 = vweird.f32 %v6699_v31  ;;  %v3516_v21 = vpop.permute.xlu2 %3515 }
 0xe7d   : > { %vm3483_vm5 = vmor %vm3481_vm4, %vm3482_vm13 }
 0xe7e   : > { %v3478_v50 = vsub.f32 1.0, %v3477_v30 }
 0xe80   : > { %v3479_v54 = vmul.f32 %v6699_v31, %v3478_v50 }
 0xe82   : > { %v3480_v2 = vadd.f32 %v6699_v31, %v3479_v54 }
 0xe84   : > { %v3484_v36 = vsel %vm3483_vm5, %v6699_v31, %v3480_v2 }
 0xe85   : > { %v3489_v47 = vsel %vm3486_vm6, %v3488_v27, %v3484_v36  ;;  %vm3785_vm6 = vcmask 523264  }
 0xe86   : > { %v3490_v49 = vmul.f32 %v6697_v7, %v3489_v47 }
 0xe88   : > { %5849 = vmatmul.msk.f32.vlgmr.msrb.gmra.mxu3 %vm3491_vm7, %v3490_v49 }
 0xe89   : > { %3596 = vmatpush.msrb.mxu3 %v6670_v34 }
 0xe8b   : > { %3597 = vmatpush.msrb.mxu3 %v6671_v40 }
 0xe90   : > { %5852 = vmatmul.msk.f32.vlgmr.msra.gmra.mxu3 %vm3437_vm2, %v3516_v21 }
 0xe91   : > { %5854 = vmatpush.xpose.msk.msra.mxu3 %vm3437_vm2, %v3607_v0 }
 0xe95   : > { %5855 = vmatpush.xpose.msk.msra.mxu3 %vm3437_vm2, %v3605_v63 }
 0xf0b   : > { %v8622_v52 = vpop.f32.mrf.mxu3 }
 0xf13   : > { %v3544_v12 = vpop.f32.mrf.mxu3 }
 0xf14   : > { %v3545_v37 = vadd.f32 %v3544_v12, %v8611_v51 }
 0xf16   : > { %v3547_v35 = vsel %vm3466_vm3, %v3545_v37, -inf }
 0xf17   : > { %3548 = vmax.xlane.f32.xlu0 %v3547_v35 }
 0xf2b   : > { %3691 = vrot.lane.b32.xlu0 %v8583_v43, %s7275_s24 }
 0xf8a   : > { %v3549_v29 = vpop.xlane.xlu0 %3548 }
 0xf8b   : > { %v3550_v39 = vsub.f32 %v3545_v37, %v3549_v29 }
 0xf8d   : > { %v3551_v4 = vmul.f32 1.442695, %v3550_v39 }
 0xf8f   : > { %6700 = vpow2.f32 %v3551_v4 }
 0xf95   : > { %v6701_v28 = vpop.eup %6700 }
 0xf96   : > { %v3553_v58 = vsel %vm3466_vm3, %v6701_v28, 0.0 }
 0xf97   : > { %3554 = vadd.xlane.f32.xlu2 %v3553_v58 }
 0xf9d   : > { %v3692_v6 = vpop.permute.xlu0 %3691 }
 0xfaf   : > { %6673 = vrot.lane.b32.xlu2 %v8594_v55, %s7274_s18 }
 0xfb7   : > { %3689 = vrot.lane.b32.xlu2 %v8579_v3, %s7275_s24 }
0x100a   : > { %v3555_v13 = vpop.xlane.xlu2 %3554 }
0x100b   : > { %6702 = vrcp.f32 %v3555_v13  ;;  %v3567_v41 = vand.u32 2147483648, %v3555_v13  ;;  %v3565_v16 = vand.u32 2147483647, %v3555_v13  ;;  %vm3561_vm9 = vweird.f32 %v3555_v13 }
0x100d   : > { %v3568_v3 = vor.u32 1.1754944e-38, %v3567_v41  ;;  %vm3566_vm11 = vcmp.eq.f32.partialorder %v3565_v16, 8.507059e+37  ;;  %v6364_v41 = vld [vmem:[%s7721_s7 + $0x28] sm:$0xff]  ;;  %v6361_v16 = vld [vmem:[%s7721_s7 + $0x10] sm:$0xff] }
0x1011   : > { %v6703_v62 = vpop.eup %6702 }
0x1012   : > { %v3557_v1 = vmul.f32 %v6703_v62, %v3555_v13  ;;  %v6674_v18 = vpop.permute.xlu2 %6673  ;;  %vm3562_vm8 = vweird.f32 %v6703_v62 }
0x1013   : > { %v6675_v33 = vunpack.i.l.bf16 %v6674_v18  ;;  %v6676_v38 = vunpack.i.h.bf16 %v6674_v18  ;;  %vm3563_vm10 = vmor %vm3561_vm9, %vm3562_vm8  ;;  %vm3887_vm8 = vcmask 1047559  }
0x1014   : > { %v3558_v10 = vsub.f32 1.0, %v3557_v1 }
0x1015   : > { %3681 = vmatpush.msrb.mxu2 %v6675_v33  ;;  %v6366_v33 = vld [vmem:[%s7721_s7 + $0x38] sm:$0xff] }
0x1016   : > { %v3559_v59 = vmul.f32 %v6703_v62, %v3558_v10  ;;  %v6365_v10 = vld [vmem:[%s7721_s7 + $0x30] sm:$0xff] }
0x1017   : > { %3682 = vmatpush.msrb.mxu2 %v6676_v38  ;;  %v6363_v38 = vld [vmem:[%s7721_s7 + $0x20] sm:$0xff] }
0x1018   : > { %v3560_v43 = vadd.f32 %v6703_v62, %v3559_v59  ;;  %v6362_v59 = vld [vmem:[%s7721_s7 + $0x18] sm:$0xff] }
0x1019   : > { %5858 = vmatpush.xpose.msk.msra.mxu2 %vm3437_vm2, %v3692_v6  ;;  %v6360_v6 = vld [vmem:[%s7721_s7 + $0x8] sm:$0xff] }
0x101a   : > { %v3564_v26 = vsel %vm3563_vm10, %v6703_v62, %v3560_v43  ;;  %v3690_v48 = vpop.permute.xlu2 %3689 }
0x101b   : > { %v3569_v5 = vsel %vm3566_vm11, %v3568_v3, %v3564_v26  ;;  %v6359_v3 = vld [vmem:[%s7721_s7] sm:$0xff] }
0x101c   : > { %v3570_v46 = vmul.f32 %v6701_v28, %v3569_v5 }
0x101d   : > { %5859 = vmatpush.xpose.msk.msra.mxu2 %vm3437_vm2, %v3690_v48 }
0x101e   : > { %5853 = vmatmul.msk.f32.vlgmr.msrb.gmra.mxu3 %vm3491_vm7, %v3570_v46 }
0x101f   : > { %3854 = vmatpush.bf16.msrb.mxu3 %v6366_v33 }
0x1023   : > { %3855 = vmatpush.bf16.msrb.mxu3 %v6365_v10  ;;  %v5976_v10 = vld [vmem:[%s7737_s30 + $0xa0] sm:$0xf] }
0x1026   : > { %5856 = vmatmul.msk.f32.vlgmr.msra.gmra.mxu3 %vm3437_vm2, %v3603_v53 }
0x1027   : > { %3856 = vmatpush.bf16.msrb.mxu3 %v6364_v41  ;;  %v6389_v41 = vld [vmem:[%s7737_s30 + $0xac] sm:$0xf0] }
0x102b   : > { %3857 = vmatpush.bf16.msrb.mxu3 %v6363_v38  ;;  %v6387_v38 = vld [vmem:[%s7737_s30 + $0xa4] sm:$0xf] }
0x102f   : > { %3858 = vmatpush.bf16.msrb.mxu3 %v6362_v59  ;;  %v5977_v59 = vor.u32 %v6389_v41, %v5976_v10  ;;  %v6372_v41 = vld [vmem:[%s7737_s30 + $0x2c] sm:$0xf] }
0x1033   : > { %3859 = vmatpush.bf16.msrb.mxu3 %v6361_v16  ;;  %v5978_v16 = vld [vmem:[%s7737_s30 + $0xb0] sm:$0xf0] }
0x1037   : > { %3860 = vmatpush.bf16.msrb.mxu3 %v6360_v6  ;;  %v5984_v6 = vld [vmem:[%s7737_s30 + $0xa8] sm:$0xf] }
0x103b   : > { %3861 = vmatpush.bf16.msrb.mxu3 %v6359_v3  ;;  %v5981_v3 = vor.u32 %v6387_v38, %v5978_v16  ;;  %v5922_v38 = vld [vmem:[%s7737_s30 + $0x38] sm:$0xf0] }
0x103c   : > { %v5925_v16 = vor.u32 %v6372_v41, %v5922_v38  ;;  %v6406_v38 = vld [vmem:[%s7747_s0 + $0x38] sm:$0xff] }
0x10a1   : > { %v3599_v42 = vpop.f32.mrf.mxu3 }
0x10a9   : > { %v3631_v8 = vpop.f32.mrf.mxu3 }
0x10aa   : > { %v3632_v15 = vadd.f32 %v3631_v8, %v8611_v51 }
0x10ac   : > { %v3634_v60 = vsel %vm3466_vm3, %v3632_v15, -inf }
0x10ad   : > { %3635 = vmax.xlane.f32.xlu1 %v3634_v60 }
0x10c6   : > { %6678 = vrot.lane.b32.xlu1 %v8594_v55, %s7275_s24 }
0x10ce   : > { %3773 = vrot.lane.b32.xlu1 %v3599_v42, %s7275_s24 }
0x1120   : > { %v3636_v14 = vpop.xlane.xlu1 %3635 }
0x1121   : > { %v3637_v17 = vsub.f32 %v3632_v15, %v3636_v14 }
0x1123   : > { %v3638_v56 = vmul.f32 1.442695, %v3637_v17  ;;  %v6684_v17 = vld [vmem:[%s922_s1] ss:$0 sm:$0xff]  ;;  %s9041_s1 = sld [smem:[#allocation55_spill]] }
0x1125   : > { %6704 = vpow2.f32 %v3638_v56 }
0x112b   : > { %v6705_v22 = vpop.eup %6704 }
0x112c   : > { %v3640_v23 = vsel %vm3466_vm3, %v6705_v22, 0.0 }
0x112d   : > { %3641 = vadd.xlane.f32.xlu0 %v3640_v23 }
0x1138   : > { %v6679_v20 = vpop.permute.xlu1 %6678 }
0x1139   : > { %v6680_v2 = vunpack.i.l.bf16 %v6679_v20 }
0x1140   : > { %v3774_v26 = vpop.permute.xlu1 %3773 }
0x1141   : > { %3687 = vrot.lane.b32.xlu0 %v8592_v11, %s7275_s24  ;;  %v6681_v11 = vunpack.i.h.bf16 %v6679_v20  ;;  %v3784_v5 = vsel %vm3437_vm2, %v8622_v52, %v3774_v26 }
0x11a0   : > { %v3642_v25 = vpop.xlane.xlu0 %3641 }
0x11a1   : > { %6706 = vrcp.f32 %v3642_v25  ;;  %v3654_v45 = vand.u32 2147483648, %v3642_v25  ;;  %v3652_v31 = vand.u32 2147483647, %v3642_v25  ;;  %vm3648_vm15 = vweird.f32 %v3642_v25 }
0x11a3   : > { %v3655_v50 = vor.u32 1.1754944e-38, %v3654_v45  ;;  %vm3653_vm1 = vcmp.eq.f32.partialorder %v3652_v31, 8.507059e+37 }
0x11a7   : > { %v6707_v19 = vpop.eup %6706 }
0x11a8   : > { %v3644_v7 = vmul.f32 %v6707_v19, %v3642_v25  ;;  %vm3649_vm12 = vweird.f32 %v6707_v19 }
0x11a9   : > { %vm3650_vm0 = vmor %vm3648_vm15, %vm3649_vm12 }
0x11aa   : > { %v3645_v9 = vsub.f32 1.0, %v3644_v7 }
0x11ac   : > { %v3646_v55 = vmul.f32 %v6707_v19, %v3645_v9 }
0x11ae   : > { %v3647_v30 = vadd.f32 %v6707_v19, %v3646_v55 }
0x11b0   : > { %v3651_v32 = vsel %vm3650_vm0, %v6707_v19, %v3647_v30 }
0x11b1   : > { %v3656_v54 = vsel %vm3653_vm1, %v3655_v50, %v3651_v32 }
0x11b2   : > { %v3657_v61 = vmul.f32 %v6705_v22, %v3656_v54 }
0x11b3   : > { %v3688_v27 = vpop.permute.xlu0 %3687 }
0x11b4   : > { %5857 = vmatmul.msk.f32.vlgmr.msrb.gmra.mxu2 %vm3491_vm7, %v3657_v61 }
0x11b5   : > { %3766 = vmatpush.msrb.mxu2 %v6680_v2 }
0x11b7   : > { %3767 = vmatpush.msrb.mxu2 %v6681_v11  ;;  %v6008_v11 = vld [vmem:[%s7737_s30 + $0xe0] sm:$0xf] }
0x11bc   : > { %5860 = vmatmul.msk.f32.vlgmr.msra.gmra.mxu2 %vm3437_vm2, %v3688_v27  ;;  %vm3891_vm2 = vcmask 1040384   ;;  %v6397_v27 = vld [vmem:[%s7737_s30 + $0xec] sm:$0xf0] }
0x1237   : > { %v3684_v36 = vpop.f32.mrf.mxu2 }
0x1238   : > { %3777 = vrot.lane.b32.xlu1 %v3684_v36, %s7274_s18  ;;  %v6395_v36 = vld [vmem:[%s7737_s30 + $0xe4] sm:$0xf] }
0x123f   : > { %v3716_v47 = vpop.f32.mrf.mxu2 }
0x1240   : > { %v3717_v49 = vadd.f32 %v3716_v47, %v8611_v51  ;;  %v6009_v47 = vor.u32 %v6397_v27, %v6008_v11 }
0x1242   : > { %v3719_v34 = vsel %vm3466_vm3, %v3717_v49, -inf  ;;  %4171 = vmatpush.bf16.msrb.mxu0 %v6009_v47  ;;  %v5928_v47 = vld [vmem:[%s7737_s30 + $0x40] sm:$0xf] }
0x1243   : > { %3720 = vmax.xlane.f32.xlu2 %v3719_v34  ;;  %v6016_v34 = vld [vmem:[%s7737_s30 + $0xe8] sm:$0xf] }
0x12aa   : > { %v3778_v48 = vpop.permute.xlu1 %3777 }
0x12ab   : > { %v3786_v46 = vsel %vm3785_vm6, %v3784_v5, %v3778_v48  ;;  %v6388_v48 = vld [vmem:[%s7737_s30 + $0xac] sm:$0xf]  ;;  %v5986_v5 = vld [vmem:[%s7737_s30 + $0xb8] sm:$0xf0] }
0x12b6   : > { %v3721_v40 = vpop.xlane.xlu2 %3720 }
0x12b7   : > { %v3722_v0 = vsub.f32 %v3717_v49, %v3721_v40  ;;  %v6010_v49 = vld [vmem:[%s7737_s30 + $0xf0] sm:$0xf0]  ;;  %v6398_v40 = vld [vmem:[%s7737_s30 + $0xf4] sm:$0xf0] }
0x12b9   : > { %v3723_v21 = vmul.f32 1.442695, %v3722_v0  ;;  %v6013_v0 = vor.u32 %v6395_v36, %v6010_v49  ;;  %v6377_v49 = vld [vmem:[%s7737_s30 + $0x4c] sm:$0xf0] }
0x12bb   : > { %6708 = vpow2.f32 %v3723_v21  ;;  %v6017_v21 = vor.u32 %v6398_v40, %v6016_v34  ;;  %4184 = vmatpush.bf16.msrb.mxu1 %v6013_v0  ;;  %v6375_v34 = vld [vmem:[%s7737_s30 + $0x44] sm:$0xf]  ;;  %v5929_v40 = vor.u32 %v6377_v49, %v5928_v47  ;;  %v5930_v0 = vld [vmem:[%s7737_s30 + $0x50] sm:$0xf0] }
0x12bd   : > { %4197 = vmatpush.bf16.msra.mxu2 %v6017_v21  ;;  %v5936_v21 = vld [vmem:[%s7737_s30 + $0x48] sm:$0xf] }
0x12c1   : > { %v6709_v63 = vpop.eup %6708 }
0x12c2   : > { %v3725_v12 = vsel %vm3466_vm3, %v6709_v63, 0.0 }
0x12c3   : > { %3726 = vadd.xlane.f32.xlu0 %v3725_v12  ;;  %v6018_v12 = vld [vmem:[%s7737_s30 + $0xf8] sm:$0xf0] }
0x1336   : > { %v3727_v37 = vpop.xlane.xlu0 %3726 }
0x1337   : > { %6710 = vrcp.f32 %v3727_v37  ;;  %v3739_v4 = vand.u32 2147483648, %v3727_v37  ;;  %v3737_v28 = vand.u32 2147483647, %v3727_v37  ;;  %vm3733_vm4 = vweird.f32 %v3727_v37 }
0x1339   : > { %v3740_v13 = vor.u32 1.1754944e-38, %v3739_v4  ;;  %vm3738_vm3 = vcmp.eq.f32.partialorder %v3737_v28, 8.507059e+37  ;;  %v6000_v28 = vld [vmem:[%s7737_s30 + $0xc8] sm:$0xf] }
0x133d   : > { %v6711_v35 = vpop.eup %6710 }
0x133e   : > { %v3729_v29 = vmul.f32 %v6711_v35, %v3727_v37  ;;  %vm3734_vm13 = vweird.f32 %v6711_v35 }
0x133f   : > { %vm3735_vm5 = vmor %vm3733_vm4, %vm3734_vm13 }
0x1340   : > { %v3730_v39 = vsub.f32 1.0, %v3729_v29  ;;  %v6393_v29 = vld [vmem:[%s7737_s30 + $0xcc] sm:$0xf0] }
0x1342   : > { %v3731_v51 = vmul.f32 %v6711_v35, %v3730_v39  ;;  %v6391_v39 = vld [vmem:[%s7737_s30 + $0xc4] sm:$0xf] }
0x1344   : > { %v3732_v58 = vadd.f32 %v6711_v35, %v3731_v51  ;;  %v5994_v51 = vld [vmem:[%s7737_s30 + $0xd0] sm:$0xf0] }
0x1346   : > { %v3736_v62 = vsel %vm3735_vm5, %v6711_v35, %v3732_v58  ;;  %v5992_v35 = vld [vmem:[%s7737_s30 + $0xc0] sm:$0xf]  ;;  %v6394_v58 = vld [vmem:[%s7737_s30 + $0xd4] sm:$0xf0] }
0x1347   : > { %v3741_v1 = vsel %vm3738_vm3, %v3740_v13, %v3736_v62  ;;  %v5993_v4 = vor.u32 %v6393_v29, %v5992_v35  ;;  %v5997_v13 = vor.u32 %v6391_v39, %v5994_v51  ;;  %v6001_v62 = vor.u32 %v6394_v58, %v6000_v28  ;;  %v6376_v29 = vld [vmem:[%s7737_s30 + $0x4c] sm:$0xf]  ;;  %v5938_v39 = vld [vmem:[%s7737_s30 + $0x58] sm:$0xf0]  ;;  %v5912_v51 = vld [vmem:[%s7737_s30 + $0x20] sm:$0xf] }
0x1348   : > { %v3742_v18 = vmul.f32 %v6709_v63, %v3741_v1  ;;  %v6396_v63 = vld [vmem:[%s7737_s30 + $0xec] sm:$0xf]  ;;  %v6373_v28 = vld [vmem:[%s7737_s30 + $0x2c] sm:$0xf0]  ;;  %v6371_v58 = vld [vmem:[%s7737_s30 + $0x24] sm:$0xf] }
0x1349   : > { %v6021_v37 = vor.u32 %v6396_v63, %v6018_v12  ;;  %v6392_v1 = vld [vmem:[%s7737_s30 + $0xcc] sm:$0xf]  ;;  %4172 = vmatpush.bf16.msrb.mxu0 %v5993_v4  ;;  %4185 = vmatpush.bf16.msrb.mxu1 %v5997_v13  ;;  %v6378_v63 = vld [vmem:[%s7737_s30 + $0x54] sm:$0xf0]  ;;  %v5941_v4 = vor.u32 %v6376_v29, %v5938_v39  ;;  %v5913_v13 = vor.u32 %v6373_v28, %v5912_v51  ;;  %v3992_v39 = vld [vmem:[%s7744_s22] sm:$0xf] }
0x134a   : > { %5861 = vmatmul.msk.f32.vlgmr.msrb.gmra.mxu2 %vm3491_vm7, %v3742_v18  ;;  %vm3787_vm7 = vcmask 785408   ;;  %v6002_v18 = vld [vmem:[%s7737_s30 + $0xd8] sm:$0xf0]  ;;  %v5937_v35 = vor.u32 %v6378_v63, %v5936_v21 }
0x134b   : > { %4210 = vmatpush.bf16.msra.mxu3 %v6021_v37  ;;  %v6005_v33 = vor.u32 %v6392_v1, %v6002_v18  ;;  %4198 = vmatpush.bf16.msra.mxu2 %v6001_v62  ;;  %v5933_v37 = vor.u32 %v6375_v34, %v5930_v0  ;;  %v5914_v62 = vld [vmem:[%s7737_s30 + $0x30] sm:$0xf0]  ;;  %v5920_v1 = vld [vmem:[%s7737_s30 + $0x28] sm:$0xf]  ;;  %v6374_v18 = vld [vmem:[%s7737_s30 + $0x34] sm:$0xf0] }
0x134c   : > { %v5921_v10 = vor.u32 %v6374_v18, %v5920_v1  ;;  %v3996_v18 = vperm.slane %v3992_v39, 2 }
0x134d   : > { %4173 = vmatpush.bf16.msrb.mxu0 %v5977_v59  ;;  %4186 = vmatpush.bf16.msrb.mxu1 %v5981_v3  ;;  %v5896_v59 = vld [vmem:[%s7737_s30] sm:$0xf]  ;;  %v5898_v3 = vld [vmem:[%s7737_s30 + $0x10] sm:$0xf0] }
0x134f   : > { %4211 = vmatpush.bf16.msra.mxu3 %v6005_v33  ;;  %v5917_v33 = vor.u32 %v6371_v58, %v5914_v62 }
0x13cd   : > { %v3769_v43 = vpop.f32.mrf.mxu2 }
0x13ce   : > { %3781 = vrot.lane.b32.xlu2 %v3769_v43, %s7273_s29  ;;  %v6390_v43 = vld [vmem:[%s7737_s30 + $0xb4] sm:$0xf0] }
0x13cf   : > { %v5985_v26 = vor.u32 %v6390_v43, %v5984_v6  ;;  %v6369_v6 = vld [vmem:[%s7737_s30 + $0xc] sm:$0xf0]  ;;  %v6367_v43 = vld [vmem:[%s7737_s30 + $0x4] sm:$0xf] }
0x13d1   : > { %4199 = vmatpush.bf16.msra.mxu2 %v5985_v26 }
0x1428   : > { %v3782_v53 = vpop.permute.xlu2 %3781 }
0x1429   : > { %v3788_v42 = vsel %vm3787_vm7, %v3786_v46, %v3782_v53  ;;  %v5989_v46 = vor.u32 %v6388_v48, %v5986_v5  ;;  %v5960_v53 = vld [vmem:[%s7737_s30 + $0x80] sm:$0xf]  ;;  %v5897_v48 = vor.u32 %v6369_v6, %v5896_v59  ;;  %v5904_v5 = vld [vmem:[%s7737_s30 + $0x8] sm:$0xf] }
0x142a   : > { %v3805_v8 = vpack.c.bf16 %v3788_v42, %v3788_v42  ;;  %v6385_v42 = vld [vmem:[%s7737_s30 + $0x8c] sm:$0xf0]  ;;  %v6414_v59 = vld [vmem:[%s7747_s0 + $0x78] sm:$0xff] }
0x142b   : > { %4212 = vmatpush.bf16.msra.mxu3 %v5989_v46  ;;  %v6370_v46 = vld [vmem:[%s7737_s30 + $0x14] sm:$0xf0] }
0x142c   : > { %3862 = vmatmul.bf16.vlgmr.msrb.gmra.mxu3 %v3805_v8  ;;  %v6383_v8 = vld [vmem:[%s7737_s30 + $0x84] sm:$0xf] }
0x14af   : > { %v3863_v15 = vpop.f32.mrf.mxu3 }
0x14b0   : > { %v3868_v60 = vrot.slane %v3863_v15, 1  ;;  %v3869_v14 = vrot.slane %v3863_v15, 2  ;;  %v5961_v15 = vor.u32 %v6385_v42, %v5960_v53  ;;  %v6368_v53 = vld [vmem:[%s7737_s30 + $0xc] sm:$0xf] }
0x14b2   : > { %v3872_v56 = vadd.f32 %v3868_v60, %v8502_v44  ;;  %v3873_v22 = vadd.f32 %v3869_v14, %v8505_v24  ;;  %v5962_v60 = vld [vmem:[%s7737_s30 + $0x90] sm:$0xf0]  ;;  %v5968_v14 = vld [vmem:[%s7737_s30 + $0x88] sm:$0xf]  ;;  %4174 = vmatpush.bf16.msrb.mxu0 %v5961_v15  ;;  %v5905_v15 = vor.u32 %v6370_v46, %v5904_v5 }
0x14b4   : > { %v8667_v23 = vadd.f32 %v6684_v17, %v3873_v22  ;;  %v8669_v25 = vadd.f32 %v6684_v17, %v3872_v56  ;;  %v6386_v17 = vld [vmem:[%s7737_s30 + $0x94] sm:$0xf0]  ;;  %v5965_v56 = vor.u32 %v6383_v8, %v5962_v60  ;;  %v5901_v8 = vor.u32 %v6367_v43, %v5898_v3  ;;  %v5906_v60 = vld [vmem:[%s7737_s30 + $0x18] sm:$0xf0] }
0x14b5   : > { %v5969_v22 = vor.u32 %v6386_v17, %v5968_v14  ;;  %v5909_v14 = vor.u32 %v6368_v53, %v5906_v60 }
0x14b6   : > { %v3888_v52 = vsel %vm3887_vm8, %v8669_v25, 0.0  ;;  %v3884_v19 = vrot.slane %v8667_v23, 7  ;;  %4187 = vmatpush.bf16.msrb.mxu1 %v5965_v56 }
0x14b7   : > { %3889 = vadd.xlane.f32.xlu1 %v3888_v52  ;;  %v3865_v7 = vpop.f32.mrf.mxu3  ;;  %v6384_v52 = vld [vmem:[%s7737_s30 + $0x8c] sm:$0xf]  ;;  %4200 = vmatpush.bf16.msra.mxu2 %v5969_v22 }
0x14b8   : > { %v3892_v9 = vsel %vm3891_vm2, %v3884_v19, 0.0  ;;  %v5970_v19 = vld [vmem:[%s7737_s30 + $0x98] sm:$0xf0] }
0x14b9   : > { %3893 = vadd.xlane.f32.xlu0 %v3892_v9  ;;  %v5973_v7 = vor.u32 %v6384_v52, %v5970_v19  ;;  %v5944_v9 = vld [vmem:[%s7737_s30 + $0x60] sm:$0xf] }
0x14bb   : > { %4213 = vmatpush.bf16.msra.mxu3 %v5973_v7 }
0x152a   : > { %v3890_v55 = vpop.xlane.xlu1 %3889 }
0x152b   : > { %v3895_v30 = vmul.f32 %v3890_v55, %v8508_v57  ;;  %v5946_v55 = vld [vmem:[%s7737_s30 + $0x70] sm:$0xf0] }
0x152c   : > { %v3894_v44 = vpop.xlane.xlu0 %3893 }
0x152d   : > { %v3896_v24 = vmul.f32 %v3894_v44, %v8508_v57  ;;  %v8683_v32 = vsub.f32 %v8669_v25, %v3895_v30  ;;  %v6381_v44 = vld [vmem:[%s7737_s30 + $0x6c] sm:$0xf0]  ;;  %v5952_v30 = vld [vmem:[%s7737_s30 + $0x68] sm:$0xf] }
0x152f   : > { %v3899_v45 = vrot.slane %v3896_v24, 1  ;;  %v3904_v61 = vmul.f32 %v8683_v32, %v8683_v32  ;;  %v6379_v24 = vld [vmem:[%s7737_s30 + $0x64] sm:$0xf] }
0x1531   : > { %v8677_v31 = vsub.f32 %v8667_v23, %v3899_v45  ;;  %v3911_v2 = vsel %vm3887_vm8, %v3904_v61, 0.0  ;;  %v5945_v45 = vor.u32 %v6381_v44, %v5944_v9  ;;  %v6380_v61 = vld [vmem:[%s7737_s30 + $0x6c] sm:$0xf] }
0x1533   : > { %v3905_v50 = vmul.f32 %v8677_v31, %v8677_v31  ;;  %4175 = vmatpush.bf16.msrb.mxu0 %v5945_v45 }
0x1535   : > { %v3908_v20 = vrot.slane %v3905_v50, 7  ;;  %v6382_v50 = vld [vmem:[%s7737_s30 + $0x74] sm:$0xf0] }
0x1537   : > { %v3914_v54 = vsel %vm3891_vm2, %v3908_v20, 0.0  ;;  %v5949_v20 = vor.u32 %v6379_v24, %v5946_v55  ;;  %4176 = vmatpush.bf16.msrb.mxu0 %v5929_v40 }
0x1538   : > { %3915 = vadd.xlane.f32.xlu0 %v3914_v54  ;;  %v5953_v54 = vor.u32 %v6382_v50, %v5952_v30  ;;  %v6685_v30 = vld [vmem:[%s931_s14] ss:$0 sm:$0xff] }
0x1539   : > { %4188 = vmatpush.bf16.msrb.mxu1 %v5949_v20 }
0x153a   : > { %4201 = vmatpush.bf16.msra.mxu2 %v5953_v54 }
0x153b   : > { %4177 = vmatpush.bf16.msrb.mxu0 %v5913_v13 }
0x153d   : > { %4189 = vmatpush.bf16.msrb.mxu1 %v5933_v37 }
0x153e   : > { %4202 = vmatpush.bf16.msra.mxu2 %v5937_v35 }
0x153f   : > { %4178 = vmatpush.bf16.msrb.mxu0 %v5897_v48 }
0x1540   : > { %3912 = vadd.xlane.f32.xlu0 %v3911_v2  ;;  %v5954_v2 = vld [vmem:[%s7737_s30 + $0x78] sm:$0xf0] }
0x1541   : > { %v5957_v27 = vor.u32 %v6380_v61, %v5954_v2  ;;  %4190 = vmatpush.bf16.msrb.mxu1 %v5917_v33  ;;  %v6686_v61 = vld [vmem:[%s940_s9] ss:$0 sm:$0xff]  ;;  %v3997_v33 = vperm.slane %v3992_v39, 3 }
0x1542   : > { %4203 = vmatpush.bf16.msra.mxu2 %v5921_v10 }
0x1543   : > { %4214 = vmatpush.bf16.msra.mxu3 %v5957_v27  ;;  %4659 = vmatpush.bf16.msra.mxu0 %v6406_v38  ;;  %v6420_v38 = vld [vmem:[%s7747_s0 + $0xa8] sm:$0xff] }
0x1545   : > { %4191 = vmatpush.bf16.msrb.mxu1 %v5901_v8 }
0x1546   : > { %4204 = vmatpush.bf16.msra.mxu2 %v5905_v15 }
0x1547   : > { %4215 = vmatpush.bf16.msra.mxu3 %v5941_v4  ;;  %v3994_v4 = vperm.slane %v3992_v39, 0 }
0x1549   : > { %4672 = vmatpush.bf16.msra.mxu1 %v6414_v59  ;;  %v6428_v59 = vld [vmem:[%s7747_s0 + $0xe8] sm:$0xff] }
0x154b   : > { %4216 = vmatpush.bf16.msra.mxu3 %v5925_v16 }
0x154f   : > { %4217 = vmatpush.bf16.msra.mxu3 %v5909_v14 }
0x15ab   : > { %v3916_v11 = vpop.xlane.xlu0 %3915 }
0x15ac   : > { %v3918_v36 = vmul.f32 %v3916_v11, %v8508_v57 }
0x15ae   : > { %v3920_v12 = vadd.f32 1e-05, %v3918_v36 }
0x15b0   : > { %6712 = vrsqrt.f32 %v3920_v12  ;;  %vm3937_vm10 = vweird.f32 %v3920_v12 }
0x15b3   : > { %v3913_v26 = vpop.xlane.xlu0 %3912 }
0x15b4   : > { %v3917_v42 = vmul.f32 %v3913_v26, %v8508_v57 }
0x15b6   : > { %v6713_v17 = vpop.eup %6712  ;;  %v3919_v56 = vadd.f32 1e-05, %v3917_v42 }
0x15b7   : > { %v3932_v22 = vmul.f32 %v6713_v17, %v3920_v12  ;;  %vm3938_vm9 = vweird.f32 %v6713_v17 }
0x15b8   : > { %6714 = vrsqrt.f32 %v3919_v56  ;;  %vm3939_vm11 = vmor %vm3937_vm10, %vm3938_vm9  ;;  %vm3927_vm15 = vweird.f32 %v3919_v56 }
0x15b9   : > { %v3933_v52 = vmul.f32 %v6713_v17, %v3932_v22 }
0x15bb   : > { %v3934_v19 = vmul.f32 0.5, %v3933_v52 }
0x15bd   : > { %v3935_v7 = vsub.f32 1.5, %v3934_v19 }
0x15be   : > { %v6715_v9 = vpop.eup %6714 }
0x15bf   : > { %v3936_v44 = vmul.f32 %v6713_v17, %v3935_v7  ;;  %v3922_v24 = vmul.f32 %v6715_v9, %v3919_v56  ;;  %vm3928_vm12 = vweird.f32 %v6715_v9  ;;  %v6405_v7 = vld [vmem:[%s7747_s0 + $0x30] sm:$0xff] }
0x15c0   : > { %vm3929_vm0 = vmor %vm3927_vm15, %vm3928_vm12  ;;  %4660 = vmatpush.bf16.msra.mxu0 %v6405_v7  ;;  %v6419_v7 = vld [vmem:[%s7747_s0 + $0xa0] sm:$0xff] }
0x15c1   : > { %v3940_v45 = vsel %vm3939_vm11, %v6713_v17, %v3936_v44  ;;  %v3923_v55 = vmul.f32 %v6715_v9, %v3922_v24 }
0x15c2   : > { %v3943_v50 = vrot.slane %v3940_v45, 1 }
0x15c3   : > { %v3924_v20 = vmul.f32 0.5, %v3923_v55  ;;  %v6422_v55 = vld [vmem:[%s7747_s0 + $0xb8] sm:$0xff] }
0x15c4   : > { %v3947_v54 = vmul.f32 %v3943_v50, %v8677_v31  ;;  %4685 = vmatpush.bf16.msrb.mxu2 %v6422_v55 }
0x15c5   : > { %v3925_v2 = vsub.f32 1.5, %v3924_v20 }
0x15c6   : > { %v3952_v11 = vmul.f32 %v6685_v30, %v3947_v54 }
0x15c7   : > { %v3926_v27 = vmul.f32 %v6715_v9, %v3925_v2  ;;  %v6412_v2 = vld [vmem:[%s7747_s0 + $0x68] sm:$0xff] }
0x15c8   : > { %v3957_v36 = vadd.f32 %v6686_v61, %v3952_v11 }
0x15c9   : > { %v3930_v47 = vsel %vm3929_vm0, %v6715_v9, %v3926_v27  ;;  %v6413_v9 = vld [vmem:[%s7747_s0 + $0x70] sm:$0xff] }
0x15ca   : > { %v3946_v49 = vmul.f32 %v3930_v47, %v8683_v32  ;;  %v3991_v40 = vpack.c.bf16 %v3957_v36, %v3957_v36  ;;  %v3995_v32 = vperm.slane %v3992_v39, 1  ;;  %4673 = vmatpush.bf16.msra.mxu1 %v6413_v9  ;;  %v6427_v9 = vld [vmem:[%s7747_s0 + $0xe0] sm:$0xff] }
0x15cc   : > { %v3951_v34 = vmul.f32 %v6685_v30, %v3946_v49  ;;  %v4005_v63 = vunpack.c.l.b16 %v3991_v40  ;;  %v6430_v30 = vld [vmem:[%s7747_s0 + $0xf8] sm:$0xff] }
0x15cd   : > { %4698 = vmatpush.bf16.msrb.mxu3 %v6430_v30 }
0x15ce   : > { %v3956_v0 = vadd.f32 %v6686_v61, %v3951_v34  ;;  %v4007_v37 = vrot.slane %v4005_v63, 6  ;;  %v6404_v61 = vld [vmem:[%s7747_s0 + $0x28] sm:$0xff]  ;;  %4674 = vmatpush.bf16.msra.mxu1 %v6412_v2  ;;  %v6409_v2 = vld [vmem:[%s7747_s0 + $0x50] sm:$0xff] }
0x15cf   : > { %4661 = vmatpush.bf16.msra.mxu0 %v6404_v61  ;;  %v6401_v61 = vld [vmem:[%s7747_s0 + $0x10] sm:$0xff] }
0x15d0   : > { %v3990_v21 = vpack.c.bf16 %v3956_v0, %v3956_v0 }
0x15d2   : > { %v4004_v12 = vunpack.c.l.b16 %v3990_v21 }
0x15d4   : > { %v4006_v31 = vrot.slane %v4004_v12, 7 }
0x15d6   : > { %v4008_v35 = vsel %vm3435_vm14, %v4007_v37, %v4006_v31  ;;  %v6421_v37 = vld [vmem:[%s7747_s0 + $0xb0] sm:$0xff] }
0x15d7   : > { %v4009_v29 = vpack.c.b16 %v4008_v35, %v4008_v35  ;;  %v6429_v35 = vld [vmem:[%s7747_s0 + $0xf0] sm:$0xff]  ;;  %4686 = vmatpush.bf16.msrb.mxu2 %v6421_v37  ;;  %v6408_v37 = vld [vmem:[%s7747_s0 + $0x48] sm:$0xff] }
0x15d8   : > { %4699 = vmatpush.bf16.msrb.mxu3 %v6429_v35 }
0x15d9   : > { %4179 = vmatmul.bf16.vlgmr.msrb.gmra.mxu0 %v4009_v29  ;;  %4192 = vmatmul.bf16.vlgmr.msrb.gmra.mxu1 %v4009_v29 }
0x15da   : > { %4205 = vmatmul.bf16.vlgmr.msra.gmra.mxu2 %v4009_v29  ;;  %4218 = vmatmul.bf16.vlgmr.msra.gmra.mxu3 %v4009_v29 }
0x15db   : > { %4687 = vmatpush.bf16.msrb.mxu2 %v6420_v38 }
0x15dc   : > { %4700 = vmatpush.bf16.msrb.mxu3 %v6428_v59  ;;  %v6416_v59 = vld [vmem:[%s7747_s0 + $0x88] sm:$0xff] }
0x15df   : > { %4688 = vmatpush.bf16.msrb.mxu2 %v6419_v7 }
0x15e0   : > { %4701 = vmatpush.bf16.msrb.mxu3 %v6427_v9  ;;  %v6415_v9 = vld [vmem:[%s7747_s0 + $0x80] sm:$0xff] }
0x1656   : > { %v4180_v51 = vpop.f32.mrf.mxu0  ;;  %v4193_v28 = vpop.f32.mrf.mxu1 }
0x1657   : > { %v8763_v58 = vadd.f32 %v4180_v51, %v3994_v4  ;;  %v8765_v13 = vadd.f32 %v4193_v28, %v3995_v32  ;;  %v6403_v32 = vld [vmem:[%s7747_s0 + $0x20] sm:$0xff] }
0x1658   : > { %v6411_v51 = vld [vmem:[%s7747_s0 + $0x60] sm:$0xff]  ;;  %4662 = vmatpush.bf16.msra.mxu0 %v6403_v32  ;;  %v6425_v32 = vld [vmem:[%s7747_s0 + $0xd0] sm:$0xff] }
0x1659   : > { %v8768_v62 = vmul.f32 0.70710677, %v8763_v58  ;;  %v8771_v1 = vmul.f32 0.70710677, %v8765_v13  ;;  %4675 = vmatpush.bf16.msra.mxu1 %v6411_v51 }
0x165b   : > { %v4231_v10 = vmul.f32 %v8768_v62, %v8768_v62  ;;  %v4271_v41 = vmul.f32 %v8771_v1, %v8771_v1 }
0x165d   : > { %v8779_v16 = vmin.f32 %v4231_v10, 16.0  ;;  %v8781_v6 = vmin.f32 %v4271_v41, 16.0  ;;  %v4206_v43 = vpop.f32.mrf.mxu2  ;;  %v4219_v3 = vpop.f32.mrf.mxu3 }
0x165e   : > { %v8783_v26 = vadd.f32 %v4206_v43, %v3996_v18  ;;  %v8785_v48 = vadd.f32 %v4219_v3, %v3997_v33  ;;  %v4182_v5 = vpop.f32.mrf.mxu0  ;;  %v4195_v46 = vpop.f32.mrf.mxu1 }
0x165f   : > { %v4233_v53 = vmul.f32 2.1237322e-06, %v8779_v16  ;;  %v4244_v42 = vmul.f32 3.8918573e-05, %v8779_v16  ;;  %v4273_v8 = vmul.f32 2.1237322e-06, %v8781_v6 }
0x1660   : > { %v4284_v15 = vmul.f32 3.8918573e-05, %v8781_v6  ;;  %v8792_v60 = vmul.f32 0.70710677, %v8783_v26  ;;  %v8797_v19 = vmul.f32 0.70710677, %v8785_v48 }
0x1661   : > { %v4234_v14 = vadd.f32 0.00028619796, %v4233_v53  ;;  %v4245_v17 = vadd.f32 0.001143296, %v4244_v42  ;;  %v4274_v56 = vadd.f32 0.00028619796, %v4273_v8 }
0x1662   : > { %v4285_v22 = vadd.f32 0.001143296, %v4284_v15  ;;  %v4311_v52 = vmul.f32 %v8792_v60, %v8792_v60  ;;  %v4351_v54 = vmul.f32 %v8797_v19, %v8797_v19  ;;  %v6402_v15 = vld [vmem:[%s7747_s0 + $0x18] sm:$0xff] }
0x1663   : > { %v4235_v44 = vmul.f32 %v4234_v14, %v8779_v16  ;;  %v4246_v24 = vmul.f32 %v4245_v17, %v8779_v16  ;;  %v4275_v45 = vmul.f32 %v4274_v56, %v8781_v6  ;;  %v6410_v14 = vld [vmem:[%s7747_s0 + $0x58] sm:$0xff]  ;;  %4663 = vmatpush.bf16.msra.mxu0 %v6402_v15 }
0x1664   : > { %v4286_v50 = vmul.f32 %v4285_v22, %v8781_v6  ;;  %v8807_v20 = vmin.f32 %v4311_v52, 16.0  ;;  %v8818_v31 = vmin.f32 %v4351_v54, 16.0  ;;  %4676 = vmatpush.bf16.msra.mxu1 %v6410_v14 }
0x1665   : > { %v4236_v11 = vadd.f32 0.0036580483, %v4235_v44  ;;  %v4247_v27 = vadd.f32 0.014752088, %v4246_v24  ;;  %v4276_v36 = vadd.f32 0.0036580483, %v4275_v45  ;;  %v4208_v47 = vpop.f32.mrf.mxu2  ;;  %v4221_v49 = vpop.f32.mrf.mxu3 }
0x1666   : > { %v4287_v34 = vadd.f32 0.014752088, %v4286_v50  ;;  %v4313_v40 = vmul.f32 2.1237322e-06, %v8807_v20  ;;  %v4324_v0 = vmul.f32 3.8918573e-05, %v8807_v20 }
0x1667   : > { %v4237_v21 = vmul.f32 %v4236_v11, %v8779_v16  ;;  %v4248_v63 = vmul.f32 %v4247_v27, %v8779_v16  ;;  %v4277_v12 = vmul.f32 %v4276_v36, %v8781_v6  ;;  %v4353_v5 = vmul.f32 2.1237322e-06, %v8818_v31  ;;  %v6418_v27 = vld [vmem:[%s7747_s0 + $0x98] sm:$0xff]  ;;  %4664 = vmatpush.bf16.msra.mxu0 %v6401_v61 }
0x1668   : > { %v4288_v29 = vmul.f32 %v4287_v34, %v8781_v6  ;;  %v4314_v39 = vadd.f32 0.00028619796, %v4313_v40  ;;  %v4325_v4 = vadd.f32 0.001143296, %v4324_v0  ;;  %v4364_v46 = vmul.f32 3.8918573e-05, %v8818_v31  ;;  %4677 = vmatpush.bf16.msra.mxu1 %v6409_v2  ;;  %4689 = vmatpush.bf16.msrb.mxu2 %v6418_v27 }
0x1669   : > { %v4238_v28 = vadd.f32 0.05243302, %v4237_v21  ;;  %v4249_v18 = vadd.f32 0.112945676, %v4248_v63  ;;  %v4278_v3 = vadd.f32 0.05243302, %v4277_v12 }
0x166a   : > { %v4289_v33 = vadd.f32 0.112945676, %v4288_v29  ;;  %v4315_v10 = vmul.f32 %v4314_v39, %v8807_v20  ;;  %v4326_v41 = vmul.f32 %v4325_v4, %v8807_v20  ;;  %v4354_v45 = vadd.f32 0.00028619796, %v4353_v5  ;;  %v6426_v34 = vld [vmem:[%s7747_s0 + $0xd8] sm:$0xff]  ;;  %v6400_v12 = vld [vmem:[%s7747_s0 + $0x8] sm:$0xff] }
0x166b   : > { %v4250_v43 = vmul.f32 %v4249_v18, %v8779_v16  ;;  %v4239_v53 = vmul.f32 %v4238_v28, %v8779_v16  ;;  %v4279_v24 = vmul.f32 %v4278_v3, %v8781_v6  ;;  %v4365_v55 = vadd.f32 0.001143296, %v4364_v46  ;;  %4702 = vmatpush.bf16.msrb.mxu3 %v6426_v34  ;;  %v6417_v39 = vld [vmem:[%s7747_s0 + $0x90] sm:$0xff]  ;;  %4665 = vmatpush.bf16.msra.mxu0 %v6400_v12 }
0x166c   : > { %v4290_v42 = vmul.f32 %v4289_v33, %v8781_v6  ;;  %v4327_v8 = vadd.f32 0.014752088, %v4326_v41  ;;  %v4316_v22 = vadd.f32 0.0036580483, %v4315_v10  ;;  %v4355_v63 = vmul.f32 %v4354_v45, %v8818_v31  ;;  %4678 = vmatpush.bf16.msra.mxu1 %v6408_v37  ;;  %v6399_v33 = vld [vmem:[%s7747_s0] sm:$0xff]  ;;  %4690 = vmatpush.bf16.msrb.mxu2 %v6417_v39 }
0x166d   : > { %v4251_v17 = vadd.f32 0.4994258, %v4250_v43  ;;  %v4240_v30 = vadd.f32 0.18741608, %v4239_v53  ;;  %v4280_v40 = vadd.f32 0.18741608, %v4279_v24  ;;  %v4366_v0 = vmul.f32 %v4365_v55, %v8818_v31 }
0x166e   : > { %v4291_v56 = vadd.f32 0.4994258, %v4290_v42  ;;  %v4328_v52 = vmul.f32 %v4327_v8, %v8807_v20  ;;  %v4317_v47 = vmul.f32 %v4316_v22, %v8807_v20  ;;  %v4356_v18 = vadd.f32 0.0036580483, %v4355_v63  ;;  %v6407_v10 = vld [vmem:[%s7747_s0 + $0x40] sm:$0xff]  ;;  %v6424_v43 = vld [vmem:[%s7747_s0 + $0xc8] sm:$0xff] }
0x166f   : > { %v4252_v44 = vmul.f32 %v4251_v17, %v8779_v16  ;;  %v4241_v21 = vmul.f32 %v4240_v30, %v8779_v16  ;;  %v4281_v4 = vmul.f32 %v4280_v40, %v8781_v6  ;;  %v4367_v16 = vadd.f32 0.014752088, %v4366_v0  ;;  %4703 = vmatpush.bf16.msrb.mxu3 %v6425_v32  ;;  %4666 = vmatpush.bf16.msra.mxu0 %v6399_v33 }
0x1670   : > { %v4292_v50 = vmul.f32 %v4291_v56, %v8781_v6  ;;  %v4329_v54 = vadd.f32 0.112945676, %v4328_v52  ;;  %v4318_v35 = vadd.f32 0.05243302, %v4317_v47  ;;  %v4357_v17 = vmul.f32 %v4356_v18, %v8818_v31  ;;  %4679 = vmatpush.bf16.msra.mxu1 %v6407_v10  ;;  %4691 = vmatpush.bf16.msrb.mxu2 %v6416_v59 }
0x1671   : > { %v8844_v11 = vadd.f32 1.0, %v4252_v44  ;;  %v4242_v51 = vadd.f32 1.1283791, %v4241_v21  ;;  %v4368_v38 = vmul.f32 %v4367_v16, %v8818_v31  ;;  %v4282_v53 = vadd.f32 1.1283791, %v4281_v4  ;;  %v6423_v44 = vld [vmem:[%s7747_s0 + $0xc0] sm:$0xff] }
0x1672   : > { %v8847_v36 = vadd.f32 1.0, %v4292_v50  ;;  %v4330_v49 = vmul.f32 %v4329_v54, %v8807_v20  ;;  %v4319_v5 = vmul.f32 %v4318_v35, %v8807_v20  ;;  %v4358_v2 = vadd.f32 0.05243302, %v4357_v17 }
0x1673   : > { %6716 = vrcp.f32 %v8844_v11  ;;  %v4369_v8 = vadd.f32 0.112945676, %v4368_v38  ;;  %v4243_v15 = vmul.f32 %v4242_v51, %v8768_v62  ;;  %v4263_v56 = vand.u32 2147483647, %v8844_v11  ;;  %4704 = vmatpush.bf16.msrb.mxu3 %v6424_v43 }
0x1674   : > { %6718 = vrcp.f32 %v8847_v36  ;;  %v4331_v29 = vadd.f32 0.4994258, %v4330_v49  ;;  %v4265_v22 = vand.u32 2147483648, %v8844_v11  ;;  %v4305_v62 = vand.u32 2147483648, %v8847_v36  ;;  %4692 = vmatpush.bf16.msrb.mxu2 %v6415_v9 }
0x1675   : > { %v4370_v7 = vmul.f32 %v4369_v8, %v8818_v31  ;;  %v4320_v45 = vadd.f32 0.18741608, %v4319_v5  ;;  %v4303_v30 = vand.u32 2147483647, %v8847_v36  ;;  %vm4259_vm4 = vweird.f32 %v8844_v11 }
0x1676   : > { %v4332_v28 = vmul.f32 %v4331_v29, %v8807_v20  ;;  %v4283_v61 = vmul.f32 %v4282_v53, %v8771_v1  ;;  %v4266_v27 = vor.u32 1.1754944e-38, %v4265_v22  ;;  %vm4299_vm3 = vweird.f32 %v8847_v36 }
0x1677   : > { %v4371_v50 = vadd.f32 0.4994258, %v4370_v7  ;;  %4705 = vmatpush.bf16.msrb.mxu3 %v6423_v44  ;;  %vm4264_vm6 = vcmp.eq.f32.partialorder %v4263_v56, 8.507059e+37  ;;  %v4306_v0 = vor.u32 1.1754944e-38, %v4305_v62  ;;  %vm4304_vm9 = vcmp.eq.f32.partialorder %v4303_v30, 8.507059e+37 }
0x1678   : > { %v8870_v46 = vadd.f32 1.0, %v4332_v28  ;;  %v4223_v18 = vmul.f32 0.5, %v8763_v58 }
0x1679   : > { %v6717_v41 = vpop.eup %6716  ;;  %v4372_v49 = vmul.f32 %v4371_v50, %v8818_v31 }
0x167a   : > { %v6719_v3 = vpop.eup %6718  ;;  %v4255_v6 = vmul.f32 %v6717_v41, %v8844_v11  ;;  %6720 = vrcp.f32 %v8870_v46  ;;  %vm4260_vm1 = vweird.f32 %v6717_v41  ;;  %v4321_v11 = vmul.f32 %v4320_v45, %v8807_v20 }
0x167b   : > { %v4295_v42 = vmul.f32 %v6719_v3, %v8847_v36  ;;  %vm4300_vm13 = vweird.f32 %v6719_v3  ;;  %vm4261_vm5 = vmor %vm4259_vm4, %vm4260_vm1  ;;  %v4359_v36 = vmul.f32 %v4358_v2, %v8818_v31  ;;  %v4373_v35 = vadd.f32 1.0, %v4372_v49 }
0x167c   : > { %v4256_v14 = vsub.f32 1.0, %v4255_v6  ;;  %vm4301_vm7 = vmor %vm4299_vm3, %vm4300_vm13  ;;  %v4322_v16 = vadd.f32 1.1283791, %v4321_v11  ;;  %v4345_v32 = vand.u32 2147483648, %v8870_v46  ;;  %v4343_v20 = vand.u32 2147483647, %v8870_v46 }
0x167d   : > { %v4296_v52 = vsub.f32 1.0, %v4295_v42  ;;  %6722 = vrcp.f32 %v4373_v35  ;;  %v4360_v10 = vadd.f32 0.18741608, %v4359_v36  ;;  %vm4339_vm11 = vweird.f32 %v8870_v46 }
0x167e   : > { %v4257_v24 = vmul.f32 %v6717_v41, %v4256_v14  ;;  %v4323_v5 = vmul.f32 %v4322_v16, %v8792_v60  ;;  %vm4344_vm15 = vcmp.eq.f32.partialorder %v4343_v20, 8.507059e+37  ;;  %v4385_v7 = vand.u32 2147483648, %v4373_v35 }
0x167f   : > { %v4297_v55 = vmul.f32 %v6719_v3, %v4296_v52  ;;  %v4361_v58 = vmul.f32 %v4360_v10, %v8818_v31  ;;  %v4383_v44 = vand.u32 2147483647, %v4373_v35  ;;  %vm4379_vm1 = vweird.f32 %v4373_v35 }
0x1680   : > { %v4258_v54 = vadd.f32 %v6717_v41, %v4257_v24  ;;  %v6721_v34 = vpop.eup %6720  ;;  %v4386_v31 = vor.u32 1.1754944e-38, %v4385_v7  ;;  %v6442_v7 = vld [vmem:[#allocation26 + $0x54] sm:$0xf0] }
0x1681   : > { %v4298_v47 = vadd.f32 %v6719_v3, %v4297_v55  ;;  %v4335_v63 = vmul.f32 %v6721_v34, %v8870_v46  ;;  %vm4340_vm10 = vweird.f32 %v6721_v34  ;;  %v4225_v46 = vmul.f32 0.5, %v8783_v26 }
0x1682   : > { %v4262_v40 = vsel %vm4261_vm5, %v6717_v41, %v4258_v54  ;;  %v4224_v41 = vmul.f32 0.5, %v8765_v13  ;;  %vm4341_vm12 = vmor %vm4339_vm11, %vm4340_vm10  ;;  %v4362_v52 = vadd.f32 1.1283791, %v4361_v58  ;;  %vm4384_vm4 = vcmp.eq.f32.partialorder %v4383_v44, 8.507059e+37  ;;  %v6198_v44 = vld [vmem:[#allocation26 + $0x58] sm:$0xf0] }
0x1683   : > { %v4267_v21 = vsel %vm4264_vm6, %v4266_v27, %v4262_v40  ;;  %v4302_v1 = vsel %vm4301_vm7, %v6719_v3, %v4298_v47  ;;  %v4336_v39 = vsub.f32 1.0, %v4335_v63  ;;  %v4346_v3 = vor.u32 1.1754944e-38, %v4345_v32  ;;  %v6723_v42 = vpop.eup %6722 }
0x1684   : > { %v4268_v12 = vmul.f32 %v4267_v21, %v4243_v15  ;;  %v4307_v37 = vsel %vm4304_vm9, %v4306_v0, %v4302_v1  ;;  %v4375_v13 = vmul.f32 %v6723_v42, %v4373_v35  ;;  %vm4380_vm0 = vweird.f32 %v6723_v42  ;;  %v6687_v35 = vld [vmem:[%s979_s26] ss:$0 sm:$0xff] }
0x1685   : > { %v4308_v29 = vmul.f32 %v4307_v37, %v4283_v61  ;;  %v4337_v28 = vmul.f32 %v6721_v34, %v4336_v39  ;;  %vm4381_vm13 = vmor %vm4379_vm1, %vm4380_vm0  ;;  %v4363_v55 = vmul.f32 %v4362_v52, %v8797_v19  ;;  %v4226_v61 = vmul.f32 0.5, %v8785_v48  ;;  %v6196_v52 = vld [vmem:[#allocation26 + $0x50] sm:$0xf] }
0x1686   : > { %v6022_v4 = vclamps-f32 %v4268_v12, 1.0  ;;  %v4376_v22 = vsub.f32 1.0, %v4375_v13  ;;  %v6443_v13 = vld [vmem:[#allocation26 + $0x64] sm:$0xf]  ;;  %vm4936_vm9 = vcmask 1041408  }
0x1687   : > { %v6023_v51 = vclamps-f32 %v4308_v29, 1.0  ;;  %v4338_v59 = vadd.f32 %v6721_v34, %v4337_v28 }
0x1688   : > { %v4391_v33 = vadd.f32 1.0, %v6022_v4  ;;  %v4377_v60 = vmul.f32 %v6723_v42, %v4376_v22  ;;  %v6206_v22 = vld [vmem:[#allocation26 + $0x68] sm:$0xf0] }
0x1689   : > { %v4392_v38 = vadd.f32 1.0, %v6023_v51  ;;  %v4342_v53 = vsel %vm4341_vm12, %v6721_v34, %v4338_v59 }
0x168a   : > { %v4395_v43 = vmul.f32 %v4391_v33, %v4223_v18  ;;  %v4347_v15 = vsel %vm4344_vm15, %v4346_v3, %v4342_v53  ;;  %v4378_v62 = vadd.f32 %v6723_v42, %v4377_v60  ;;  %v6446_v53 = vld [vmem:[#allocation26 + $0x74] sm:$0xf0]  ;;  %v6197_v60 = vor.u32 %v6442_v7, %v6196_v52 }
0x168b   : > { %v4396_v6 = vmul.f32 %v4392_v38, %v4224_v41  ;;  %v4348_v17 = vmul.f32 %v4347_v15, %v4323_v5  ;;  %v6212_v5 = vld [vmem:[#allocation26 + $0x70] sm:$0xf]  ;;  %v6214_v15 = vld [vmem:[#allocation26 + $0x78] sm:$0xf0] }
0x168c   : > { %v4463_v8 = vpack.c.bf16 %v4395_v43, %v4395_v43  ;;  %v4382_v30 = vsel %vm4381_vm13, %v6723_v42, %v4378_v62  ;;  %v6445_v42 = vld [vmem:[#allocation26 + $0x74] sm:$0xf]  ;;  %v6188_v62 = vld [vmem:[#allocation26 + $0x40] sm:$0xf] }
0x168d   : > { %v4464_v14 = vpack.c.bf16 %v4396_v6, %v4396_v6  ;;  %v6024_v56 = vclamps-f32 %v4348_v17, 1.0  ;;  %v4387_v50 = vsel %vm4384_vm4, %v4386_v31, %v4382_v30  ;;  %v6217_v58 = vor.u32 %v6445_v42, %v6214_v15  ;;  %v6444_v17 = vld [vmem:[#allocation26 + $0x64] sm:$0xf0]  ;;  %v6190_v30 = vld [vmem:[#allocation26 + $0x48] sm:$0xf0] }
0x168e   : > { %4667 = vmatmul.bf16.vlgmr.msra.gmra.mxu0 %v4463_v8  ;;  %v4388_v54 = vmul.f32 %v4387_v50, %v4363_v55  ;;  %v6213_v8 = vor.u32 %v6446_v53, %v6212_v5  ;;  %v6440_v31 = vld [vmem:[#allocation26 + $0x44] sm:$0xf0]  ;;  %v6688_v42 = vld [vmem:[#allocation23] ss:$0 sm:$0xff] }
0x168f   : > { %4680 = vmatmul.bf16.vlgmr.msra.gmra.mxu1 %v4464_v14  ;;  %v4393_v9 = vadd.f32 1.0, %v6024_v56  ;;  %v6204_v14 = vld [vmem:[#allocation26 + $0x60] sm:$0xf]  ;;  %v6189_v55 = vor.u32 %v6440_v31, %v6188_v62 }
0x1690   : > { %v6025_v26 = vclamps-f32 %v4388_v54, 1.0  ;;  %4907 = vmatpush.bf16.msrb.mxu0 %v6213_v8  ;;  %4920 = vmatpush.bf16.msrb.mxu1 %v6217_v58  ;;  %v6205_v56 = vor.u32 %v6444_v17, %v6204_v14  ;;  %v6180_v54 = vld [vmem:[#allocation26 + $0x30] sm:$0xf]  ;;  %v6689_v14 = vld [vmem:[#allocation25] ss:$0 sm:$0xff] }
0x1691   : > { %v4397_v24 = vmul.f32 %v4393_v9, %v4225_v46  ;;  %v6209_v46 = vor.u32 %v6443_v13, %v6206_v22  ;;  %v6441_v9 = vld [vmem:[#allocation26 + $0x54] sm:$0xf] }
0x1692   : > { %v4394_v2 = vadd.f32 1.0, %v6025_v26  ;;  %v6438_v26 = vld [vmem:[#allocation26 + $0x34] sm:$0xf0] }
0x1693   : > { %v4465_v45 = vpack.c.bf16 %v4397_v24, %v4397_v24  ;;  %v6201_v24 = vor.u32 %v6441_v9, %v6198_v44 }
0x1694   : > { %v4398_v27 = vmul.f32 %v4394_v2, %v4226_v61  ;;  %4908 = vmatpush.bf16.msrb.mxu0 %v6205_v56  ;;  %4921 = vmatpush.bf16.msrb.mxu1 %v6209_v46  ;;  %v6437_v61 = vld [vmem:[#allocation26 + $0x34] sm:$0xf] }
0x1695   : > { %4693 = vmatmul.bf16.vlgmr.msrb.gmra.mxu2 %v4465_v45  ;;  %v6439_v45 = vld [vmem:[#allocation26 + $0x44] sm:$0xf] }
0x1696   : > { %v4466_v47 = vpack.c.bf16 %v4398_v27, %v4398_v27  ;;  %v6193_v50 = vor.u32 %v6439_v45, %v6190_v30  ;;  %v6181_v27 = vor.u32 %v6438_v26, %v6180_v54 }
0x1698   : > { %4706 = vmatmul.bf16.vlgmr.msrb.gmra.mxu3 %v4466_v47  ;;  %4909 = vmatpush.bf16.msrb.mxu0 %v6197_v60  ;;  %v6182_v47 = vld [vmem:[#allocation26 + $0x38] sm:$0xf0] }
0x1699   : > { %4922 = vmatpush.bf16.msrb.mxu1 %v6201_v24 }
0x169c   : > { %4910 = vmatpush.bf16.msrb.mxu0 %v6189_v55 }
0x169d   : > { %4923 = vmatpush.bf16.msrb.mxu1 %v6193_v50 }
0x16a0   : > { %4911 = vmatpush.bf16.msrb.mxu0 %v6181_v27 }
0x170b   : > { %v4668_v49 = vpop.f32.mrf.mxu0 }
0x170c   : > { %v4681_v34 = vpop.f32.mrf.mxu1 }
0x170d   : > { %v4682_v21 = vadd.f32 %v4681_v34, %v4668_v49  ;;  %v6185_v34 = vor.u32 %v6437_v61, %v6182_v47 }
0x170f   : > { %4924 = vmatpush.bf16.msrb.mxu1 %v6185_v34 }
0x1713   : > { %v4670_v40 = vpop.f32.mrf.mxu0 }
0x1714   : > { %v4683_v0 = vpop.f32.mrf.mxu1  ;;  %v6172_v40 = vld [vmem:[#allocation26 + $0x20] sm:$0xf] }
0x1715   : > { %v6436_v0 = vld [vmem:[#allocation26 + $0x24] sm:$0xf0] }
0x1718   : > { %v4694_v11 = vpop.f32.mrf.mxu2 }
0x1719   : > { %v4695_v19 = vadd.f32 %v4694_v11, %v4682_v21  ;;  %v6435_v11 = vld [vmem:[#allocation26 + $0x24] sm:$0xf]  ;;  %v6173_v21 = vor.u32 %v6436_v0, %v6172_v40 }
0x171b   : > { %v4707_v63 = vpop.f32.mrf.mxu3  ;;  %4912 = vmatpush.bf16.msrb.mxu0 %v6173_v21 }
0x171c   : > { %v4708_v12 = vadd.f32 %v4707_v63, %v4695_v19  ;;  %v6174_v19 = vld [vmem:[#allocation26 + $0x28] sm:$0xf0] }
0x171d   : > { %v6177_v63 = vor.u32 %v6435_v11, %v6174_v19 }
0x171e   : > { %v4712_v37 = vrot.slane %v4708_v12, 1  ;;  %v4713_v36 = vrot.slane %v4708_v12, 2  ;;  %v6164_v12 = vld [vmem:[#allocation26 + $0x10] sm:$0xf] }
0x171f   : > { %4925 = vmatpush.bf16.msrb.mxu1 %v6177_v63 }
0x1720   : > { %v4696_v1 = vpop.f32.mrf.mxu2  ;;  %v4717_v48 = vadd.f32 %v4713_v36, %v8667_v23  ;;  %v4716_v29 = vadd.f32 %v4712_v37, %v8669_v25  ;;  %v6434_v37 = vld [vmem:[#allocation26 + $0x14] sm:$0xf0]  ;;  %v6433_v36 = vld [vmem:[#allocation26 + $0x14] sm:$0xf] }
0x1722   : > { %v4722_v39 = vadd.f32 %v6687_v35, %v4716_v29  ;;  %v4723_v4 = vadd.f32 %v6687_v35, %v4717_v48  ;;  %v6166_v35 = vld [vmem:[#allocation26 + $0x18] sm:$0xf0]  ;;  %v6165_v48 = vor.u32 %v6434_v37, %v6164_v12 }
0x1723   : > { %v4709_v16 = vpop.f32.mrf.mxu3  ;;  %v6169_v29 = vor.u32 %v6433_v36, %v6166_v35 }
0x1724   : > { %v4731_v32 = vsel %vm3887_vm8, %v4722_v39, 0.0  ;;  %v4728_v51 = vrot.slane %v4723_v4, 7  ;;  %4913 = vmatpush.bf16.msrb.mxu0 %v6165_v48 }
0x1725   : > { %4732 = vadd.xlane.f32.xlu0 %v4731_v32  ;;  %v6431_v32 = vld [vmem:[#allocation26 + $0x4] sm:$0xf]  ;;  %4926 = vmatpush.bf16.msrb.mxu1 %v6169_v29 }
0x1726   : > { %v4734_v28 = vsel %vm3891_vm2, %v4728_v51, 0.0  ;;  %v6158_v51 = vld [vmem:[#allocation26 + $0x8] sm:$0xf0] }
0x1727   : > { %4735 = vadd.xlane.f32.xlu2 %v4734_v28 }
0x1798   : > { %v4733_v10 = vpop.xlane.xlu0 %4732 }
0x1799   : > { %v4737_v23 = vmul.f32 %v4733_v10, %v8508_v57  ;;  %v6161_v10 = vor.u32 %v6431_v32, %v6158_v51 }
0x179a   : > { %v4736_v20 = vpop.xlane.xlu2 %4735 }
0x179b   : > { %v4738_v18 = vmul.f32 %v4736_v20, %v8508_v57  ;;  %v8913_v59 = vsub.f32 %v4722_v39, %v4737_v23  ;;  %v6156_v39 = vld [vmem:[#allocation26] sm:$0xf]  ;;  %4927 = vmatpush.bf16.msrb.mxu1 %v6161_v10 }
0x179d   : > { %v4741_v33 = vrot.slane %v4738_v18, 1  ;;  %v4746_v3 = vmul.f32 %v8913_v59, %v8913_v59 }
0x179f   : > { %v8908_v41 = vsub.f32 %v4723_v4, %v4741_v33  ;;  %v4753_v6 = vsel %vm3887_vm8, %v4746_v3, 0.0  ;;  %v6432_v4 = vld [vmem:[#allocation26 + $0x4] sm:$0xf0] }
0x17a0   : > { %v6157_v20 = vor.u32 %v6432_v4, %v6156_v39 }
0x17a1   : > { %v4747_v25 = vmul.f32 %v8908_v41, %v8908_v41 }
0x17a2   : > { %4914 = vmatpush.bf16.msrb.mxu0 %v6157_v20 }
0x17a3   : > { %v4750_v38 = vrot.slane %v4747_v25, 7 }
0x17a5   : > { %v4756_v43 = vsel %vm3891_vm2, %v4750_v38, 0.0 }
0x17a6   : > { %4757 = vadd.xlane.f32.xlu0 %v4756_v43 }
0x17ae   : > { %4754 = vadd.xlane.f32.xlu0 %v4753_v6 }
0x1819   : > { %v4758_v2 = vpop.xlane.xlu0 %4757 }
0x181a   : > { %v4760_v49 = vmul.f32 %v4758_v2, %v8508_v57 }
0x181c   : > { %v4762_v1 = vadd.f32 1e-05, %v4760_v49 }
0x181e   : > { %6724 = vrsqrt.f32 %v4762_v1  ;;  %vm4779_vm2 = vweird.f32 %v4762_v1 }
0x1821   : > { %v4755_v16 = vpop.xlane.xlu0 %4754 }
0x1822   : > { %v4759_v28 = vmul.f32 %v4755_v16, %v8508_v57 }
0x1824   : > { %v6725_v18 = vpop.eup %6724  ;;  %v4761_v33 = vadd.f32 1e-05, %v4759_v28 }
0x1825   : > { %v4774_v23 = vmul.f32 %v6725_v18, %v4762_v1  ;;  %vm4780_vm8 = vweird.f32 %v6725_v18 }
0x1826   : > { %6726 = vrsqrt.f32 %v4761_v33  ;;  %vm4781_vm5 = vmor %vm4779_vm2, %vm4780_vm8  ;;  %vm4769_vm6 = vweird.f32 %v4761_v33 }
0x1827   : > { %v4775_v25 = vmul.f32 %v6725_v18, %v4774_v23 }
0x1829   : > { %v4776_v38 = vmul.f32 0.5, %v4775_v25 }
0x182b   : > { %v4777_v43 = vsub.f32 1.5, %v4776_v38 }
0x182c   : > { %v6727_v3 = vpop.eup %6726 }
0x182d   : > { %v4778_v6 = vmul.f32 %v6725_v18, %v4777_v43  ;;  %v4764_v5 = vmul.f32 %v6727_v3, %v4761_v33  ;;  %vm4770_vm3 = vweird.f32 %v6727_v3 }
0x182e   : > { %vm4771_vm7 = vmor %vm4769_vm6, %vm4770_vm3 }
0x182f   : > { %v4782_v57 = vsel %vm4781_vm5, %v6725_v18, %v4778_v6  ;;  %v4765_v53 = vmul.f32 %v6727_v3, %v4764_v5 }
0x1830   : > { %v4785_v8 = vrot.slane %v4782_v57, 1 }
0x1831   : > { %v4766_v15 = vmul.f32 0.5, %v4765_v53 }
0x1832   : > { %v4789_v58 = vmul.f32 %v4785_v8, %v8908_v41 }
0x1833   : > { %v4767_v17 = vsub.f32 1.5, %v4766_v15 }
0x1834   : > { %v4794_v13 = vmul.f32 %v6688_v42, %v4789_v58 }
0x1835   : > { %v4768_v56 = vmul.f32 %v6727_v3, %v4767_v17 }
0x1836   : > { %v4799_v22 = vadd.f32 %v6689_v14, %v4794_v13 }
0x1837   : > { %v4772_v46 = vsel %vm4771_vm7, %v6727_v3, %v4768_v56 }
0x1838   : > { %v4788_v52 = vmul.f32 %v4772_v46, %v8913_v59  ;;  %v4817_v9 = vpack.c.bf16 %v4799_v22, %v4799_v22 }
0x183a   : > { %v4793_v7 = vmul.f32 %v6688_v42, %v4788_v52  ;;  %v4821_v24 = vunpack.c.l.b16 %v4817_v9 }
0x183c   : > { %v4798_v60 = vadd.f32 %v6689_v14, %v4793_v7  ;;  %v4823_v45 = vrot.slane %v4821_v24, 6 }
0x183e   : > { %v4816_v44 = vpack.c.bf16 %v4798_v60, %v4798_v60 }
0x1840   : > { %v4820_v62 = vunpack.c.l.b16 %v4816_v44 }
0x1842   : > { %v4822_v31 = vrot.slane %v4820_v62, 7 }
0x1844   : > { %v4824_v41 = vsel %vm3435_vm14, %v4823_v45, %v4822_v31 }
0x1845   : > { %v4825_v55 = vpack.c.b16 %v4824_v41, %v4824_v41 }
0x1847   : > { %4915 = vmatmul.bf16.vlgmr.msrb.gmra.mxu0 %v4825_v55  ;;  %4928 = vmatmul.bf16.vlgmr.msrb.gmra.mxu1 %v4825_v55 }
0x18c4   : > { %v4916_v30 = vpop.f32.mrf.mxu0  ;;  %v4929_v50 = vpop.f32.mrf.mxu1 }
0x18c5   : > { %v4935_v54 = vrot.slane %v4929_v50, 6 }
0x18c7   : > { %v4937_v26 = vsel %vm4936_vm9, %v4916_v30, %v4935_v54 }
0x18c8   : > { %4939 = vst [vmem:[%s9041_s1] sm:$0xf] %v4937_v26 }
0x18cc   : > { %v4918_v59 = vpop.f32.mrf.mxu0  ;;  %v4931_v61 = vpop.f32.mrf.mxu1 }
0x18cd PF: > { %s9042_s24 = sld [smem:[#allocation39_spill]]  ;;  %s9045_s22 = smov %s7246_s23 }
0x18ce   : > { %s9043_s1 = sld [smem:[#allocation37_spill]] }
0x18cf   : > { %s9044_s14 = sld [smem:[#allocation40_spill]] }
0x18d3   : > { %p48_p8 = scmp.ge.s32.totalorder %s9042_s24, 4  }
0x18d5   : > { %s9046_s23 = smov %s9044_s14  ;;  %50 = sbr.rel (!%p48_p8) target bundleno = 30 (0x1e), region = 296 }
0x18da   :  { %4951 = vsyncpa [#allocation4], 1 }
0x18db   :  { %4953 = vsyncpa [#allocation4 + $0x1], 1 }
0x18dc   :  { %4954 = vsyncpa [#allocation6], 1 }
0x18dd   :  { %4956 = vsyncpa [#allocation6 + $0x1], 1 }
0x18de   :  { %4957 = vsyncpa [#allocation9], 1 }
0x18df   :  { %4959 = vsyncpa [#allocation9 + $0x1], 1 }
0x18e0   :  { %4960 = vsyncpa [#allocation12], 1 }
0x18e1   :  { %4962 = vsyncpa [#allocation12 + $0x1], 1 }
0x18e2   :  { %4963 = vsyncpa [#allocation15], 1 }
0x18e3   :  { %4965 = vsyncpa [#allocation15 + $0x1], 1 }
0x18e4   :  { %4966 = vsyncpa [#allocation18], 1 }
0x18e5   :  { %4968 = vsyncpa [#allocation18 + $0x1], 1 }
0x18e6   :  { %4969 = vsyncpa [#allocation21], 1 }
0x18e7   :  { %4971 = vsyncpa [#allocation21 + $0x1], 1 }
0x18e8   :  { %4972 = vsyncpa [#allocation24], 1 }
0x18e9   :  { %4973 = vsyncpa [#allocation27], 1 }

</bundles_post_ra>
